<compile_context>
chip_gen: v7x
topology: tpu7x:2x2x1
jax: 0.10.0
libtpu: 0.0.40
codegen_flags: <defaults>
</compile_context>

<pallas_src>
import jax
import jax.numpy as jnp
from jax.experimental import pallas as pl
from jax.experimental.pallas import tpu as pltpu

_VMEM_LIMIT = 32 * 1024 * 1024


# ---------------------------------------------------------------------------
# Pallas kernels
# ---------------------------------------------------------------------------
def _conv_pool_kernel(p_ref, w_ref, b_ref, o_ref):
    """o (OC, M) = relu( max_parity( W (OC,K) @ P[parity] (K,M) ) + b (OC,1) ).

    p_ref holds the im2col patches of the four (oh%2, ow%2) output parities, so the
    elementwise max over the leading axis IS the 2x2 max-pool.  MXU matmuls are bf16
    with f32 accumulation; bias/relu in f32."""
    acc = jnp.dot(w_ref[...], p_ref[0], preferred_element_type=jnp.float32)
    for k in range(1, p_ref.shape[0]):
        acc = jnp.maximum(
            acc, jnp.dot(w_ref[...], p_ref[k], preferred_element_type=jnp.float32))
    o_ref[...] = jnp.maximum(acc + b_ref[...], 0.0).astype(o_ref.dtype)


def conv_pool_relu(p4, w_mat, b, out_dtype=jnp.bfloat16):
    """p4: (4, K, M) bf16 parity patch matrices, w_mat: (OC, K), b: (OC, 1).
    Returns the pooled+activated conv output, shape (OC, M), lane-dense."""
    _, K, M = p4.shape
    OC = w_mat.shape[0]
    return pl.pallas_call(
        _conv_pool_kernel,
        out_shape=jax.ShapeDtypeStruct((OC, M), out_dtype),
        grid=(1,),
        in_specs=[pl.BlockSpec((4, K, M), lambda i: (0, 0, 0)),
                  pl.BlockSpec((OC, K), lambda i: (0, 0)),
                  pl.BlockSpec((OC, 1), lambda i: (0, 0))],
        out_specs=pl.BlockSpec((OC, M), lambda i: (0, 0)),
        compiler_params=pltpu.CompilerParams(
            dimension_semantics=("arbitrary",),
            vmem_limit_bytes=_VMEM_LIMIT),
    )(p4, w_mat, b)


def _conv_pool_fc_kernel(p_ref, w_ref, b_ref,
                         w1_ref, b1_ref, w2_ref, b2_ref, w3_ref, b3_ref,
                         o_ref, feat_ref):
    """conv2 matmul + 2x2 pool (parity max) + bias + relu, then flatten to torch's
    (c, h, w) feature order via static-slice copies into a VMEM scratch, then the
    fused fc1 -> relu -> fc2 -> relu -> fc3 -> sigmoid stack.  One launch."""
    acc = jnp.dot(w_ref[...], p_ref[0], preferred_element_type=jnp.float32)
    for k in range(1, p_ref.shape[0]):
        acc = jnp.maximum(
            acc, jnp.dot(w_ref[...], p_ref[k], preferred_element_type=jnp.float32))
    pooled = jnp.maximum(acc + b_ref[...], 0.0)        # (OC, N*S) f32, S = 13*13

    n_batch, n_feat = feat_ref.shape                   # (N, OC*S)
    oc = pooled.shape[0]
    spatial = n_feat // oc                             # S = 169
    # torch.flatten(x, 1): feat[n, c*S + s] = pooled[c, n*S + s]  (static slices only).
    for n in range(n_batch):
        for c in range(oc):
            feat_ref[n:n + 1, c * spatial:(c + 1) * spatial] = pooled[
                c:c + 1, n * spatial:(n + 1) * spatial]
    feat = feat_ref[...].astype(w1_ref.dtype)          # (N, 2704) bf16 for the MXU

    h = jnp.dot(feat, w1_ref[...], preferred_element_type=jnp.float32) + b1_ref[...]
    h = jnp.maximum(h, 0.0)
    h = jnp.dot(h, w2_ref[...], preferred_element_type=jnp.float32) + b2_ref[...]
    h = jnp.maximum(h, 0.0)
    z = jnp.dot(h, w3_ref[...], preferred_element_type=jnp.float32) + b3_ref[...]
    # Numerically stable sigmoid (no inf intermediate): sigmoid(z) = 0.5*(tanh(z/2)+1).
    o_ref[...] = (0.5 * (jnp.tanh(0.5 * z) + 1.0)).astype(o_ref.dtype)


def conv_pool_fc_fused(p4, w_mat, b, w1, b1, w2, b2, w3, b3, n_batch):
    """conv2 + relu + pool + flatten + fc1 + fc2 + fc3 + sigmoid in one pallas_call."""
    _, K, M = p4.shape
    OC = w_mat.shape[0]
    F, H1 = w1.shape
    H2, H3 = w2.shape[1], w3.shape[1]

    def full(shape):
        n = len(shape)
        return pl.BlockSpec(shape, lambda i, _n=n: (0,) * _n)

    return pl.pallas_call(
        _conv_pool_fc_kernel,
        out_shape=jax.ShapeDtypeStruct((n_batch, H3), jnp.float32),
        grid=(1,),
        in_specs=[full((4, K, M)), full((OC, K)), full((OC, 1)),
                  full((F, H1)), full((1, H1)),
                  full((H1, H2)), full((1, H2)),
                  full((H2, H3)), full((1, H3))],
        out_specs=full((n_batch, H3)),
        scratch_shapes=[pltpu.VMEM((n_batch, F), jnp.float32)],
        compiler_params=pltpu.CompilerParams(
            dimension_semantics=("arbitrary",),
            vmem_limit_bytes=_VMEM_LIMIT),
    )(p4, w_mat, b, w1, b1, w2, b2, w3, b3)


# ---------------------------------------------------------------------------
# XLA glue: parity-split im2col (see TODO(synk) above) and one-time param prep.
# ---------------------------------------------------------------------------
def pooled_conv_patches(x_cnhw, kh, kw):
    """x: (C, N, H, W) -> (4, kh*kw*C, N*(OH//2)*(OW//2)) bf16 im2col patch matrices,
    one per (oh%2, ow%2) parity of the 'valid' conv output grid.  Feature order is
    (i, j, c) (matches conv_weight_matrix), column order is (n, oh//2, ow//2)."""
    C, N, H, W = x_cnhw.shape
    OH, OW = H - kh + 1, W - kw + 1
    PH, PW = OH // 2, OW // 2
    parities = []
    for p in range(2):
        for q in range(2):
            slabs = [x_cnhw[:, :, p + i:p + i + 2 * PH - 1:2,
                            q + j:q + j + 2 * PW - 1:2]           # (C, N, PH, PW)
                     for i in range(kh) for j in range(kw)]
            parities.append(
                jnp.stack(slabs, axis=0).reshape(kh * kw * C, N * PH * PW))
    return jnp.stack(parities, axis=0).astype(jnp.bfloat16)


def conv_weight_matrix(w):
    """torch conv weight (OC, C, KH, KW) -> (OC, KH*KW*C), feature order (i, j, c)."""
    OC, C, KH, KW = w.shape
    return w.transpose(0, 2, 3, 1).reshape(OC, KH * KW * C)


def init_params(key):
    """Deterministic init with the torch module's parameter shapes
    (fc weights stored transposed as (in, out); conv weights in torch layout)."""
    ks = jax.random.split(key, 10)

    def u(k, shape, fan_in):
        bound = 1.0 / jnp.sqrt(jnp.float32(fan_in))
        return jax.random.uniform(k, shape, jnp.float32, -bound, bound)

    return {
        "conv1_w": u(ks[0], (6, 1, 5, 5), 1 * 25),
        "conv1_b": u(ks[1], (6,), 1 * 25),
        "conv2_w": u(ks[2], (16, 6, 5, 5), 6 * 25),
        "conv2_b": u(ks[3], (16,), 6 * 25),
        "fc1_w":   u(ks[4], (16 * 13 * 13, 120), 16 * 13 * 13),
        "fc1_b":   u(ks[5], (120,), 16 * 13 * 13),
        "fc2_w":   u(ks[6], (120, 84), 120),
        "fc2_b":   u(ks[7], (84,), 120),
        "fc3_w":   u(ks[8], (84, 1), 84),
        "fc3_b":   u(ks[9], (1,), 84),
    }


def prepare_params(p):
    """One-time parameter prep (hoisted out of the forward pass): conv weights as
    matmul-ready (OC, K) matrices, biases pre-reshaped, big matmul operands in bf16."""
    return {
        "w1m": conv_weight_matrix(p["conv1_w"]).astype(jnp.bfloat16),   # (6, 25)
        "b1":  p["conv1_b"].reshape(-1, 1).astype(jnp.float32),         # (6, 1)
        "w2m": conv_weight_matrix(p["conv2_w"]).astype(jnp.bfloat16),   # (16, 150)
        "b2":  p["conv2_b"].reshape(-1, 1).astype(jnp.float32),         # (16, 1)
        "fc1_w": p["fc1_w"].astype(jnp.bfloat16),                       # (2704, 120)
        "fc1_b": p["fc1_b"].reshape(1, -1).astype(jnp.float32),
        "fc2_w": p["fc2_w"].astype(jnp.float32),
        "fc2_b": p["fc2_b"].reshape(1, -1).astype(jnp.float32),
        "fc3_w": p["fc3_w"].astype(jnp.float32),
        "fc3_b": p["fc3_b"].reshape(1, -1).astype(jnp.float32),
    }


# ---------------------------------------------------------------------------
# Forward pass
# ---------------------------------------------------------------------------
@jax.jit
def net_forward(x, params):
    """x: (N, 1, 64, 64) f32 -> (N, 1) sigmoid outputs.  Two pallas_calls total."""
    N = x.shape[0]
    x_c = jnp.transpose(x, (1, 0, 2, 3))                        # (1, N, 64, 64): free

    # conv1 + relu + 2x2 pool fused in one kernel (pool = max over parity patches).
    p1 = pooled_conv_patches(x_c, 5, 5)                         # (4, 25, N*900) bf16
    pooled1 = conv_pool_relu(p1, params["w1m"], params["b1"])   # (6, N*900) bf16
    pooled1 = pooled1.reshape(6, N, 30, 30)

    # conv2 + relu + 2x2 pool + flatten + fc1/fc2/fc3 + sigmoid in one kernel.
    p2 = pooled_conv_patches(pooled1, 5, 5)                     # (4, 150, N*169) bf16
    return conv_pool_fc_fused(p2, params["w2m"], params["b2"],
                              params["fc1_w"], params["fc1_b"],
                              params["fc2_w"], params["fc2_b"],
                              params["fc3_w"], params["fc3_b"], N)


if __name__ == "__main__":
    key = jax.random.PRNGKey(0)
    kx, kp = jax.random.split(key)
    # 64x64 input is required by the module: after two (conv5 -> 2x2 pool) stages the
    # spatial size is 13, matching fc1's 16*13*13 input features.
    x = jax.random.normal(kx, (2, 1, 64, 64), jnp.float32)
    params = prepare_params(init_params(kp))
    out = jax.block_until_ready(net_forward(x, params))
    assert out.shape == (2, 1)
    assert bool(jnp.all((out >= 0.0) & (out <= 1.0)))
    print("KERNEL_OK")
</pallas_src>

<mosaic_0001>
module attributes {stable_mosaic.version = 11 : i64} {
  func.func @_conv_pool_kernel(%arg0: i32, %arg1: memref<4x25x1800xbf16, #tpu.memory_space<vmem>>, %arg2: memref<6x25xbf16, #tpu.memory_space<vmem>>, %arg3: memref<6x1xf32, #tpu.memory_space<vmem>>, %arg4: memref<6x1800xbf16, #tpu.memory_space<vmem>>) attributes {dimension_semantics = [#tpu.dimension_semantics<arbitrary>], iteration_bounds = array<i64: 1>, scalar_prefetch = 0 : i64, scratch_operands = 0 : i64, tpu.core_type = #tpu.core_type<tc>, window_params = [{pipeline_mode = #tpu.pipeline_mode<synchronous>, transform_indices = @transform_0, window_bounds = array<i64: 4, 25, 1800>}, {pipeline_mode = #tpu.pipeline_mode<synchronous>, transform_indices = @transform_1, window_bounds = array<i64: 6, 25>}, {pipeline_mode = #tpu.pipeline_mode<synchronous>, transform_indices = @transform_2, window_bounds = array<i64: 6, 1>}, {pipeline_mode = #tpu.pipeline_mode<synchronous>, transform_indices = @transform_3, window_bounds = array<i64: 6, 1800>}]} {
    %c0 = arith.constant 0 : index
    %c0_0 = arith.constant 0 : index
    %0 = vector.load %arg2[%c0, %c0_0] : memref<6x25xbf16, #tpu.memory_space<vmem>>, vector<6x25xbf16>
    %c0_1 = arith.constant 0 : index
    %c0_2 = arith.constant 0 : index
    %c0_3 = arith.constant 0 : index
    %1 = vector.load %arg1[%c0_1, %c0_2, %c0_3] : memref<4x25x1800xbf16, #tpu.memory_space<vmem>>, vector<1x25x1800xbf16>
    %2 = vector.shape_cast %1 : vector<1x25x1800xbf16> to vector<25x1800xbf16>
    %cst = arith.constant dense<0.000000e+00> : vector<6x1800xf32>
    %3 = tpu.matmul %0, %2, %cst {dimension_numbers = #tpu.dot_dimension_numbers<[1], [0], [0], [1], [0, 0, 1, 1], [], []>} : vector<6x25xbf16>, vector<25x1800xbf16>, vector<6x1800xf32> -> vector<6x1800xf32>
    %c0_4 = arith.constant 0 : index
    %c0_5 = arith.constant 0 : index
    %4 = vector.load %arg2[%c0_4, %c0_5] : memref<6x25xbf16, #tpu.memory_space<vmem>>, vector<6x25xbf16>
    %c1 = arith.constant 1 : index
    %c0_6 = arith.constant 0 : index
    %c0_7 = arith.constant 0 : index
    %5 = vector.load %arg1[%c1, %c0_6, %c0_7] : memref<4x25x1800xbf16, #tpu.memory_space<vmem>>, vector<1x25x1800xbf16>
    %6 = vector.shape_cast %5 : vector<1x25x1800xbf16> to vector<25x1800xbf16>
    %cst_8 = arith.constant dense<0.000000e+00> : vector<6x1800xf32>
    %7 = tpu.matmul %4, %6, %cst_8 {dimension_numbers = #tpu.dot_dimension_numbers<[1], [0], [0], [1], [0, 0, 1, 1], [], []>} : vector<6x25xbf16>, vector<25x1800xbf16>, vector<6x1800xf32> -> vector<6x1800xf32>
    %8 = arith.maximumf %3, %7 : vector<6x1800xf32>
    %c0_9 = arith.constant 0 : index
    %c0_10 = arith.constant 0 : index
    %9 = vector.load %arg2[%c0_9, %c0_10] : memref<6x25xbf16, #tpu.memory_space<vmem>>, vector<6x25xbf16>
    %c2 = arith.constant 2 : index
    %c0_11 = arith.constant 0 : index
    %c0_12 = arith.constant 0 : index
    %10 = vector.load %arg1[%c2, %c0_11, %c0_12] : memref<4x25x1800xbf16, #tpu.memory_space<vmem>>, vector<1x25x1800xbf16>
    %11 = vector.shape_cast %10 : vector<1x25x1800xbf16> to vector<25x1800xbf16>
    %cst_13 = arith.constant dense<0.000000e+00> : vector<6x1800xf32>
    %12 = tpu.matmul %9, %11, %cst_13 {dimension_numbers = #tpu.dot_dimension_numbers<[1], [0], [0], [1], [0, 0, 1, 1], [], []>} : vector<6x25xbf16>, vector<25x1800xbf16>, vector<6x1800xf32> -> vector<6x1800xf32>
    %13 = arith.maximumf %8, %12 : vector<6x1800xf32>
    %c0_14 = arith.constant 0 : index
    %c0_15 = arith.constant 0 : index
    %14 = vector.load %arg2[%c0_14, %c0_15] : memref<6x25xbf16, #tpu.memory_space<vmem>>, vector<6x25xbf16>
    %c3 = arith.constant 3 : index
    %c0_16 = arith.constant 0 : index
    %c0_17 = arith.constant 0 : index
    %15 = vector.load %arg1[%c3, %c0_16, %c0_17] : memref<4x25x1800xbf16, #tpu.memory_space<vmem>>, vector<1x25x1800xbf16>
    %16 = vector.shape_cast %15 : vector<1x25x1800xbf16> to vector<25x1800xbf16>
    %cst_18 = arith.constant dense<0.000000e+00> : vector<6x1800xf32>
    %17 = tpu.matmul %14, %16, %cst_18 {dimension_numbers = #tpu.dot_dimension_numbers<[1], [0], [0], [1], [0, 0, 1, 1], [], []>} : vector<6x25xbf16>, vector<25x1800xbf16>, vector<6x1800xf32> -> vector<6x1800xf32>
    %18 = arith.maximumf %13, %17 : vector<6x1800xf32>
    %c0_19 = arith.constant 0 : index
    %c0_20 = arith.constant 0 : index
    %19 = vector.load %arg3[%c0_19, %c0_20] : memref<6x1xf32, #tpu.memory_space<vmem>>, vector<6x1xf32>
    %20 = vector.broadcast %19 : vector<6x1xf32> to vector<6x1800xf32>
    %21 = arith.addf %18, %20 : vector<6x1800xf32>
    %cst_21 = arith.constant 0.000000e+00 : f32
    %22 = vector.broadcast %cst_21 : f32 to vector<6x1800xf32>
    %23 = arith.maximumf %21, %22 : vector<6x1800xf32>
    %24 = arith.truncf %23 : vector<6x1800xf32> to vector<6x1800xbf16>
    %c0_22 = arith.constant 0 : index
    %c0_23 = arith.constant 0 : index
    %25 = vector.load %arg4[%c0_22, %c0_23] : memref<6x1800xbf16, #tpu.memory_space<vmem>>, vector<6x1800xbf16>
    tpu.vector_store %arg4[%c0_22, %c0_23], %24 {strides = array<i32>} : memref<6x1800xbf16, #tpu.memory_space<vmem>>, vector<6x1800xbf16>,
    return
  }
  func.func @transform_0(%arg0: i32) -> (i32, i32, i32) {
    %c0_i32 = arith.constant 0 : i32
    %c0_i32_0 = arith.constant 0 : i32
    %c0_i32_1 = arith.constant 0 : i32
    %c0_i32_2 = arith.constant 0 : i32
    return %c0_i32, %c0_i32_0, %c0_i32_1 : i32, i32, i32
  }
  func.func @transform_1(%arg0: i32) -> (i32, i32) {
    %c0_i32 = arith.constant 0 : i32
    %c0_i32_0 = arith.constant 0 : i32
    %c0_i32_1 = arith.constant 0 : i32
    return %c0_i32, %c0_i32_0 : i32, i32
  }
  func.func @transform_2(%arg0: i32) -> (i32, i32) {
    %c0_i32 = arith.constant 0 : i32
    %c0_i32_0 = arith.constant 0 : i32
    %c0_i32_1 = arith.constant 0 : i32
    return %c0_i32, %c0_i32_0 : i32, i32
  }
  func.func @transform_3(%arg0: i32) -> (i32, i32) {
    %c0_i32 = arith.constant 0 : i32
    %c0_i32_0 = arith.constant 0 : i32
    %c0_i32_1 = arith.constant 0 : i32
    return %c0_i32, %c0_i32_0 : i32, i32
  }
}

module attributes {stable_mosaic.version = 11 : i64} {
  func.func @_conv_pool_fc_kernel(%arg0: i32, %arg1: memref<4x150x338xbf16, #tpu.memory_space<vmem>>, %arg2: memref<16x150xbf16, #tpu.memory_space<vmem>>, %arg3: memref<16x1xf32, #tpu.memory_space<vmem>>, %arg4: memref<2704x120xbf16, #tpu.memory_space<vmem>>, %arg5: memref<1x120xf32, #tpu.memory_space<vmem>>, %arg6: memref<120x84xf32, #tpu.memory_space<vmem>>, %arg7: memref<1x84xf32, #tpu.memory_space<vmem>>, %arg8: memref<84x1xf32, #tpu.memory_space<vmem>>, %arg9: memref<1x1xf32, #tpu.memory_space<vmem>>, %arg10: memref<2x1xf32, #tpu.memory_space<vmem>>, %arg11: memref<2x2704xf32, #tpu.memory_space<vmem>>) attributes {dimension_semantics = [#tpu.dimension_semantics<arbitrary>], iteration_bounds = array<i64: 1>, scalar_prefetch = 0 : i64, scratch_operands = 1 : i64, tpu.core_type = #tpu.core_type<tc>, window_params = [{pipeline_mode = #tpu.pipeline_mode<synchronous>, transform_indices = @transform_0, window_bounds = array<i64: 4, 150, 338>}, {pipeline_mode = #tpu.pipeline_mode<synchronous>, transform_indices = @transform_1, window_bounds = array<i64: 16, 150>}, {pipeline_mode = #tpu.pipeline_mode<synchronous>, transform_indices = @transform_2, window_bounds = array<i64: 16, 1>}, {pipeline_mode = #tpu.pipeline_mode<synchronous>, transform_indices = @transform_3, window_bounds = array<i64: 2704, 120>}, {pipeline_mode = #tpu.pipeline_mode<synchronous>, transform_indices = @transform_4, window_bounds = array<i64: 1, 120>}, {pipeline_mode = #tpu.pipeline_mode<synchronous>, transform_indices = @transform_5, window_bounds = array<i64: 120, 84>}, {pipeline_mode = #tpu.pipeline_mode<synchronous>, transform_indices = @transform_6, window_bounds = array<i64: 1, 84>}, {pipeline_mode = #tpu.pipeline_mode<synchronous>, transform_indices = @transform_7, window_bounds = array<i64: 84, 1>}, {pipeline_mode = #tpu.pipeline_mode<synchronous>, transform_indices = @transform_8, window_bounds = array<i64: 1, 1>}, {pipeline_mode = #tpu.pipeline_mode<synchronous>, transform_indices = @transform_9, window_bounds = array<i64: 2, 1>}]} {
    %c0 = arith.constant 0 : index
    %c0_0 = arith.constant 0 : index
    %0 = vector.load %arg2[%c0, %c0_0] : memref<16x150xbf16, #tpu.memory_space<vmem>>, vector<16x150xbf16>
    %c0_1 = arith.constant 0 : index
    %c0_2 = arith.constant 0 : index
    %c0_3 = arith.constant 0 : index
    %1 = vector.load %arg1[%c0_1, %c0_2, %c0_3] : memref<4x150x338xbf16, #tpu.memory_space<vmem>>, vector<1x150x338xbf16>
    %2 = vector.shape_cast %1 : vector<1x150x338xbf16> to vector<150x338xbf16>
    %cst = arith.constant dense<0.000000e+00> : vector<16x338xf32>
    %3 = tpu.matmul %0, %2, %cst {dimension_numbers = #tpu.dot_dimension_numbers<[1], [0], [0], [1], [0, 0, 1, 1], [], []>} : vector<16x150xbf16>, vector<150x338xbf16>, vector<16x338xf32> -> vector<16x338xf32>
    %c0_4 = arith.constant 0 : index
    %c0_5 = arith.constant 0 : index
    %4 = vector.load %arg2[%c0_4, %c0_5] : memref<16x150xbf16, #tpu.memory_space<vmem>>, vector<16x150xbf16>
    %c1 = arith.constant 1 : index
    %c0_6 = arith.constant 0 : index
    %c0_7 = arith.constant 0 : index
    %5 = vector.load %arg1[%c1, %c0_6, %c0_7] : memref<4x150x338xbf16, #tpu.memory_space<vmem>>, vector<1x150x338xbf16>
    %6 = vector.shape_cast %5 : vector<1x150x338xbf16> to vector<150x338xbf16>
    %cst_8 = arith.constant dense<0.000000e+00> : vector<16x338xf32>
    %7 = tpu.matmul %4, %6, %cst_8 {dimension_numbers = #tpu.dot_dimension_numbers<[1], [0], [0], [1], [0, 0, 1, 1], [], []>} : vector<16x150xbf16>, vector<150x338xbf16>, vector<16x338xf32> -> vector<16x338xf32>
    %8 = arith.maximumf %3, %7 : vector<16x338xf32>
    %c0_9 = arith.constant 0 : index
    %c0_10 = arith.constant 0 : index
    %9 = vector.load %arg2[%c0_9, %c0_10] : memref<16x150xbf16, #tpu.memory_space<vmem>>, vector<16x150xbf16>
    %c2 = arith.constant 2 : index
    %c0_11 = arith.constant 0 : index
    %c0_12 = arith.constant 0 : index
    %10 = vector.load %arg1[%c2, %c0_11, %c0_12] : memref<4x150x338xbf16, #tpu.memory_space<vmem>>, vector<1x150x338xbf16>
    %11 = vector.shape_cast %10 : vector<1x150x338xbf16> to vector<150x338xbf16>
    %cst_13 = arith.constant dense<0.000000e+00> : vector<16x338xf32>
    %12 = tpu.matmul %9, %11, %cst_13 {dimension_numbers = #tpu.dot_dimension_numbers<[1], [0], [0], [1], [0, 0, 1, 1], [], []>} : vector<16x150xbf16>, vector<150x338xbf16>, vector<16x338xf32> -> vector<16x338xf32>
    %13 = arith.maximumf %8, %12 : vector<16x338xf32>
    %c0_14 = arith.constant 0 : index
    %c0_15 = arith.constant 0 : index
    %14 = vector.load %arg2[%c0_14, %c0_15] : memref<16x150xbf16, #tpu.memory_space<vmem>>, vector<16x150xbf16>
    %c3 = arith.constant 3 : index
    %c0_16 = arith.constant 0 : index
    %c0_17 = arith.constant 0 : index
    %15 = vector.load %arg1[%c3, %c0_16, %c0_17] : memref<4x150x338xbf16, #tpu.memory_space<vmem>>, vector<1x150x338xbf16>
    %16 = vector.shape_cast %15 : vector<1x150x338xbf16> to vector<150x338xbf16>
    %cst_18 = arith.constant dense<0.000000e+00> : vector<16x338xf32>
    %17 = tpu.matmul %14, %16, %cst_18 {dimension_numbers = #tpu.dot_dimension_numbers<[1], [0], [0], [1], [0, 0, 1, 1], [], []>} : vector<16x150xbf16>, vector<150x338xbf16>, vector<16x338xf32> -> vector<16x338xf32>
    %18 = arith.maximumf %13, %17 : vector<16x338xf32>
    %c0_19 = arith.constant 0 : index
    %c0_20 = arith.constant 0 : index
    %19 = vector.load %arg3[%c0_19, %c0_20] : memref<16x1xf32, #tpu.memory_space<vmem>>, vector<16x1xf32>
    %20 = vector.broadcast %19 : vector<16x1xf32> to vector<16x338xf32>
    %21 = arith.addf %18, %20 : vector<16x338xf32>
    %cst_21 = arith.constant 0.000000e+00 : f32
    %22 = vector.broadcast %cst_21 : f32 to vector<16x338xf32>
    %23 = arith.maximumf %21, %22 : vector<16x338xf32>
    %24 = vector.extract_strided_slice %23 {offsets = [0, 0], sizes = [1, 169], strides = [1, 1]} : vector<16x338xf32> to vector<1x169xf32>
    %c0_22 = arith.constant 0 : index
    %c0_23 = arith.constant 0 : index
    %25 = vector.load %arg11[%c0_22, %c0_23] : memref<2x2704xf32, #tpu.memory_space<vmem>>, vector<1x169xf32>
    tpu.vector_store %arg11[%c0_22, %c0_23], %24 {strides = array<i32>} : memref<2x2704xf32, #tpu.memory_space<vmem>>, vector<1x169xf32>,
    %26 = vector.extract_strided_slice %23 {offsets = [1, 0], sizes = [1, 169], strides = [1, 1]} : vector<16x338xf32> to vector<1x169xf32>
    %c0_24 = arith.constant 0 : index
    %c169 = arith.constant 169 : index
    %27 = vector.load %arg11[%c0_24, %c169] : memref<2x2704xf32, #tpu.memory_space<vmem>>, vector<1x169xf32>
    tpu.vector_store %arg11[%c0_24, %c169], %26 {strides = array<i32>} : memref<2x2704xf32, #tpu.memory_space<vmem>>, vector<1x169xf32>,
    %28 = vector.extract_strided_slice %23 {offsets = [2, 0], sizes = [1, 169], strides = [1, 1]} : vector<16x338xf32> to vector<1x169xf32>
    %c0_25 = arith.constant 0 : index
    %c338 = arith.constant 338 : index
    %29 = vector.load %arg11[%c0_25, %c338] : memref<2x2704xf32, #tpu.memory_space<vmem>>, vector<1x169xf32>
    tpu.vector_store %arg11[%c0_25, %c338], %28 {strides = array<i32>} : memref<2x2704xf32, #tpu.memory_space<vmem>>, vector<1x169xf32>,
    %30 = vector.extract_strided_slice %23 {offsets = [3, 0], sizes = [1, 169], strides = [1, 1]} : vector<16x338xf32> to vector<1x169xf32>
    %c0_26 = arith.constant 0 : index
    %c507 = arith.constant 507 : index
    %31 = vector.load %arg11[%c0_26, %c507] : memref<2x2704xf32, #tpu.memory_space<vmem>>, vector<1x169xf32>
    tpu.vector_store %arg11[%c0_26, %c507], %30 {strides = array<i32>} : memref<2x2704xf32, #tpu.memory_space<vmem>>, vector<1x169xf32>,
    %32 = vector.extract_strided_slice %23 {offsets = [4, 0], sizes = [1, 169], strides = [1, 1]} : vector<16x338xf32> to vector<1x169xf32>
    %c0_27 = arith.constant 0 : index
    %c676 = arith.constant 676 : index
    %33 = vector.load %arg11[%c0_27, %c676] : memref<2x2704xf32, #tpu.memory_space<vmem>>, vector<1x169xf32>
    tpu.vector_store %arg11[%c0_27, %c676], %32 {strides = array<i32>} : memref<2x2704xf32, #tpu.memory_space<vmem>>, vector<1x169xf32>,
    %34 = vector.extract_strided_slice %23 {offsets = [5, 0], sizes = [1, 169], strides = [1, 1]} : vector<16x338xf32> to vector<1x169xf32>
    %c0_28 = arith.constant 0 : index
    %c845 = arith.constant 845 : index
    %35 = vector.load %arg11[%c0_28, %c845] : memref<2x2704xf32, #tpu.memory_space<vmem>>, vector<1x169xf32>
    tpu.vector_store %arg11[%c0_28, %c845], %34 {strides = array<i32>} : memref<2x2704xf32, #tpu.memory_space<vmem>>, vector<1x169xf32>,
    %36 = vector.extract_strided_slice %23 {offsets = [6, 0], sizes = [1, 169], strides = [1, 1]} : vector<16x338xf32> to vector<1x169xf32>
    %c0_29 = arith.constant 0 : index
    %c1014 = arith.constant 1014 : index
    %37 = vector.load %arg11[%c0_29, %c1014] : memref<2x2704xf32, #tpu.memory_space<vmem>>, vector<1x169xf32>
    tpu.vector_store %arg11[%c0_29, %c1014], %36 {strides = array<i32>} : memref<2x2704xf32, #tpu.memory_space<vmem>>, vector<1x169xf32>,
    %38 = vector.extract_strided_slice %23 {offsets = [7, 0], sizes = [1, 169], strides = [1, 1]} : vector<16x338xf32> to vector<1x169xf32>
    %c0_30 = arith.constant 0 : index
    %c1183 = arith.constant 1183 : index
    %39 = vector.load %arg11[%c0_30, %c1183] : memref<2x2704xf32, #tpu.memory_space<vmem>>, vector<1x169xf32>
    tpu.vector_store %arg11[%c0_30, %c1183], %38 {strides = array<i32>} : memref<2x2704xf32, #tpu.memory_space<vmem>>, vector<1x169xf32>,
    %40 = vector.extract_strided_slice %23 {offsets = [8, 0], sizes = [1, 169], strides = [1, 1]} : vector<16x338xf32> to vector<1x169xf32>
    %c0_31 = arith.constant 0 : index
    %c1352 = arith.constant 1352 : index
    %41 = vector.load %arg11[%c0_31, %c1352] : memref<2x2704xf32, #tpu.memory_space<vmem>>, vector<1x169xf32>
    tpu.vector_store %arg11[%c0_31, %c1352], %40 {strides = array<i32>} : memref<2x2704xf32, #tpu.memory_space<vmem>>, vector<1x169xf32>,
    %42 = vector.extract_strided_slice %23 {offsets = [9, 0], sizes = [1, 169], strides = [1, 1]} : vector<16x338xf32> to vector<1x169xf32>
    %c0_32 = arith.constant 0 : index
    %c1521 = arith.constant 1521 : index
    %43 = vector.load %arg11[%c0_32, %c1521] : memref<2x2704xf32, #tpu.memory_space<vmem>>, vector<1x169xf32>
    tpu.vector_store %arg11[%c0_32, %c1521], %42 {strides = array<i32>} : memref<2x2704xf32, #tpu.memory_space<vmem>>, vector<1x169xf32>,
    %44 = vector.extract_strided_slice %23 {offsets = [10, 0], sizes = [1, 169], strides = [1, 1]} : vector<16x338xf32> to vector<1x169xf32>
    %c0_33 = arith.constant 0 : index
    %c1690 = arith.constant 1690 : index
    %45 = vector.load %arg11[%c0_33, %c1690] : memref<2x2704xf32, #tpu.memory_space<vmem>>, vector<1x169xf32>
    tpu.vector_store %arg11[%c0_33, %c1690], %44 {strides = array<i32>} : memref<2x2704xf32, #tpu.memory_space<vmem>>, vector<1x169xf32>,
    %46 = vector.extract_strided_slice %23 {offsets = [11, 0], sizes = [1, 169], strides = [1, 1]} : vector<16x338xf32> to vector<1x169xf32>
    %c0_34 = arith.constant 0 : index
    %c1859 = arith.constant 1859 : index
    %47 = vector.load %arg11[%c0_34, %c1859] : memref<2x2704xf32, #tpu.memory_space<vmem>>, vector<1x169xf32>
    tpu.vector_store %arg11[%c0_34, %c1859], %46 {strides = array<i32>} : memref<2x2704xf32, #tpu.memory_space<vmem>>, vector<1x169xf32>,
    %48 = vector.extract_strided_slice %23 {offsets = [12, 0], sizes = [1, 169], strides = [1, 1]} : vector<16x338xf32> to vector<1x169xf32>
    %c0_35 = arith.constant 0 : index
    %c2028 = arith.constant 2028 : index
    %49 = vector.load %arg11[%c0_35, %c2028] : memref<2x2704xf32, #tpu.memory_space<vmem>>, vector<1x169xf32>
    tpu.vector_store %arg11[%c0_35, %c2028], %48 {strides = array<i32>} : memref<2x2704xf32, #tpu.memory_space<vmem>>, vector<1x169xf32>,
    %50 = vector.extract_strided_slice %23 {offsets = [13, 0], sizes = [1, 169], strides = [1, 1]} : vector<16x338xf32> to vector<1x169xf32>
    %c0_36 = arith.constant 0 : index
    %c2197 = arith.constant 2197 : index
    %51 = vector.load %arg11[%c0_36, %c2197] : memref<2x2704xf32, #tpu.memory_space<vmem>>, vector<1x169xf32>
    tpu.vector_store %arg11[%c0_36, %c2197], %50 {strides = array<i32>} : memref<2x2704xf32, #tpu.memory_space<vmem>>, vector<1x169xf32>,
    %52 = vector.extract_strided_slice %23 {offsets = [14, 0], sizes = [1, 169], strides = [1, 1]} : vector<16x338xf32> to vector<1x169xf32>
    %c0_37 = arith.constant 0 : index
    %c2366 = arith.constant 2366 : index
    %53 = vector.load %arg11[%c0_37, %c2366] : memref<2x2704xf32, #tpu.memory_space<vmem>>, vector<1x169xf32>
    tpu.vector_store %arg11[%c0_37, %c2366], %52 {strides = array<i32>} : memref<2x2704xf32, #tpu.memory_space<vmem>>, vector<1x169xf32>,
    %54 = vector.extract_strided_slice %23 {offsets = [15, 0], sizes = [1, 169], strides = [1, 1]} : vector<16x338xf32> to vector<1x169xf32>
    %c0_38 = arith.constant 0 : index
    %c2535 = arith.constant 2535 : index
    %55 = vector.load %arg11[%c0_38, %c2535] : memref<2x2704xf32, #tpu.memory_space<vmem>>, vector<1x169xf32>
    tpu.vector_store %arg11[%c0_38, %c2535], %54 {strides = array<i32>} : memref<2x2704xf32, #tpu.memory_space<vmem>>, vector<1x169xf32>,
    %56 = vector.extract_strided_slice %23 {offsets = [0, 169], sizes = [1, 169], strides = [1, 1]} : vector<16x338xf32> to vector<1x169xf32>
    %c1_39 = arith.constant 1 : index
    %c0_40 = arith.constant 0 : index
    %57 = vector.load %arg11[%c1_39, %c0_40] : memref<2x2704xf32, #tpu.memory_space<vmem>>, vector<1x169xf32>
    tpu.vector_store %arg11[%c1_39, %c0_40], %56 {strides = array<i32>} : memref<2x2704xf32, #tpu.memory_space<vmem>>, vector<1x169xf32>,
    %58 = vector.extract_strided_slice %23 {offsets = [1, 169], sizes = [1, 169], strides = [1, 1]} : vector<16x338xf32> to vector<1x169xf32>
    %c1_41 = arith.constant 1 : index
    %c169_42 = arith.constant 169 : index
    %59 = vector.load %arg11[%c1_41, %c169_42] : memref<2x2704xf32, #tpu.memory_space<vmem>>, vector<1x169xf32>
    tpu.vector_store %arg11[%c1_41, %c169_42], %58 {strides = array<i32>} : memref<2x2704xf32, #tpu.memory_space<vmem>>, vector<1x169xf32>,
    %60 = vector.extract_strided_slice %23 {offsets = [2, 169], sizes = [1, 169], strides = [1, 1]} : vector<16x338xf32> to vector<1x169xf32>
    %c1_43 = arith.constant 1 : index
    %c338_44 = arith.constant 338 : index
    %61 = vector.load %arg11[%c1_43, %c338_44] : memref<2x2704xf32, #tpu.memory_space<vmem>>, vector<1x169xf32>
    tpu.vector_store %arg11[%c1_43, %c338_44], %60 {strides = array<i32>} : memref<2x2704xf32, #tpu.memory_space<vmem>>, vector<1x169xf32>,
    %62 = vector.extract_strided_slice %23 {offsets = [3, 169], sizes = [1, 169], strides = [1, 1]} : vector<16x338xf32> to vector<1x169xf32>
    %c1_45 = arith.constant 1 : index
    %c507_46 = arith.constant 507 : index
    %63 = vector.load %arg11[%c1_45, %c507_46] : memref<2x2704xf32, #tpu.memory_space<vmem>>, vector<1x169xf32>
    tpu.vector_store %arg11[%c1_45, %c507_46], %62 {strides = array<i32>} : memref<2x2704xf32, #tpu.memory_space<vmem>>, vector<1x169xf32>,
    %64 = vector.extract_strided_slice %23 {offsets = [4, 169], sizes = [1, 169], strides = [1, 1]} : vector<16x338xf32> to vector<1x169xf32>
    %c1_47 = arith.constant 1 : index
    %c676_48 = arith.constant 676 : index
    %65 = vector.load %arg11[%c1_47, %c676_48] : memref<2x2704xf32, #tpu.memory_space<vmem>>, vector<1x169xf32>
    tpu.vector_store %arg11[%c1_47, %c676_48], %64 {strides = array<i32>} : memref<2x2704xf32, #tpu.memory_space<vmem>>, vector<1x169xf32>,
    %66 = vector.extract_strided_slice %23 {offsets = [5, 169], sizes = [1, 169], strides = [1, 1]} : vector<16x338xf32> to vector<1x169xf32>
    %c1_49 = arith.constant 1 : index
    %c845_50 = arith.constant 845 : index
    %67 = vector.load %arg11[%c1_49, %c845_50] : memref<2x2704xf32, #tpu.memory_space<vmem>>, vector<1x169xf32>
    tpu.vector_store %arg11[%c1_49, %c845_50], %66 {strides = array<i32>} : memref<2x2704xf32, #tpu.memory_space<vmem>>, vector<1x169xf32>,
    %68 = vector.extract_strided_slice %23 {offsets = [6, 169], sizes = [1, 169], strides = [1, 1]} : vector<16x338xf32> to vector<1x169xf32>
    %c1_51 = arith.constant 1 : index
    %c1014_52 = arith.constant 1014 : index
    %69 = vector.load %arg11[%c1_51, %c1014_52] : memref<2x2704xf32, #tpu.memory_space<vmem>>, vector<1x169xf32>
    tpu.vector_store %arg11[%c1_51, %c1014_52], %68 {strides = array<i32>} : memref<2x2704xf32, #tpu.memory_space<vmem>>, vector<1x169xf32>,
    %70 = vector.extract_strided_slice %23 {offsets = [7, 169], sizes = [1, 169], strides = [1, 1]} : vector<16x338xf32> to vector<1x169xf32>
    %c1_53 = arith.constant 1 : index
    %c1183_54 = arith.constant 1183 : index
    %71 = vector.load %arg11[%c1_53, %c1183_54] : memref<2x2704xf32, #tpu.memory_space<vmem>>, vector<1x169xf32>
    tpu.vector_store %arg11[%c1_53, %c1183_54], %70 {strides = array<i32>} : memref<2x2704xf32, #tpu.memory_space<vmem>>, vector<1x169xf32>,
    %72 = vector.extract_strided_slice %23 {offsets = [8, 169], sizes = [1, 169], strides = [1, 1]} : vector<16x338xf32> to vector<1x169xf32>
    %c1_55 = arith.constant 1 : index
    %c1352_56 = arith.constant 1352 : index
    %73 = vector.load %arg11[%c1_55, %c1352_56] : memref<2x2704xf32, #tpu.memory_space<vmem>>, vector<1x169xf32>
    tpu.vector_store %arg11[%c1_55, %c1352_56], %72 {strides = array<i32>} : memref<2x2704xf32, #tpu.memory_space<vmem>>, vector<1x169xf32>,
    %74 = vector.extract_strided_slice %23 {offsets = [9, 169], sizes = [1, 169], strides = [1, 1]} : vector<16x338xf32> to vector<1x169xf32>
    %c1_57 = arith.constant 1 : index
    %c1521_58 = arith.constant 1521 : index
    %75 = vector.load %arg11[%c1_57, %c1521_58] : memref<2x2704xf32, #tpu.memory_space<vmem>>, vector<1x169xf32>
    tpu.vector_store %arg11[%c1_57, %c1521_58], %74 {strides = array<i32>} : memref<2x2704xf32, #tpu.memory_space<vmem>>, vector<1x169xf32>,
    %76 = vector.extract_strided_slice %23 {offsets = [10, 169], sizes = [1, 169], strides = [1, 1]} : vector<16x338xf32> to vector<1x169xf32>
    %c1_59 = arith.constant 1 : index
    %c1690_60 = arith.constant 1690 : index
    %77 = vector.load %arg11[%c1_59, %c1690_60] : memref<2x2704xf32, #tpu.memory_space<vmem>>, vector<1x169xf32>
    tpu.vector_store %arg11[%c1_59, %c1690_60], %76 {strides = array<i32>} : memref<2x2704xf32, #tpu.memory_space<vmem>>, vector<1x169xf32>,
    %78 = vector.extract_strided_slice %23 {offsets = [11, 169], sizes = [1, 169], strides = [1, 1]} : vector<16x338xf32> to vector<1x169xf32>
    %c1_61 = arith.constant 1 : index
    %c1859_62 = arith.constant 1859 : index
    %79 = vector.load %arg11[%c1_61, %c1859_62] : memref<2x2704xf32, #tpu.memory_space<vmem>>, vector<1x169xf32>
    tpu.vector_store %arg11[%c1_61, %c1859_62], %78 {strides = array<i32>} : memref<2x2704xf32, #tpu.memory_space<vmem>>, vector<1x169xf32>,
    %80 = vector.extract_strided_slice %23 {offsets = [12, 169], sizes = [1, 169], strides = [1, 1]} : vector<16x338xf32> to vector<1x169xf32>
    %c1_63 = arith.constant 1 : index
    %c2028_64 = arith.constant 2028 : index
    %81 = vector.load %arg11[%c1_63, %c2028_64] : memref<2x2704xf32, #tpu.memory_space<vmem>>, vector<1x169xf32>
    tpu.vector_store %arg11[%c1_63, %c2028_64], %80 {strides = array<i32>} : memref<2x2704xf32, #tpu.memory_space<vmem>>, vector<1x169xf32>,
    %82 = vector.extract_strided_slice %23 {offsets = [13, 169], sizes = [1, 169], strides = [1, 1]} : vector<16x338xf32> to vector<1x169xf32>
    %c1_65 = arith.constant 1 : index
    %c2197_66 = arith.constant 2197 : index
    %83 = vector.load %arg11[%c1_65, %c2197_66] : memref<2x2704xf32, #tpu.memory_space<vmem>>, vector<1x169xf32>
    tpu.vector_store %arg11[%c1_65, %c2197_66], %82 {strides = array<i32>} : memref<2x2704xf32, #tpu.memory_space<vmem>>, vector<1x169xf32>,
    %84 = vector.extract_strided_slice %23 {offsets = [14, 169], sizes = [1, 169], strides = [1, 1]} : vector<16x338xf32> to vector<1x169xf32>
    %c1_67 = arith.constant 1 : index
    %c2366_68 = arith.constant 2366 : index
    %85 = vector.load %arg11[%c1_67, %c2366_68] : memref<2x2704xf32, #tpu.memory_space<vmem>>, vector<1x169xf32>
    tpu.vector_store %arg11[%c1_67, %c2366_68], %84 {strides = array<i32>} : memref<2x2704xf32, #tpu.memory_space<vmem>>, vector<1x169xf32>,
    %86 = vector.extract_strided_slice %23 {offsets = [15, 169], sizes = [1, 169], strides = [1, 1]} : vector<16x338xf32> to vector<1x169xf32>
    %c1_69 = arith.constant 1 : index
    %c2535_70 = arith.constant 2535 : index
    %87 = vector.load %arg11[%c1_69, %c2535_70] : memref<2x2704xf32, #tpu.memory_space<vmem>>, vector<1x169xf32>
    tpu.vector_store %arg11[%c1_69, %c2535_70], %86 {strides = array<i32>} : memref<2x2704xf32, #tpu.memory_space<vmem>>, vector<1x169xf32>,
    %c0_71 = arith.constant 0 : index
    %c0_72 = arith.constant 0 : index
    %88 = vector.load %arg11[%c0_71, %c0_72] : memref<2x2704xf32, #tpu.memory_space<vmem>>, vector<2x2704xf32>
    %89 = arith.truncf %88 : vector<2x2704xf32> to vector<2x2704xbf16>
    %c0_73 = arith.constant 0 : index
    %c0_74 = arith.constant 0 : index
    %90 = vector.load %arg4[%c0_73, %c0_74] : memref<2704x120xbf16, #tpu.memory_space<vmem>>, vector<2704x120xbf16>
    %cst_75 = arith.constant dense<0.000000e+00> : vector<2x120xf32>
    %91 = tpu.matmul %89, %90, %cst_75 {dimension_numbers = #tpu.dot_dimension_numbers<[1], [0], [0], [1], [0, 0, 1, 1], [], []>} : vector<2x2704xbf16>, vector<2704x120xbf16>, vector<2x120xf32> -> vector<2x120xf32>
    %c0_76 = arith.constant 0 : index
    %c0_77 = arith.constant 0 : index
    %92 = vector.load %arg5[%c0_76, %c0_77] : memref<1x120xf32, #tpu.memory_space<vmem>>, vector<1x120xf32>
    %93 = vector.broadcast %92 : vector<1x120xf32> to vector<2x120xf32>
    %94 = arith.addf %91, %93 : vector<2x120xf32>
    %cst_78 = arith.constant 0.000000e+00 : f32
    %95 = vector.broadcast %cst_78 : f32 to vector<2x120xf32>
    %96 = arith.maximumf %94, %95 : vector<2x120xf32>
    %c0_79 = arith.constant 0 : index
    %c0_80 = arith.constant 0 : index
    %97 = vector.load %arg6[%c0_79, %c0_80] : memref<120x84xf32, #tpu.memory_space<vmem>>, vector<120x84xf32>
    %cst_81 = arith.constant dense<0.000000e+00> : vector<2x84xf32>
    %98 = tpu.matmul %96, %97, %cst_81 {dimension_numbers = #tpu.dot_dimension_numbers<[1], [0], [0], [1], [0, 0, 1, 1], [], []>} : vector<2x120xf32>, vector<120x84xf32>, vector<2x84xf32> -> vector<2x84xf32>
    %c0_82 = arith.constant 0 : index
    %c0_83 = arith.constant 0 : index
    %99 = vector.load %arg7[%c0_82, %c0_83] : memref<1x84xf32, #tpu.memory_space<vmem>>, vector<1x84xf32>
    %100 = vector.broadcast %99 : vector<1x84xf32> to vector<2x84xf32>
    %101 = arith.addf %98, %100 : vector<2x84xf32>
    %cst_84 = arith.constant 0.000000e+00 : f32
    %102 = vector.broadcast %cst_84 : f32 to vector<2x84xf32>
    %103 = arith.maximumf %101, %102 : vector<2x84xf32>
    %c0_85 = arith.constant 0 : index
    %c0_86 = arith.constant 0 : index
    %104 = vector.load %arg8[%c0_85, %c0_86] : memref<84x1xf32, #tpu.memory_space<vmem>>, vector<84x1xf32>
    %cst_87 = arith.constant dense<0.000000e+00> : vector<2x1xf32>
    %105 = tpu.matmul %103, %104, %cst_87 {dimension_numbers = #tpu.dot_dimension_numbers<[1], [0], [0], [1], [0, 0, 1, 1], [], []>} : vector<2x84xf32>, vector<84x1xf32>, vector<2x1xf32> -> vector<2x1xf32>
    %c0_88 = arith.constant 0 : index
    %c0_89 = arith.constant 0 : index
    %106 = vector.load %arg9[%c0_88, %c0_89] : memref<1x1xf32, #tpu.memory_space<vmem>>, vector<1x1xf32>
    %107 = vector.broadcast %106 : vector<1x1xf32> to vector<2x1xf32>
    %108 = arith.addf %105, %107 : vector<2x1xf32>
    %cst_90 = arith.constant 5.000000e-01 : f32
    %109 = vector.broadcast %cst_90 : f32 to vector<2x1xf32>
    %110 = arith.mulf %109, %108 : vector<2x1xf32>
    %111 = math.tanh %110 : vector<2x1xf32>
    %cst_91 = arith.constant 1.000000e+00 : f32
    %112 = vector.broadcast %cst_91 : f32 to vector<2x1xf32>
    %113 = arith.addf %111, %112 : vector<2x1xf32>
    %cst_92 = arith.constant 5.000000e-01 : f32
    %114 = vector.broadcast %cst_92 : f32 to vector<2x1xf32>
    %115 = arith.mulf %114, %113 : vector<2x1xf32>
    %c0_93 = arith.constant 0 : index
    %c0_94 = arith.constant 0 : index
    %116 = vector.load %arg10[%c0_93, %c0_94] : memref<2x1xf32, #tpu.memory_space<vmem>>, vector<2x1xf32>
    tpu.vector_store %arg10[%c0_93, %c0_94], %115 {strides = array<i32>} : memref<2x1xf32, #tpu.memory_space<vmem>>, vector<2x1xf32>,
    return
  }
  func.func @transform_0(%arg0: i32) -> (i32, i32, i32) {
    %c0_i32 = arith.constant 0 : i32
    %c0_i32_0 = arith.constant 0 : i32
    %c0_i32_1 = arith.constant 0 : i32
    %c0_i32_2 = arith.constant 0 : i32
    return %c0_i32, %c0_i32_0, %c0_i32_1 : i32, i32, i32
  }
  func.func @transform_1(%arg0: i32) -> (i32, i32) {
    %c0_i32 = arith.constant 0 : i32
    %c0_i32_0 = arith.constant 0 : i32
    %c0_i32_1 = arith.constant 0 : i32
    return %c0_i32, %c0_i32_0 : i32, i32
  }
  func.func @transform_2(%arg0: i32) -> (i32, i32) {
    %c0_i32 = arith.constant 0 : i32
    %c0_i32_0 = arith.constant 0 : i32
    %c0_i32_1 = arith.constant 0 : i32
    return %c0_i32, %c0_i32_0 : i32, i32
  }
  func.func @transform_3(%arg0: i32) -> (i32, i32) {
    %c0_i32 = arith.constant 0 : i32
    %c0_i32_0 = arith.constant 0 : i32
    %c0_i32_1 = arith.constant 0 : i32
    return %c0_i32, %c0_i32_0 : i32, i32
  }
  func.func @transform_4(%arg0: i32) -> (i32, i32) {
    %c0_i32 = arith.constant 0 : i32
    %c0_i32_0 = arith.constant 0 : i32
    %c0_i32_1 = arith.constant 0 : i32
    return %c0_i32, %c0_i32_0 : i32, i32
  }
  func.func @transform_5(%arg0: i32) -> (i32, i32) {
    %c0_i32 = arith.constant 0 : i32
    %c0_i32_0 = arith.constant 0 : i32
    %c0_i32_1 = arith.constant 0 : i32
    return %c0_i32, %c0_i32_0 : i32, i32
  }
  func.func @transform_6(%arg0: i32) -> (i32, i32) {
    %c0_i32 = arith.constant 0 : i32
    %c0_i32_0 = arith.constant 0 : i32
    %c0_i32_1 = arith.constant 0 : i32
    return %c0_i32, %c0_i32_0 : i32, i32
  }
  func.func @transform_7(%arg0: i32) -> (i32, i32) {
    %c0_i32 = arith.constant 0 : i32
    %c0_i32_0 = arith.constant 0 : i32
    %c0_i32_1 = arith.constant 0 : i32
    return %c0_i32, %c0_i32_0 : i32, i32
  }
  func.func @transform_8(%arg0: i32) -> (i32, i32) {
    %c0_i32 = arith.constant 0 : i32
    %c0_i32_0 = arith.constant 0 : i32
    %c0_i32_1 = arith.constant 0 : i32
    return %c0_i32, %c0_i32_0 : i32, i32
  }
  func.func @transform_9(%arg0: i32) -> (i32, i32) {
    %c0_i32 = arith.constant 0 : i32
    %c0_i32_0 = arith.constant 0 : i32
    %c0_i32_1 = arith.constant 0 : i32
    return %c0_i32, %c0_i32_0 : i32, i32
  }
}

</mosaic_0001>

<bundles_post_ra>
// kernel: net_forward.2
= control target key start
LH: loop header
LB: loop body
LE: loop exit
PB: predicated region body
PF: predicated region fallthrough
CT: control target
= control target key end

     0   :  { %vm189_vm0 = vcmask 1043456   ;;  %vm190_vm1 = vcmask 1044480   ;;  %v2835_v1 = vmov 65535   ;;  %v2836_v3 = vmov 0   ;;  %s3517_s0 = inlined_call_operand.vmem [shape: bf16[4,25,1800], index: 0, kind: input, shape index: {}]   ;;  %s3518_s1 = inlined_call_operand.vmem [shape: bf16[6,25], index: 1, kind: input, shape index: {}]   ;;  %s3519_s2 = inlined_call_operand.vmem [shape: f32[6,1], index: 2, kind: input, shape index: {}]   ;;  %s3520_s3 = inlined_call_operand.vmem [shape: bf16[6,1800], index: 3, kind: output, shape index: {}]  }
   0x1   :  { %v2659_v0 = vld [vmem:[%s3517_s0 + $0x4] ss:$60 sps:$4 sm:$0xff]   ;;  %v191_v2 = vsel %vm189_vm0, 4294967295, %v2835_v1  ;;  %270 = vmatprep.mubr.bf16.mxu0 %v2836_v3  ;;  %311 = vmatprep.mubr.bf16.mxu1 %v2836_v3  ;;  %v2661_v4 = vld [vmem:[%s3517_s0 + $0xc] ss:$60 sps:$4 sm:$0xff]   ;;  %vm185_vm2 = vcmask 203776  }
   0x2   :  { %2658 = vset.pattern.permute.xlu0 %v2836_v3  ;;  %238 = vmatprep.subr.bf16.mxu0 %v2659_v0  ;;  %v2663_v5 = vld [vmem:[%s3517_s0] ss:$60 sps:$4 sm:$0xff]   ;;  %v2664_v6 = vld [vmem:[%s3517_s0 + $0x8] ss:$60 sps:$4 sm:$0xff]   ;;  %v2874_v7 = vsel %vm190_vm1, %v191_v2, 0  ;;  %v2837_v47 = vmov 0.0  }
   0x3   :  { %279 = vmatprep.subr.bf16.mxu1 %v2661_v4  ;;  %v2665_v8 = vld [vmem:[%s3517_s0 + $0x7c] ss:$60 sps:$4 sm:$0x1f]   ;;  %239 = vmatpush1.bf16.msra.mxu0 %v2663_v5  ;;  %v2667_v9 = vld [vmem:[%s3517_s0 + $0x84] ss:$60 sps:$4 sm:$0x1f]  }
   0x4   :  { %280 = vmatpush1.bf16.msra.mxu1 %v2664_v6  ;;  %v197_v10 = vand.u32 %v2665_v8, %v2874_v7  ;;  %v2669_v11 = vld [vmem:[%s3517_s0 + $0x78] ss:$60 sps:$4 sm:$0x1f]   ;;  %v2670_v12 = vld [vmem:[%s3517_s0 + $0x80] ss:$60 sps:$4 sm:$0x1f]   ;;  %v203_v13 = vand.u32 %v2667_v9, %v2874_v7 }
   0x5   :  { %v194_v14 = vand.u32 %v2669_v11, %v2874_v7  ;;  %v200_v15 = vand.u32 %v2670_v12, %v2874_v7  ;;  %v2895_v16 = vld [vmem:[%s3518_s1] sm:$0x7]  ;;  %v2671_v17 = vld [vmem:[%s3517_s0 + $0x10] ss:$60 sps:$4 sm:$0xff]   ;;  %v2674_v19 = vld [vmem:[%s3517_s0 + $0x18] ss:$60 sps:$4 sm:$0xff]  }
   0x6   :  { %240 = vmatprep.subr.bf16.mxu0 %v197_v10  ;;  %v2673_v18 = vld [vmem:[%s3517_s0 + $0x14] ss:$60 sps:$4 sm:$0xff]   ;;  %281 = vmatprep.subr.bf16.mxu1 %v203_v13  ;;  %v2676_v20 = vld [vmem:[%s3517_s0 + $0x1c] ss:$60 sps:$4 sm:$0xff]   ;;  %v2685_v29 = vld [vmem:[%s3517_s0 + $0x24] ss:$60 sps:$4 sm:$0xff]  }
   0x7   :  { %241 = vmatpush1.bf16.msra.mxu0 %v194_v14  ;;  %v2677_v21 = vld [vmem:[%s3517_s0 + $0x88] ss:$60 sps:$4 sm:$0x1f]   ;;  %v2680_v23 = vld [vmem:[%s3517_s0 + $0x90] ss:$60 sps:$4 sm:$0x1f]  }
   0x8   :  { %282 = vmatpush1.bf16.msra.mxu1 %v200_v15  ;;  %320 = vmatprep.subr.bf16.mxu0 %v2673_v18  ;;  %v2679_v22 = vld [vmem:[%s3517_s0 + $0x8c] ss:$60 sps:$4 sm:$0x1f]   ;;  %v2682_v24 = vld [vmem:[%s3517_s0 + $0x94] ss:$60 sps:$4 sm:$0x1f]   ;;  %v206_v27 = vand.u32 %v2677_v21, %v2874_v7  ;;  %v212_v28 = vand.u32 %v2680_v23, %v2874_v7 }
   0x9   :  { %361 = vmatprep.subr.bf16.mxu1 %v2676_v20  ;;  %v209_v25 = vand.u32 %v2679_v22, %v2874_v7  ;;  %v215_v26 = vand.u32 %v2682_v24, %v2874_v7  ;;  %v2688_v30 = vld [vmem:[%s3517_s0 + $0x2c] ss:$60 sps:$4 sm:$0xff]   ;;  %v2683_v31 = vld [vmem:[%s3517_s0 + $0x20] ss:$60 sps:$4 sm:$0xff]   ;;  %v2697_v41 = vld [vmem:[%s3517_s0 + $0x34] ss:$60 sps:$4 sm:$0xff]  }
   0xa   :  { %2376 = vmatmul.mubr.msk.bf16.vlgmr.msra.gmra.mrb[0].mxu0 %vm185_vm2, %v2895_v16  ;;  %v2686_v32 = vld [vmem:[%s3517_s0 + $0x28] ss:$60 sps:$4 sm:$0xff]   ;;  %v2689_v33 = vld [vmem:[%s3517_s0 + $0x98] ss:$60 sps:$4 sm:$0x1f]   ;;  %vm2838_vm3 = vmmov 0  }
   0xb   :  { %2377 = vmatmul.mubr.msk.bf16.vlgmr.msra.gmra.mrb[0].mxu1 %vm185_vm2, %v2895_v16  ;;  %321 = vmatpush1.bf16.msra.mxu0 %v2671_v17  ;;  %v2691_v34 = vld [vmem:[%s3517_s0 + $0x9c] ss:$60 sps:$4 sm:$0x1f]   ;;  %v2694_v36 = vld [vmem:[%s3517_s0 + $0xa4] ss:$60 sps:$4 sm:$0x1f]   ;;  %v218_v39 = vand.u32 %v2689_v33, %v2874_v7 }
   0xc   :  { %362 = vmatpush1.bf16.msra.mxu1 %v2674_v19  ;;  %322 = vmatprep.subr.bf16.mxu0 %v209_v25  ;;  %v2692_v35 = vld [vmem:[%s3517_s0 + $0xa0] ss:$60 sps:$4 sm:$0x1f]   ;;  %v221_v37 = vand.u32 %v2691_v34, %v2874_v7  ;;  %v227_v38 = vand.u32 %v2694_v36, %v2874_v7  ;;  %v2701_v42 = vld [vmem:[%s3517_s0 + $0xac] ss:$60 sps:$4 sm:$0x1f]  }
   0xd   :  { %352 = vmatprep.mubr.bf16.mxu0 %v2836_v3  ;;  %363 = vmatprep.subr.bf16.mxu1 %v215_v26  ;;  %v224_v40 = vand.u32 %v2692_v35, %v2874_v7  ;;  %v2695_v43 = vld [vmem:[%s3517_s0 + $0x30] ss:$60 sps:$4 sm:$0xff]   ;;  %v2698_v44 = vld [vmem:[%s3517_s0 + $0x38] ss:$60 sps:$4 sm:$0xff]   ;;  %v233_v48 = vand.u32 %v2701_v42, %v2874_v7  ;;  %v2717_v61 = vld [vmem:[%s3517_s0 + $0x104] ss:$60 sps:$4 sm:$0xff]  }
   0xe   :  { %393 = vmatprep.mubr.bf16.mxu1 %v2836_v3  ;;  %v2699_v45 = vld [vmem:[%s3517_s0 + $0xa8] ss:$60 sps:$4 sm:$0x1f]   ;;  %v2702_v46 = vld [vmem:[%s3517_s0 + $0xb0] ss:$60 sps:$4 sm:$0x1f]  }
   0xf   :  { %323 = vmatpush1.bf16.msra.mxu0 %v206_v27  ;;  %v2705_v49 = vld [vmem:[%s3517_s0 + $0xf4] ss:$60 sps:$4 sm:$0xff]   ;;  %v2708_v50 = vld [vmem:[%s3517_s0 + $0xfc] ss:$60 sps:$4 sm:$0xff]   ;;  %v230_v51 = vand.u32 %v2699_v45, %v2874_v7  ;;  %v236_v52 = vand.u32 %v2702_v46, %v2874_v7  ;;  %v2720_v0 = vld [vmem:[%s3517_s0 + $0x10c] ss:$60 sps:$4 sm:$0xff]  }
  0x10   :  { %364 = vmatpush1.bf16.msra.mxu1 %v212_v28  ;;  %402 = vmatprep.subr.bf16.mxu0 %v2685_v29  ;;  %v2711_v53 = vld [vmem:[%s3517_s0 + $0x16c] ss:$60 sps:$4 sm:$0x1f]   ;;  %v2714_v54 = vld [vmem:[%s3517_s0 + $0x174] ss:$60 sps:$4 sm:$0x1f]  }
  0x11   :  { %443 = vmatprep.subr.bf16.mxu1 %v2688_v30  ;;  %v2703_v55 = vld [vmem:[%s3517_s0 + $0xf0] ss:$60 sps:$4 sm:$0xff]   ;;  %v2706_v56 = vld [vmem:[%s3517_s0 + $0xf8] ss:$60 sps:$4 sm:$0xff]   ;;  %v739_v59 = vand.u32 %v2711_v53, %v2874_v7  ;;  %v745_v60 = vand.u32 %v2714_v54, %v2874_v7  ;;  %v2715_v4 = vld [vmem:[%s3517_s0 + $0x100] ss:$60 sps:$4 sm:$0xff]  }
  0x12   :  { %2378 = vmatmul.mubr.msk.bf16.vlgmr.msra.gmra.mrb[4].mxu0 %vm185_vm2, %v2895_v16  ;;  %v2709_v57 = vld [vmem:[%s3517_s0 + $0x168] ss:$60 sps:$4 sm:$0x1f]   ;;  %v2712_v58 = vld [vmem:[%s3517_s0 + $0x170] ss:$60 sps:$4 sm:$0x1f]  }
  0x13   :  { %2379 = vmatmul.mubr.msk.bf16.vlgmr.msra.gmra.mrb[4].mxu1 %vm185_vm2, %v2895_v16  ;;  %403 = vmatpush1.bf16.msra.mxu0 %v2683_v31  ;;  %v736_v62 = vand.u32 %v2709_v57, %v2874_v7  ;;  %v742_v63 = vand.u32 %v2712_v58, %v2874_v7  ;;  %v2723_v1 = vld [vmem:[%s3517_s0 + $0x17c] ss:$60 sps:$4 sm:$0x1f]   ;;  %v2726_v2 = vld [vmem:[%s3517_s0 + $0x184] ss:$60 sps:$4 sm:$0x1f]  }
  0x14   :  { %444 = vmatpush1.bf16.msra.mxu1 %v2686_v32  ;;  %404 = vmatprep.subr.bf16.mxu0 %v221_v37  ;;  %v2721_v5 = vld [vmem:[%s3517_s0 + $0x178] ss:$60 sps:$4 sm:$0x1f]   ;;  %v2718_v6 = vld [vmem:[%s3517_s0 + $0x108] ss:$60 sps:$4 sm:$0xff]   ;;  %v751_v9 = vand.u32 %v2723_v1, %v2874_v7  ;;  %v757_v10 = vand.u32 %v2726_v2, %v2874_v7  ;;  %vm2340_vm4 = vcmask 59392  }
  0x15   :  { %445 = vmatprep.subr.bf16.mxu1 %v227_v38  ;;  %434 = vmatprep.mubr.bf16.mxu0 %v2836_v3  ;;  %v2724_v8 = vld [vmem:[%s3517_s0 + $0x180] ss:$60 sps:$4 sm:$0x1f]   ;;  %v2729_v11 = vld [vmem:[%s3517_s0 + $0x114] ss:$60 sps:$4 sm:$0xff]   ;;  %v748_v12 = vand.u32 %v2721_v5, %v2874_v7 }
  0x16   :  { %475 = vmatprep.mubr.bf16.mxu1 %v2836_v3  ;;  %v754_v13 = vand.u32 %v2724_v8, %v2874_v7  ;;  %v2735_v14 = vld [vmem:[%s3517_s0 + $0x18c] ss:$60 sps:$4 sm:$0x1f]   ;;  %v2732_v15 = vld [vmem:[%s3517_s0 + $0x11c] ss:$60 sps:$4 sm:$0xff]  }
  0x17   :  { %405 = vmatpush1.bf16.msra.mxu0 %v218_v39  ;;  %v2738_v17 = vld [vmem:[%s3517_s0 + $0x194] ss:$60 sps:$4 sm:$0x1f]   ;;  %v2733_v20 = vld [vmem:[%s3517_s0 + $0x188] ss:$60 sps:$4 sm:$0x1f]   ;;  %v763_v22 = vand.u32 %v2735_v14, %v2874_v7 }
  0x18   :  { %446 = vmatpush1.bf16.msra.mxu1 %v224_v40  ;;  %484 = vmatprep.subr.bf16.mxu0 %v2697_v41  ;;  %v2727_v18 = vld [vmem:[%s3517_s0 + $0x110] ss:$60 sps:$4 sm:$0xff]   ;;  %v2730_v19 = vld [vmem:[%s3517_s0 + $0x118] ss:$60 sps:$4 sm:$0xff]   ;;  %v769_v23 = vand.u32 %v2738_v17, %v2874_v7  ;;  %v760_v24 = vand.u32 %v2733_v20, %v2874_v7  ;;  %v2741_v26 = vld [vmem:[%s3517_s0 + $0x124] ss:$60 sps:$4 sm:$0xff]  }
  0x19   :  { %2622 = vmatprep.subr.bf16.mxu1 %v2837_v47  ;;  %v2736_v21 = vld [vmem:[%s3517_s0 + $0x190] ss:$60 sps:$4 sm:$0x1f]   ;;  %v2745_v27 = vld [vmem:[%s3517_s0 + $0x19c] ss:$60 sps:$4 sm:$0x1f]  }
  0x1a   :  { %2380 = vmatmul.mubr.msk.bf16.vlgmr.msra.gmra.mrb[8].mxu0 %vm185_vm2, %v2895_v16  ;;  %v766_v25 = vand.u32 %v2736_v21, %v2874_v7  ;;  %v2739_v28 = vld [vmem:[%s3517_s0 + $0x120] ss:$60 sps:$4 sm:$0xff]   ;;  %v2743_v29 = vld [vmem:[%s3517_s0 + $0x198] ss:$60 sps:$4 sm:$0x1f]   ;;  %v775_v32 = vand.u32 %v2745_v27, %v2874_v7 }
  0x1b   :  { %2381 = vmatmul.mubr.msk.bf16.vlgmr.msra.gmra.mrb[8].mxu1 %vm185_vm2, %v2895_v16  ;;  %485 = vmatpush1.bf16.msra.mxu0 %v2695_v43  ;;  %v2742_v30 = vld [vmem:[%s3517_s0 + $0x128] ss:$60 sps:$4 sm:$0xff]   ;;  %v2746_v31 = vld [vmem:[%s3517_s0 + $0x1a0] ss:$60 sps:$4 sm:$0x1f]   ;;  %v772_v35 = vand.u32 %v2743_v29, %v2874_v7 }
  0x1c   :  { %2623 = vmatpush3.bf16.msra.mxu1 %v2698_v44  ;;  %486 = vmatprep.subr.bf16.mxu0 %v233_v48  ;;  %v2749_v33 = vld [vmem:[%s3517_s0 + $0x1e4] ss:$60 sps:$4 sm:$0xff]   ;;  %v2755_v34 = vld [vmem:[%s3517_s0 + $0x25c] ss:$60 sps:$4 sm:$0x1f]   ;;  %v778_v36 = vand.u32 %v2746_v31, %v2874_v7 }
  0x1d   :  { %2624 = vmatprep.subr.bf16.mxu1 %v2837_v47  ;;  %516 = vmatprep.mubr.bf16.mxu0 %v2836_v3  ;;  %v2758_v37 = vld [vmem:[%s3517_s0 + $0x264] ss:$60 sps:$4 sm:$0x1f]   ;;  %v2752_v38 = vld [vmem:[%s3517_s0 + $0x1ec] ss:$60 sps:$4 sm:$0xff]   ;;  %v1296_v43 = vand.u32 %v2755_v34, %v2874_v7 }
  0x1e   :  { %2626 = vmatprep.mubr.msk.bf16.mxu1 %vm2838_vm3, %v2837_v47  ;;  %v2747_v39 = vld [vmem:[%s3517_s0 + $0x1e0] ss:$60 sps:$4 sm:$0xff]   ;;  %v2750_v40 = vld [vmem:[%s3517_s0 + $0x1e8] ss:$60 sps:$4 sm:$0xff]   ;;  %v1302_v44 = vand.u32 %v2758_v37, %v2874_v7  ;;  %v2761_v45 = vld [vmem:[%s3517_s0 + $0x1f4] ss:$60 sps:$4 sm:$0xff]  }
  0x1f   :  { %487 = vmatpush1.bf16.msra.mxu0 %v230_v51  ;;  %v2753_v41 = vld [vmem:[%s3517_s0 + $0x258] ss:$60 sps:$4 sm:$0x1f]   ;;  %v2756_v42 = vld [vmem:[%s3517_s0 + $0x260] ss:$60 sps:$4 sm:$0x1f]  }
  0x20   :  { %2625 = vmatpush3.bf16.msra.mxu1 %v236_v52  ;;  %780 = vmatprep.subr.bf16.mxu0 %v2705_v49  ;;  %v2764_v46 = vld [vmem:[%s3517_s0 + $0x1fc] ss:$60 sps:$4 sm:$0xff]   ;;  %v1293_v48 = vand.u32 %v2753_v41, %v2874_v7  ;;  %v1299_v49 = vand.u32 %v2756_v42, %v2874_v7  ;;  %v2770_v51 = vld [vmem:[%s3517_s0 + $0x274] ss:$60 sps:$4 sm:$0x1f]  }
  0x21   :  { %821 = vmatprep.subr.bf16.mxu1 %v2708_v50  ;;  %v2767_v50 = vld [vmem:[%s3517_s0 + $0x26c] ss:$60 sps:$4 sm:$0x1f]   ;;  %v2762_v53 = vld [vmem:[%s3517_s0 + $0x1f8] ss:$60 sps:$4 sm:$0xff]   ;;  %v1314_v57 = vand.u32 %v2770_v51, %v2874_v7 }
  0x22   :  { %2382 = vmatmul.mubr.msk.bf16.vlgmr.msra.gmra.mrb[12].mxu0 %vm185_vm2, %v2895_v16  ;;  %v2759_v52 = vld [vmem:[%s3517_s0 + $0x1f0] ss:$60 sps:$4 sm:$0xff]   ;;  %v2765_v54 = vld [vmem:[%s3517_s0 + $0x268] ss:$60 sps:$4 sm:$0x1f]  }
  0x23   :  { %2627 = vmatmul.mubr.msk.bf16.vlgmr.msra.gmra.mrb[12].mxu1 %vm185_vm2, %v2895_v16  ;;  %781 = vmatpush1.bf16.msra.mxu0 %v2703_v55  ;;  %v2768_v55 = vld [vmem:[%s3517_s0 + $0x270] ss:$60 sps:$4 sm:$0x1f]   ;;  %v2773_v58 = vld [vmem:[%s3517_s0 + $0x204] ss:$60 sps:$4 sm:$0xff]  }
  0x24   :  { %822 = vmatpush1.bf16.msra.mxu1 %v2706_v56  ;;  %782 = vmatprep.subr.bf16.mxu0 %v739_v59  ;;  %v1308_v56 = vand.u32 %v2767_v50, %v2874_v7  ;;  %v1305_v59 = vand.u32 %v2765_v54, %v2874_v7  ;;  %v2774_v1 = vld [vmem:[%s3517_s0 + $0x208] ss:$60 sps:$4 sm:$0xff]   ;;  %v2777_v2 = vld [vmem:[%s3517_s0 + $0x278] ss:$60 sps:$4 sm:$0x1f]  }
  0x25   :  { %823 = vmatprep.subr.bf16.mxu1 %v745_v60  ;;  %812 = vmatprep.mubr.bf16.mxu0 %v2836_v3  ;;  %v1311_v60 = vand.u32 %v2768_v55, %v2874_v7  ;;  %v1317_v8 = vand.u32 %v2777_v2, %v2874_v7  ;;  %v2786_v14 = vld [vmem:[%s3517_s0 + $0x218] ss:$60 sps:$4 sm:$0xff]   ;;  %v2790_v17 = vld [vmem:[%s3517_s0 + $0x290] ss:$60 sps:$4 sm:$0x1f]  }
  0x26   :  { %853 = vmatprep.mubr.bf16.mxu1 %v2836_v3  ;;  %v1335_v20 = vand.u32 %v2790_v17, %v2874_v7  ;;  %v2793_v21 = vld [vmem:[%s3517_s0 + $0x2d4] ss:$60 sps:$4 sm:$0xff]   ;;  %v2797_v27 = vld [vmem:[%s3517_s0 + $0x348] ss:$60 sps:$4 sm:$0x1f]  }
  0x27   :  { %783 = vmatpush1.bf16.msra.mxu0 %v736_v62  ;;  %v2776_v62 = vld [vmem:[%s3517_s0 + $0x20c] ss:$60 sps:$4 sm:$0xff]   ;;  %v1850_v31 = vand.u32 %v2797_v27, %v2874_v7  ;;  %v2803_v37 = vld [vmem:[%s3517_s0 + $0x2e0] ss:$60 sps:$4 sm:$0xff]   ;;  %v2818_v51 = vld [vmem:[%s3517_s0 + $0x2f8] ss:$60 sps:$4 sm:$0xff]  }
  0x28   :  { %824 = vmatpush1.bf16.msra.mxu1 %v742_v63  ;;  %862 = vmatprep.subr.bf16.mxu0 %v2717_v61  ;;  %v2779_v61 = vld [vmem:[%s3517_s0 + $0x27c] ss:$60 sps:$4 sm:$0x1f]   ;;  %v2782_v63 = vld [vmem:[%s3517_s0 + $0x284] ss:$60 sps:$4 sm:$0x1f]  }
  0x29   :  { %903 = vmatprep.subr.bf16.mxu1 %v2720_v0  ;;  %v2771_v0 = vld [vmem:[%s3517_s0 + $0x200] ss:$60 sps:$4 sm:$0xff]   ;;  %v1320_v5 = vand.u32 %v2779_v61, %v2874_v7  ;;  %v2808_v34 = vld [vmem:[%s3517_s0 + $0x2ec] ss:$60 sps:$4 sm:$0xff]  }
  0x2a   :  { %2446 = vmatmul.mubr.msk.bf16.vlgmr.msra.gmra.mrb[16].mxu0 %vm185_vm2, %v2895_v16  ;;  %v2815_v50 = vld [vmem:[%s3517_s0 + $0x2f0] ss:$60 sps:$4 sm:$0xff]   ;;  %v2830_v61 = vld [vmem:[%s3517_s0 + $0x308] ss:$60 sps:$4 sm:$0xff]  }
  0x2b   :  { %2447 = vmatmul.mubr.msk.bf16.vlgmr.msra.gmra.mrb[16].mxu1 %vm185_vm2, %v2895_v16  ;;  %863 = vmatpush1.bf16.msra.mxu0 %v2715_v4  ;;  %v2780_v4 = vld [vmem:[%s3517_s0 + $0x280] ss:$60 sps:$4 sm:$0x1f]  }
  0x2c   :  { %904 = vmatpush1.bf16.msra.mxu1 %v2718_v6  ;;  %864 = vmatprep.subr.bf16.mxu0 %v751_v9  ;;  %v1326_v6 = vand.u32 %v2782_v63, %v2874_v7  ;;  %v1323_v9 = vand.u32 %v2780_v4, %v2874_v7  ;;  %v2834_v63 = vld [vmem:[%s3517_s0 + $0x380] ss:$60 sps:$4 sm:$0x1f]  }
  0x2d   :  { %905 = vmatprep.subr.bf16.mxu1 %v757_v10  ;;  %894 = vmatprep.mubr.bf16.mxu0 %v2836_v3  ;;  %v2785_v10 = vld [vmem:[%s3517_s0 + $0x214] ss:$60 sps:$4 sm:$0xff]   ;;  %v1892_v2 = vand.u32 %v2834_v63, %v2874_v7 }
  0x2e   :  { %935 = vmatprep.mubr.bf16.mxu1 %v2836_v3 }
  0x2f   :  { %865 = vmatpush1.bf16.msra.mxu0 %v748_v12  ;;  %v2236_v12 = vld [vmem:[%s3519_s2] sm:$0x3f] }
  0x30   :  { %906 = vmatpush1.bf16.msra.mxu1 %v754_v13  ;;  %944 = vmatprep.subr.bf16.mxu0 %v2729_v11  ;;  %v2789_v11 = vld [vmem:[%s3517_s0 + $0x28c] ss:$60 sps:$4 sm:$0x1f]  }
  0x31   :  { %985 = vmatprep.subr.bf16.mxu1 %v2732_v15  ;;  %v2783_v13 = vld [vmem:[%s3517_s0 + $0x210] ss:$60 sps:$4 sm:$0xff]   ;;  %2239 = vperm.xlu0 %2658, %v2236_v12   ;;  %v2787_v15 = vld [vmem:[%s3517_s0 + $0x288] ss:$60 sps:$4 sm:$0x1f]  }
  0x32   :  { %2448 = vmatmul.mubr.msk.bf16.vlgmr.msra.gmra.mrb[20].mxu0 %vm185_vm2, %v2895_v16 }
  0x33   :  { %2449 = vmatmul.mubr.msk.bf16.vlgmr.msra.gmra.mrb[20].mxu1 %vm185_vm2, %v2895_v16  ;;  %945 = vmatpush1.bf16.msra.mxu0 %v2727_v18  ;;  %v1332_v18 = vand.u32 %v2789_v11, %v2874_v7 }
  0x34   :  { %986 = vmatpush1.bf16.msra.mxu1 %v2730_v19  ;;  %946 = vmatprep.subr.bf16.mxu0 %v763_v22  ;;  %v1329_v19 = vand.u32 %v2787_v15, %v2874_v7  ;;  %v2796_v22 = vld [vmem:[%s3517_s0 + $0x2dc] ss:$60 sps:$4 sm:$0xff]  }
  0x35   :  { %987 = vmatprep.subr.bf16.mxu1 %v769_v23  ;;  %976 = vmatprep.mubr.bf16.mxu0 %v2836_v3  ;;  %v2799_v23 = vld [vmem:[%s3517_s0 + $0x34c] ss:$60 sps:$4 sm:$0x1f]  }
  0x36   :  { %1017 = vmatprep.mubr.bf16.mxu1 %v2836_v3  ;;  %v1853_v29 = vand.u32 %v2799_v23, %v2874_v7 }
  0x37   :  { %947 = vmatpush1.bf16.msra.mxu0 %v760_v24  ;;  %v2802_v24 = vld [vmem:[%s3517_s0 + $0x354] ss:$60 sps:$4 sm:$0x1f]  }
  0x38   :  { %988 = vmatpush1.bf16.msra.mxu1 %v766_v25  ;;  %1026 = vmatprep.subr.bf16.mxu0 %v2741_v26  ;;  %v2791_v25 = vld [vmem:[%s3517_s0 + $0x2d0] ss:$60 sps:$4 sm:$0xff]   ;;  %v2794_v26 = vld [vmem:[%s3517_s0 + $0x2d8] ss:$60 sps:$4 sm:$0xff]  }
  0x39   :  { %2630 = vmatprep.subr.bf16.mxu1 %v2837_v47 }
  0x3a   :  { %2450 = vmatmul.mubr.msk.bf16.vlgmr.msra.gmra.mrb[24].mxu0 %vm185_vm2, %v2895_v16 }
  0x3b   :  { %2451 = vmatmul.mubr.msk.bf16.vlgmr.msra.gmra.mrb[24].mxu1 %vm185_vm2, %v2895_v16  ;;  %1027 = vmatpush1.bf16.msra.mxu0 %v2739_v28  ;;  %v2800_v28 = vld [vmem:[%s3517_s0 + $0x350] ss:$60 sps:$4 sm:$0x1f]  }
  0x3c   :  { %2631 = vmatpush3.bf16.msra.mxu1 %v2742_v30  ;;  %1028 = vmatprep.subr.bf16.mxu0 %v775_v32  ;;  %v1859_v30 = vand.u32 %v2802_v24, %v2874_v7  ;;  %v1856_v32 = vand.u32 %v2800_v28, %v2874_v7 }
  0x3d   :  { %2632 = vmatprep.subr.bf16.mxu1 %v2837_v47  ;;  %1058 = vmatprep.mubr.bf16.mxu0 %v2836_v3 }
  0x3e   :  { %2634 = vmatprep.mubr.msk.bf16.mxu1 %vm2838_vm3, %v2837_v47 }
  0x3f   :  { %1029 = vmatpush1.bf16.msra.mxu0 %v772_v35  ;;  %v2811_v35 = vld [vmem:[%s3517_s0 + $0x35c] ss:$60 sps:$4 sm:$0x1f]  }
  0x40   :  { %2633 = vmatpush3.bf16.msra.mxu1 %v778_v36  ;;  %1337 = vmatprep.subr.bf16.mxu0 %v2749_v33  ;;  %v2805_v33 = vld [vmem:[%s3517_s0 + $0x2e4] ss:$60 sps:$4 sm:$0xff]   ;;  %v1865_v41 = vand.u32 %v2811_v35, %v2874_v7 }
  0x41   :  { %1378 = vmatprep.subr.bf16.mxu1 %v2752_v38  ;;  %v2814_v36 = vld [vmem:[%s3517_s0 + $0x364] ss:$60 sps:$4 sm:$0x1f]  }
  0x42   :  { %2452 = vmatmul.mubr.msk.bf16.vlgmr.msra.gmra.mrb[28].mxu0 %vm185_vm2, %v2895_v16  ;;  %v2806_v38 = vld [vmem:[%s3517_s0 + $0x2e8] ss:$60 sps:$4 sm:$0xff]   ;;  %v1871_v42 = vand.u32 %v2814_v36, %v2874_v7 }
  0x43   :  { %2635 = vmatmul.mubr.msk.bf16.vlgmr.msra.gmra.mrb[28].mxu1 %vm185_vm2, %v2895_v16  ;;  %1338 = vmatpush1.bf16.msra.mxu0 %v2747_v39  ;;  %v2809_v39 = vld [vmem:[%s3517_s0 + $0x358] ss:$60 sps:$4 sm:$0x1f]  }
  0x44   :  { %1379 = vmatpush1.bf16.msra.mxu1 %v2750_v40  ;;  %1339 = vmatprep.subr.bf16.mxu0 %v1296_v43  ;;  %v2812_v40 = vld [vmem:[%s3517_s0 + $0x360] ss:$60 sps:$4 sm:$0x1f]   ;;  %v1862_v43 = vand.u32 %v2809_v39, %v2874_v7 }
  0x45   :  { %1380 = vmatprep.subr.bf16.mxu1 %v1302_v44  ;;  %1369 = vmatprep.mubr.bf16.mxu0 %v2836_v3  ;;  %v1868_v44 = vand.u32 %v2812_v40, %v2874_v7 }
  0x46   :  { %1410 = vmatprep.mubr.bf16.mxu1 %v2836_v3 }
  0x47   :  { %1340 = vmatpush1.bf16.msra.mxu0 %v1293_v48  ;;  %v2823_v48 = vld [vmem:[%s3517_s0 + $0x36c] ss:$60 sps:$4 sm:$0x1f]  }
  0x48   :  { %1381 = vmatpush1.bf16.msra.mxu1 %v1299_v49  ;;  %1419 = vmatprep.subr.bf16.mxu0 %v2761_v45  ;;  %v2817_v45 = vld [vmem:[%s3517_s0 + $0x2f4] ss:$60 sps:$4 sm:$0xff]   ;;  %v1877_v54 = vand.u32 %v2823_v48, %v2874_v7 }
  0x49   :  { %1460 = vmatprep.subr.bf16.mxu1 %v2764_v46  ;;  %v2820_v46 = vld [vmem:[%s3517_s0 + $0x2fc] ss:$60 sps:$4 sm:$0xff]   ;;  %v2826_v49 = vld [vmem:[%s3517_s0 + $0x374] ss:$60 sps:$4 sm:$0x1f]  }
  0x4a   :  { %2516 = vmatmul.mubr.msk.bf16.vlgmr.msra.gmra.mrb[32].mxu0 %vm185_vm2, %v2895_v16  ;;  %v1883_v55 = vand.u32 %v2826_v49, %v2874_v7 }
  0x4b   :  { %2517 = vmatmul.mubr.msk.bf16.vlgmr.msra.gmra.mrb[32].mxu1 %vm185_vm2, %v2895_v16  ;;  %1420 = vmatpush1.bf16.msra.mxu0 %v2759_v52  ;;  %v2821_v52 = vld [vmem:[%s3517_s0 + $0x368] ss:$60 sps:$4 sm:$0x1f]  }
  0x4c   :  { %1461 = vmatpush1.bf16.msra.mxu1 %v2762_v53  ;;  %1421 = vmatprep.subr.bf16.mxu0 %v1308_v56  ;;  %v2824_v53 = vld [vmem:[%s3517_s0 + $0x370] ss:$60 sps:$4 sm:$0x1f]   ;;  %v1874_v56 = vand.u32 %v2821_v52, %v2874_v7 }
  0x4d   :  { %1462 = vmatprep.subr.bf16.mxu1 %v1314_v57  ;;  %1451 = vmatprep.mubr.bf16.mxu0 %v2836_v3  ;;  %v1880_v57 = vand.u32 %v2824_v53, %v2874_v7 }
  0x4e   :  { %1492 = vmatprep.mubr.bf16.mxu1 %v2836_v3 }
  0x4f   :  { %1422 = vmatpush1.bf16.msra.mxu0 %v1305_v59  ;;  %v2833_v59 = vld [vmem:[%s3517_s0 + $0x37c] ss:$60 sps:$4 sm:$0x1f]  }
  0x50   :  { %1463 = vmatpush1.bf16.msra.mxu1 %v1311_v60  ;;  %1501 = vmatprep.subr.bf16.mxu0 %v2773_v58  ;;  %v2829_v58 = vld [vmem:[%s3517_s0 + $0x304] ss:$60 sps:$4 sm:$0xff]  }
  0x51   :  { %1542 = vmatprep.subr.bf16.mxu1 %v2776_v62  ;;  %v2827_v60 = vld [vmem:[%s3517_s0 + $0x300] ss:$60 sps:$4 sm:$0xff]   ;;  %v2831_v62 = vld [vmem:[%s3517_s0 + $0x378] ss:$60 sps:$4 sm:$0x1f]  }
  0x52   :  { %2518 = vmatmul.mubr.msk.bf16.vlgmr.msra.gmra.mrb[36].mxu0 %vm185_vm2, %v2895_v16 }
  0x53   :  { %2519 = vmatmul.mubr.msk.bf16.vlgmr.msra.gmra.mrb[36].mxu1 %vm185_vm2, %v2895_v16  ;;  %1502 = vmatpush1.bf16.msra.mxu0 %v2771_v0  ;;  %v1889_v0 = vand.u32 %v2833_v59, %v2874_v7 }
  0x54   :  { %1543 = vmatpush1.bf16.msra.mxu1 %v2774_v1  ;;  %1503 = vmatprep.subr.bf16.mxu0 %v1320_v5  ;;  %v1886_v1 = vand.u32 %v2831_v62, %v2874_v7 }
  0x55   :  { %1544 = vmatprep.subr.bf16.mxu1 %v1326_v6  ;;  %1533 = vmatprep.mubr.bf16.mxu0 %v2836_v3 }
  0x56   :  { %1574 = vmatprep.mubr.bf16.mxu1 %v2836_v3 }
  0x57   :  { %1504 = vmatpush1.bf16.msra.mxu0 %v1317_v8 }
  0x58   :  { %1545 = vmatpush1.bf16.msra.mxu1 %v1323_v9  ;;  %1583 = vmatprep.subr.bf16.mxu0 %v2785_v10 }
  0x59   :  { %2638 = vmatprep.subr.bf16.mxu1 %v2837_v47 }
  0x5a   :  { %2520 = vmatmul.mubr.msk.bf16.vlgmr.msra.gmra.mrb[40].mxu0 %vm185_vm2, %v2895_v16 }
  0x5b   :  { %2521 = vmatmul.mubr.msk.bf16.vlgmr.msra.gmra.mrb[40].mxu1 %vm185_vm2, %v2895_v16  ;;  %1584 = vmatpush1.bf16.msra.mxu0 %v2783_v13 }
  0x5c   :  { %2639 = vmatpush3.bf16.msra.mxu1 %v2786_v14  ;;  %1585 = vmatprep.subr.bf16.mxu0 %v1332_v18 }
  0x5d   :  { %2640 = vmatprep.subr.bf16.mxu1 %v2837_v47  ;;  %1615 = vmatprep.mubr.bf16.mxu0 %v2836_v3 }
  0x5e   :  { %2642 = vmatprep.mubr.msk.bf16.mxu1 %vm2838_vm3, %v2837_v47 }
  0x5f   :  { %1586 = vmatpush1.bf16.msra.mxu0 %v1329_v19 }
  0x60   :  { %2641 = vmatpush3.bf16.msra.mxu1 %v1335_v20  ;;  %1894 = vmatprep.subr.bf16.mxu0 %v2793_v21 }
  0x61   :  { %1935 = vmatprep.subr.bf16.mxu1 %v2796_v22 }
  0x62   :  { %2522 = vmatmul.mubr.msk.bf16.vlgmr.msra.gmra.mrb[44].mxu0 %vm185_vm2, %v2895_v16 }
  0x63   :  { %2643 = vmatmul.mubr.msk.bf16.vlgmr.msra.gmra.mrb[44].mxu1 %vm185_vm2, %v2895_v16  ;;  %1895 = vmatpush1.bf16.msra.mxu0 %v2791_v25 }
  0x64   :  { %1936 = vmatpush1.bf16.msra.mxu1 %v2794_v26  ;;  %1896 = vmatprep.subr.bf16.mxu0 %v1853_v29 }
  0x65   :  { %1937 = vmatprep.subr.bf16.mxu1 %v1859_v30  ;;  %1926 = vmatprep.mubr.bf16.mxu0 %v2836_v3 }
  0x66   :  { %1967 = vmatprep.mubr.bf16.mxu1 %v2836_v3 }
  0x67   :  { %1897 = vmatpush1.bf16.msra.mxu0 %v1850_v31 }
  0x68   :  { %1938 = vmatpush1.bf16.msra.mxu1 %v1856_v32  ;;  %1976 = vmatprep.subr.bf16.mxu0 %v2805_v33 }
  0x69   :  { %2017 = vmatprep.subr.bf16.mxu1 %v2808_v34 }
  0x6a   :  { %2586 = vmatmul.mubr.msk.bf16.vlgmr.msra.gmra.mrb[48].mxu0 %vm185_vm2, %v2895_v16 }
  0x6b   :  { %2587 = vmatmul.mubr.msk.bf16.vlgmr.msra.gmra.mrb[48].mxu1 %vm185_vm2, %v2895_v16  ;;  %1977 = vmatpush1.bf16.msra.mxu0 %v2803_v37 }
  0x6c   :  { %2018 = vmatpush1.bf16.msra.mxu1 %v2806_v38  ;;  %1978 = vmatprep.subr.bf16.mxu0 %v1865_v41 }
  0x6d   :  { %2019 = vmatprep.subr.bf16.mxu1 %v1871_v42  ;;  %2008 = vmatprep.mubr.bf16.mxu0 %v2836_v3 }
  0x6e   :  { %2049 = vmatprep.mubr.bf16.mxu1 %v2836_v3 }
  0x6f   :  { %1979 = vmatpush1.bf16.msra.mxu0 %v1862_v43 }
  0x70   :  { %2020 = vmatpush1.bf16.msra.mxu1 %v1868_v44  ;;  %2058 = vmatprep.subr.bf16.mxu0 %v2817_v45 }
  0x71   :  { %2099 = vmatprep.subr.bf16.mxu1 %v2820_v46 }
  0x72   :  { %2588 = vmatmul.mubr.msk.bf16.vlgmr.msra.gmra.mrb[52].mxu0 %vm185_vm2, %v2895_v16 }
  0x73   :  { %2589 = vmatmul.mubr.msk.bf16.vlgmr.msra.gmra.mrb[52].mxu1 %vm185_vm2, %v2895_v16  ;;  %2059 = vmatpush1.bf16.msra.mxu0 %v2815_v50 }
  0x74   :  { %2100 = vmatpush1.bf16.msra.mxu1 %v2818_v51  ;;  %2060 = vmatprep.subr.bf16.mxu0 %v1877_v54 }
  0x75   :  { %2101 = vmatprep.subr.bf16.mxu1 %v1883_v55  ;;  %2090 = vmatprep.mubr.bf16.mxu0 %v2836_v3 }
  0x76   :  { %2131 = vmatprep.mubr.bf16.mxu1 %v2836_v3 }
  0x77   :  { %2061 = vmatpush1.bf16.msra.mxu0 %v1874_v56 }
  0x78   :  { %2102 = vmatpush1.bf16.msra.mxu1 %v1880_v57  ;;  %2140 = vmatprep.subr.bf16.mxu0 %v2829_v58 }
  0x79   :  { %2646 = vmatprep.subr.bf16.mxu1 %v2837_v47 }
  0x7a   :  { %2590 = vmatmul.mubr.msk.bf16.vlgmr.msra.gmra.mrb[56].mxu0 %vm185_vm2, %v2895_v16 }
  0x7b   :  { %2591 = vmatmul.mubr.msk.bf16.vlgmr.msra.gmra.mrb[56].mxu1 %vm185_vm2, %v2895_v16  ;;  %2141 = vmatpush1.bf16.msra.mxu0 %v2827_v60 }
  0x7c   :  { %2647 = vmatpush3.bf16.msra.mxu1 %v2830_v61  ;;  %2142 = vmatprep.subr.bf16.mxu0 %v1889_v0 }
  0x7d   :  { %2648 = vmatprep.subr.bf16.mxu1 %v2837_v47  ;;  %2172 = vmatprep.mubr.bf16.mxu0 %v2836_v3 }
  0x7e   :  { %2650 = vmatprep.mubr.msk.bf16.mxu1 %vm2838_vm3, %v2837_v47 }
  0x7f   :  { %2143 = vmatpush1.bf16.msra.mxu0 %v1886_v1 }
  0x80   :  { %2649 = vmatpush3.bf16.msra.mxu1 %v1892_v2 }
  0x82   :  { %2592 = vmatmul.mubr.msk.bf16.vlgmr.msra.gmra.mrb[60].mxu0 %vm185_vm2, %v2895_v16 }
  0x83   :  { %2651 = vmatmul.mubr.msk.bf16.vlgmr.msra.gmra.mrb[60].mxu1 %vm185_vm2, %v2895_v16 }
  0xdd   :  { %v3398_v4 = vpop.f32.mrb[0].mxu0 }
  0xde   :  { %v3400_v5 = vpop.f32.mrb[0].mxu1  ;;  %v3402_v7 = vpop.f32.mrb[1].mxu0 }
  0xdf   :  { %v3404_v6 = vpop.f32.mrb[1].mxu1  ;;  %v276_v3 = vpop.f32.mrb[2].mxu0 }
  0xe0   :  { %v317_v8 = vpop.f32.mrb[2].mxu1  ;;  %v277_v9 = vpop.f32.mrb[3].mxu0 }
  0xe1   :  { %v318_v47 = vpop.f32.mrb[3].mxu1 }
  0xe5   :  { %v3406_v10 = vpop.f32.mrb[4].mxu0 }
  0xe6   :  { %v3408_v11 = vpop.f32.mrb[4].mxu1  ;;  %v3410_v12 = vpop.f32.mrb[5].mxu0 }
  0xe7   :  { %v3412_v13 = vpop.f32.mrb[5].mxu1  ;;  %v358_v16 = vpop.f32.mrb[6].mxu0 }
  0xe8   :  { %v399_v14 = vpop.f32.mrb[6].mxu1  ;;  %v359_v15 = vpop.f32.mrb[7].mxu0 }
  0xe9   :  { %v400_v17 = vpop.f32.mrb[7].mxu1 }
  0xed   :  { %v3414_v18 = vpop.f32.mrb[8].mxu0 }
  0xee   :  { %v3416_v19 = vpop.f32.mrb[8].mxu1  ;;  %v3418_v20 = vpop.f32.mrb[9].mxu0 }
  0xef   :  { %v3420_v21 = vpop.f32.mrb[9].mxu1  ;;  %v440_v22 = vpop.f32.mrb[10].mxu0 }
  0xf0   :  { %v481_v23 = vpop.f32.mrb[10].mxu1  ;;  %v441_v24 = vpop.f32.mrb[11].mxu0 }
  0xf1   :  { %v482_v25 = vpop.f32.mrb[11].mxu1 }
  0xf5   :  { %v3422_v26 = vpop.f32.mrb[12].mxu0 }
  0xf6   :  { %v3424_v27 = vpop.f32.mrb[12].mxu1  ;;  %v3426_v28 = vpop.f32.mrb[13].mxu0 }
  0xf7   :  { %v2628_v29 = vpop.f32.mrb[13].mxu1  ;;  %v522_v30 = vpop.f32.mrb[14].mxu0 }
  0xf8   :  { %v562_v31 = vpop.f32.mrb[14].mxu1  ;;  %v523_v32 = vpop.f32.mrb[15].mxu0 }
  0xf9   :  { %v2629_v33 = vpop.f32.mrb[15].mxu1 }
  0xfd   :  { %v814_v34 = vpop.f32.mrb[16].mxu0 }
  0xfe   :  { %v855_v35 = vpop.f32.mrb[16].mxu1  ;;  %v1107_v36 = vmax.f32 %v3398_v4, %v814_v34  ;;  %v816_v38 = vpop.f32.mrb[17].mxu0 }
  0xff   :  { %v1109_v37 = vmax.f32 %v3400_v5, %v855_v35  ;;  %v857_v39 = vpop.f32.mrb[17].mxu1  ;;  %v1108_v40 = vmax.f32 %v3402_v7, %v816_v38  ;;  %v818_v42 = vpop.f32.mrb[18].mxu0 }
 0x100   :  { %v1110_v41 = vmax.f32 %v3404_v6, %v857_v39  ;;  %v859_v43 = vpop.f32.mrb[18].mxu1  ;;  %v819_v44 = vpop.f32.mrb[19].mxu0 }
 0x101   :  { %v860_v45 = vpop.f32.mrb[19].mxu1 }
 0x105   :  { %v896_v46 = vpop.f32.mrb[20].mxu0 }
 0x106   :  { %v937_v48 = vpop.f32.mrb[20].mxu1  ;;  %v1111_v49 = vmax.f32 %v3406_v10, %v896_v46  ;;  %v898_v51 = vpop.f32.mrb[21].mxu0 }
 0x107   :  { %v1113_v50 = vmax.f32 %v3408_v11, %v937_v48  ;;  %v939_v52 = vpop.f32.mrb[21].mxu1  ;;  %v1112_v53 = vmax.f32 %v3410_v12, %v898_v51  ;;  %v900_v55 = vpop.f32.mrb[22].mxu0 }
 0x108   :  { %v1114_v54 = vmax.f32 %v3412_v13, %v939_v52  ;;  %v941_v56 = vpop.f32.mrb[22].mxu1  ;;  %v901_v57 = vpop.f32.mrb[23].mxu0 }
 0x109   :  { %v942_v58 = vpop.f32.mrb[23].mxu1 }
 0x10d   :  { %v978_v59 = vpop.f32.mrb[24].mxu0 }
 0x10e   :  { %v1019_v60 = vpop.f32.mrb[24].mxu1  ;;  %v1115_v61 = vmax.f32 %v3414_v18, %v978_v59  ;;  %v980_v63 = vpop.f32.mrb[25].mxu0 }
 0x10f   :  { %v1117_v62 = vmax.f32 %v3416_v19, %v1019_v60  ;;  %v1021_v0 = vpop.f32.mrb[25].mxu1  ;;  %v1116_v1 = vmax.f32 %v3418_v20, %v980_v63  ;;  %v982_v4 = vpop.f32.mrb[26].mxu0 }
 0x110   :  { %v1118_v2 = vmax.f32 %v3420_v21, %v1021_v0  ;;  %v1023_v5 = vpop.f32.mrb[26].mxu1  ;;  %v983_v7 = vpop.f32.mrb[27].mxu0 }
 0x111   :  { %v1024_v6 = vpop.f32.mrb[27].mxu1 }
 0x115   :  { %v1060_v3 = vpop.f32.mrb[28].mxu0 }
 0x116   :  { %v1101_v8 = vpop.f32.mrb[28].mxu1  ;;  %v1119_v9 = vmax.f32 %v3422_v26, %v1060_v3  ;;  %v1062_v10 = vpop.f32.mrb[29].mxu0 }
 0x117   :  { %v1121_v47 = vmax.f32 %v3424_v27, %v1101_v8  ;;  %v2636_v11 = vpop.f32.mrb[29].mxu1  ;;  %v1120_v12 = vmax.f32 %v3426_v28, %v1062_v10  ;;  %v1064_v13 = vpop.f32.mrb[30].mxu0 }
 0x118   :  { %v1104_v16 = vpop.f32.mrb[30].mxu1  ;;  %v1065_v14 = vpop.f32.mrb[31].mxu0 }
 0x119   :  { %v2637_v15 = vpop.f32.mrb[31].mxu1 }
 0x11d   :  { %v1371_v17 = vpop.f32.mrb[32].mxu0 }
 0x11e   :  { %v1412_v18 = vpop.f32.mrb[32].mxu1  ;;  %v1664_v19 = vmax.f32 %v1107_v36, %v1371_v17  ;;  %v1373_v21 = vpop.f32.mrb[33].mxu0 }
 0x11f   :  { %v1666_v20 = vmax.f32 %v1109_v37, %v1412_v18  ;;  %v1414_v22 = vpop.f32.mrb[33].mxu1  ;;  %v1665_v23 = vmax.f32 %v1108_v40, %v1373_v21  ;;  %v1375_v25 = vpop.f32.mrb[34].mxu0 }
 0x120   :  { %v1667_v24 = vmax.f32 %v1110_v41, %v1414_v22  ;;  %v1416_v26 = vpop.f32.mrb[34].mxu1  ;;  %v1376_v29 = vpop.f32.mrb[35].mxu0 }
 0x121   :  { %v1417_v27 = vpop.f32.mrb[35].mxu1 }
 0x125   :  { %v1453_v30 = vpop.f32.mrb[36].mxu0 }
 0x126   :  { %v1494_v31 = vpop.f32.mrb[36].mxu1  ;;  %v3443_v32 = vmax.f32 %v1111_v49, %v1453_v30  ;;  %v1455_v33 = vpop.f32.mrb[37].mxu0 }
 0x127   :  { %v3445_v28 = vmax.f32 %v1113_v50, %v1494_v31  ;;  %v1496_v34 = vpop.f32.mrb[37].mxu1  ;;  %v3447_v35 = vmax.f32 %v1112_v53, %v1455_v33  ;;  %v1457_v37 = vpop.f32.mrb[38].mxu0 }
 0x128   :  { %v3449_v36 = vmax.f32 %v1114_v54, %v1496_v34  ;;  %v1498_v38 = vpop.f32.mrb[38].mxu1  ;;  %v1458_v39 = vpop.f32.mrb[39].mxu0 }
 0x129   :  { %v1499_v40 = vpop.f32.mrb[39].mxu1 }
 0x12d   :  { %v1535_v41 = vpop.f32.mrb[40].mxu0 }
 0x12e   :  { %v1576_v42 = vpop.f32.mrb[40].mxu1  ;;  %v3451_v43 = vmax.f32 %v1115_v61, %v1535_v41  ;;  %v1537_v45 = vpop.f32.mrb[41].mxu0 }
 0x12f   :  { %v3453_v44 = vmax.f32 %v1117_v62, %v1576_v42  ;;  %v1578_v46 = vpop.f32.mrb[41].mxu1  ;;  %v3455_v48 = vmax.f32 %v1116_v1, %v1537_v45  ;;  %v1539_v50 = vpop.f32.mrb[42].mxu0 }
 0x130   :  { %v3457_v49 = vmax.f32 %v1118_v2, %v1578_v46  ;;  %v1580_v51 = vpop.f32.mrb[42].mxu1  ;;  %v1540_v52 = vpop.f32.mrb[43].mxu0 }
 0x131   :  { %v1581_v53 = vpop.f32.mrb[43].mxu1  ;;  %v3465_v1 = vpop.permute.xlu0 %2239 }
 0x135   :  { %v1617_v54 = vpop.f32.mrb[44].mxu0 }
 0x136   :  { %v1658_v55 = vpop.f32.mrb[44].mxu1  ;;  %v3459_v56 = vmax.f32 %v1119_v9, %v1617_v54  ;;  %v1619_v58 = vpop.f32.mrb[45].mxu0 }
 0x137   :  { %v3461_v57 = vmax.f32 %v1121_v47, %v1658_v55  ;;  %v2644_v59 = vpop.f32.mrb[45].mxu1  ;;  %v3463_v60 = vmax.f32 %v1120_v12, %v1619_v58  ;;  %v1621_v61 = vpop.f32.mrb[46].mxu0 }
 0x138   :  { %v1661_v62 = vpop.f32.mrb[46].mxu1  ;;  %v1622_v63 = vpop.f32.mrb[47].mxu0 }
 0x139   :  { %v2645_v0 = vpop.f32.mrb[47].mxu1 }
 0x13d   :  { %v1928_v2 = vpop.f32.mrb[48].mxu0 }
 0x13e   :  { %v1969_v4 = vpop.f32.mrb[48].mxu1  ;;  %v2221_v5 = vmax.f32 %v1664_v19, %v1928_v2  ;;  %v1930_v6 = vpop.f32.mrb[49].mxu0 }
 0x13f   :  { %v2223_v7 = vmax.f32 %v1666_v20, %v1969_v4  ;;  %v1971_v3 = vpop.f32.mrb[49].mxu1  ;;  %v2222_v8 = vmax.f32 %v1665_v23, %v1930_v6  ;;  %v1932_v47 = vpop.f32.mrb[50].mxu0 }
 0x140   :  { %v2224_v9 = vmax.f32 %v1667_v24, %v1971_v3  ;;  %v1973_v10 = vpop.f32.mrb[50].mxu1  ;;  %v1933_v11 = vpop.f32.mrb[51].mxu0  ;;  %v2242_v12 = vadd.f32 %v3465_v1, %v2221_v5 }
 0x141   :  { %v1974_v13 = vpop.f32.mrb[51].mxu1  ;;  %v2244_v16 = vadd.f32 %v3465_v1, %v2223_v7  ;;  %v2243_v14 = vadd.f32 %v3465_v1, %v2222_v8 }
 0x142   :  { %v2245_v15 = vadd.f32 %v3465_v1, %v2224_v9  ;;  %v2257_v17 = vmax.f32 %v2242_v12, 0.0 }
 0x143   :  { %v2259_v18 = vmax.f32 %v2244_v16, 0.0  ;;  %v2258_v19 = vmax.f32 %v2243_v14, 0.0 }
 0x144   :  { %v2260_v20 = vmax.f32 %v2245_v15, 0.0 }
 0x145   :  { %v2010_v21 = vpop.f32.mrb[52].mxu0  ;;  %v2602_v23 = vpack.c.bf16 %v2258_v19, %v2257_v17 }
 0x146   :  { %v2051_v22 = vpop.f32.mrb[52].mxu1  ;;  %v2603_v24 = vpack.c.bf16 %v2260_v20, %v2259_v18  ;;  %v2225_v25 = vmax.f32 %v3443_v32, %v2010_v21  ;;  %v2012_v29 = vpop.f32.mrb[53].mxu0 }
 0x147   :  { %v2227_v26 = vmax.f32 %v3445_v28, %v2051_v22  ;;  %v2053_v27 = vpop.f32.mrb[53].mxu1  ;;  %v2226_v30 = vmax.f32 %v3447_v35, %v2012_v29  ;;  %2333 = vst [vmem:[%s3520_s3] sm:$0x77] %v2602_v23  ;;  %v2014_v33 = vpop.f32.mrb[54].mxu0 }
 0x148   :  { %2334 = vst [vmem:[%s3520_s3 + $0x8] sm:$0x77] %v2603_v24  ;;  %v2228_v31 = vmax.f32 %v3449_v36, %v2053_v27  ;;  %v2055_v34 = vpop.f32.mrb[54].mxu1  ;;  %v2246_v32 = vadd.f32 %v3465_v1, %v2225_v25  ;;  %v2015_v37 = vpop.f32.mrb[55].mxu0 }
 0x149   :  { %v2248_v28 = vadd.f32 %v3465_v1, %v2227_v26  ;;  %v2056_v38 = vpop.f32.mrb[55].mxu1  ;;  %v2247_v35 = vadd.f32 %v3465_v1, %v2226_v30 }
 0x14a   :  { %v2249_v39 = vadd.f32 %v3465_v1, %v2228_v31  ;;  %v2261_v40 = vmax.f32 %v2246_v32, 0.0 }
 0x14b   :  { %v2263_v41 = vmax.f32 %v2248_v28, 0.0  ;;  %v2262_v42 = vmax.f32 %v2247_v35, 0.0 }
 0x14c   :  { %v2264_v45 = vmax.f32 %v2249_v39, 0.0 }
 0x14d   :  { %v2604_v46 = vpack.c.bf16 %v2262_v42, %v2261_v40  ;;  %v2092_v51 = vpop.f32.mrb[56].mxu0 }
 0x14e   :  { %v2605_v50 = vpack.c.bf16 %v2264_v45, %v2263_v41  ;;  %v2133_v36 = vpop.f32.mrb[56].mxu1  ;;  %v2229_v52 = vmax.f32 %v3451_v43, %v2092_v51  ;;  %v2094_v54 = vpop.f32.mrb[57].mxu0 }
 0x14f   :  { %v2231_v53 = vmax.f32 %v3453_v44, %v2133_v36  ;;  %v2135_v55 = vpop.f32.mrb[57].mxu1  ;;  %2335 = vst [vmem:[%s3520_s3 + $0x10] sm:$0x77] %v2604_v46  ;;  %v2230_v58 = vmax.f32 %v3455_v48, %v2094_v54  ;;  %v2096_v61 = vpop.f32.mrb[58].mxu0 }
 0x150   :  { %2336 = vst [vmem:[%s3520_s3 + $0x18] sm:$0x77] %v2605_v50  ;;  %v2232_v59 = vmax.f32 %v3457_v49, %v2135_v55  ;;  %v2137_v62 = vpop.f32.mrb[58].mxu1  ;;  %v2250_v43 = vadd.f32 %v3465_v1, %v2229_v52  ;;  %v2097_v63 = vpop.f32.mrb[59].mxu0 }
 0x151   :  { %v2252_v44 = vadd.f32 %v3465_v1, %v2231_v53  ;;  %v2138_v0 = vpop.f32.mrb[59].mxu1  ;;  %v2251_v2 = vadd.f32 %v3465_v1, %v2230_v58 }
 0x152   :  { %v2253_v4 = vadd.f32 %v3465_v1, %v2232_v59  ;;  %v2265_v5 = vmax.f32 %v2250_v43, 0.0 }
 0x153   :  { %v2267_v7 = vmax.f32 %v2252_v44, 0.0  ;;  %v2266_v6 = vmax.f32 %v2251_v2, 0.0 }
 0x154   :  { %v2268_v3 = vmax.f32 %v2253_v4, 0.0 }
 0x155   :  { %v2606_v8 = vpack.c.bf16 %v2266_v6, %v2265_v5  ;;  %v2174_v9 = vpop.f32.mrb[60].mxu0 }
 0x156   :  { %v2607_v48 = vpack.c.bf16 %v2268_v3, %v2267_v7  ;;  %v2215_v49 = vpop.f32.mrb[60].mxu1  ;;  %v2233_v47 = vmax.f32 %v3459_v56, %v2174_v9  ;;  %v2176_v11 = vpop.f32.mrb[61].mxu0 }
 0x157   :  { %v2235_v10 = vmax.f32 %v3461_v57, %v2215_v49  ;;  %v2652_v13 = vpop.f32.mrb[61].mxu1  ;;  %2337 = vst [vmem:[%s3520_s3 + $0x20] sm:$0x77] %v2606_v8  ;;  %v2234_v12 = vmax.f32 %v3463_v60, %v2176_v11  ;;  %v2178_v16 = vpop.f32.mrb[62].mxu0 }
 0x158   :  { %2338 = vst [vmem:[%s3520_s3 + $0x28] sm:$0x77] %v2607_v48  ;;  %v2218_v14 = vpop.f32.mrb[62].mxu1  ;;  %v2254_v15 = vadd.f32 %v3465_v1, %v2233_v47  ;;  %v2179_v17 = vpop.f32.mrb[63].mxu0 }
 0x159   :  { %v2256_v56 = vadd.f32 %v3465_v1, %v2235_v10  ;;  %v2653_v57 = vpop.f32.mrb[63].mxu1  ;;  %v2255_v18 = vadd.f32 %v3465_v1, %v2234_v12 }
 0x15a   :  { %v2269_v19 = vmax.f32 %v2254_v15, 0.0 }
 0x15b   :  { %v2271_v20 = vmax.f32 %v2256_v56, 0.0  ;;  %v2270_v21 = vmax.f32 %v2255_v18, 0.0 }
 0x15d   :  { %v2609_v22 = vpack.c.bf16 %v2271_v20, %v2271_v20  ;;  %v2608_v23 = vpack.c.bf16 %v2270_v21, %v2269_v19 }
 0x15f   :  { %2341 = vst.msk [vmem:[%s3520_s3 + $0x38] sm:$0x7] %vm2340_vm4, %v2609_v22  ;;  %2339 = vst [vmem:[%s3520_s3 + $0x30] sm:$0x77] %v2608_v23 }

// kernel: net_forward.3
= control target key start
LH: loop header
LB: loop body
LE: loop exit
PB: predicated region body
PF: predicated region fallthrough
CT: control target
= control target key end

     0   :  { %v4993_v0 = vmov 0   ;;  %vm236_vm0 = vcmask 179200   ;;  %vm240_vm1 = vcmask 1042432   ;;  %s4995_s28 = smov 87   ;;  %s4996_s11 = smov 82   ;;  %vm1522_vm5 = vcmask 711680   ;;  %s6645_s0 = inlined_call_operand.vmem [shape: bf16[4,150,338], index: 0, kind: input, shape index: {}]   ;;  %s6646_s1 = inlined_call_operand.vmem [shape: bf16[16,150], index: 1, kind: input, shape index: {}]   ;;  %s6647_s2 = inlined_call_operand.vmem [shape: f32[16,1], index: 2, kind: input, shape index: {}]   ;;  %s6648_s3 = inlined_call_operand.vmem [shape: bf16[2704,120], index: 3, kind: input, shape index: {}]   ;;  %s6649_s4 = inlined_call_operand.vmem [shape: f32[1,120], index: 4, kind: input, shape index: {}]   ;;  %s6650_s5 = inlined_call_operand.vmem [shape: f32[120,84], index: 5, kind: input, shape index: {}]   ;;  %s6651_s7 = inlined_call_operand.vmem [shape: f32[84,1], index: 7, kind: input, shape index: {}]   ;;  %s6652_s8 = inlined_call_operand.<no memory space> [shape: f32[1,1], index: 8, kind: input, shape index: {}]   ;;  %s6653_s6 = inlined_call_operand.vmem [shape: f32[1,84], index: 6, kind: input, shape index: {}]   ;;  %s6654_s9 = inlined_call_operand.vmem [shape: f32[2,1], index: 9, kind: output, shape index: {}]  }
   0x1   :  { %293 = vmatprep.subr.bf16.mxu1 %v4993_v0  ;;  %v4660_v1 = vld [vmem:[%s6645_s0 + $0x4] ss:$12 sps:$4 sm:$0xff]   ;;  %4659 = vset.pattern.permute.xlu0 %v4993_v0  ;;  %v4662_v2 = vld [vmem:[%s6645_s0 + $0x8] ss:$12 sps:$4 sm:$0xff]   ;;  %v4663_v3 = vld [vmem:[%s6645_s0] ss:$12 sps:$4 sm:$0xff]  }
   0x2   :  { %250 = vmatprep.subr.bf16.mxu0 %v4660_v1  ;;  %294 = vmatpush1.bf16.msra.mxu1 %v4662_v2  ;;  %v4664_v4 = vld [vmem:[%s6645_s0 + $0x1c] ss:$12 sps:$4 sm:$0xff]   ;;  %v4666_v5 = vld [vmem:[%s6645_s0 + $0x20] ss:$12 sps:$4 sm:$0xff]   ;;  %v4667_v6 = vld [vmem:[%s6645_s0 + $0x18] ss:$12 sps:$4 sm:$0xff]  }
   0x3   :  { %251 = vmatpush1.bf16.msra.mxu0 %v4663_v3  ;;  %295 = vmatprep.subr.bf16.mxu1 %v4993_v0  ;;  %v4668_v7 = vld [vmem:[%s6645_s0 + $0x34] ss:$12 sps:$4 sm:$0xff]   ;;  %v4670_v8 = vld [vmem:[%s6645_s0 + $0x38] ss:$12 sps:$4 sm:$0xff]   ;;  %v4671_v9 = vld [vmem:[%s6645_s0 + $0x30] ss:$12 sps:$4 sm:$0xff]  }
   0x4   :  { %252 = vmatprep.subr.bf16.mxu0 %v4664_v4  ;;  %v4672_v10 = vld [vmem:[%s6645_s0 + $0x4c] ss:$12 sps:$4 sm:$0xff]   ;;  %v4674_v11 = vld [vmem:[%s6645_s0 + $0x50] ss:$12 sps:$4 sm:$0xff]   ;;  %v4675_v12 = vld [vmem:[%s6645_s0 + $0x48] ss:$12 sps:$4 sm:$0xff]  }
   0x5   :  { %v4676_v13 = vld [vmem:[%s6645_s0 + $0x64] ss:$12 sps:$4 sm:$0xff]   ;;  %v4678_v14 = vld [vmem:[%s6645_s0 + $0x68] ss:$12 sps:$4 sm:$0xff]   ;;  %v4679_v15 = vld [vmem:[%s6645_s0 + $0x60] ss:$12 sps:$4 sm:$0xff]  }
   0x6   :  { %296 = vmatpush1.bf16.msra.mxu1 %v4666_v5  ;;  %v4680_v16 = vld [vmem:[%s6645_s0 + $0x7c] ss:$12 sps:$4 sm:$0xff]   ;;  %v4682_v17 = vld [vmem:[%s6645_s0 + $0x80] ss:$12 sps:$4 sm:$0xff]   ;;  %v4683_v18 = vld [vmem:[%s6645_s0 + $0x78] ss:$12 sps:$4 sm:$0xff]  }
   0x7   :  { %253 = vmatpush1.bf16.msra.mxu0 %v4667_v6  ;;  %297 = vmatprep.subr.bf16.mxu1 %v4993_v0  ;;  %v4684_v19 = vld [vmem:[%s6645_s0 + $0x94] ss:$12 sps:$4 sm:$0xff]   ;;  %v5132_v20 = vld [vmem:[%s6646_s1 + $0x4] ss:$8 sps:$4 sm:$0xff]   ;;  %v4687_v22 = vld [vmem:[%s6645_s0 + $0x90] ss:$12 sps:$4 sm:$0xff]  }
   0x8   :  { %254 = vmatprep.subr.bf16.mxu0 %v4668_v7  ;;  %v4686_v21 = vld [vmem:[%s6645_s0 + $0x98] ss:$12 sps:$4 sm:$0xff]   ;;  %3904 = vmatprep.mubr.msk.bf16.mxu1 %vm236_vm0, %v5132_v20  ;;  %v4690_v24 = vld [vmem:[%s6645_s0 + $0xb0] ss:$12 sps:$4 sm:$0xff]   ;;  %v4691_v25 = vld [vmem:[%s6645_s0 + $0xa8] ss:$12 sps:$4 sm:$0xff]  }
   0x9   :  { %v4688_v23 = vld [vmem:[%s6645_s0 + $0xac] ss:$12 sps:$4 sm:$0xff]   ;;  %3903 = vmatprep.mubr.msk.bf16.mxu0 %vm236_vm0, %v5132_v20  ;;  %v4692_v26 = vld [vmem:[%s6645_s0 + $0xc4] ss:$12 sps:$4 sm:$0xff]   ;;  %v4694_v28 = vld [vmem:[%s6645_s0 + $0xc8] ss:$12 sps:$4 sm:$0xff]  }
   0xa   :  { %298 = vmatpush1.bf16.msra.mxu1 %v4670_v8  ;;  %v73_v27 = vld [vmem:[%s6645_s0 + $0xd8] sm:$0x77]  ;;  %v4697_v29 = vld [vmem:[%s6645_s0 + $0xe0] ss:$0 sps:$4 sm:$0x77]   ;;  %s4998_s20 = smov 123  }
   0xb   :  { %255 = vmatpush1.bf16.msra.mxu0 %v4671_v9  ;;  %299 = vmatprep.subr.bf16.mxu1 %v4993_v0  ;;  %v4695_v30 = vld [vmem:[%s6645_s0 + $0xc0] ss:$12 sps:$4 sm:$0xff]   ;;  %v3900_v31 = vcombine.high %v73_v27, %v73_v27  ;;  %v3899_v32 = vcombine.low %v73_v27, %v73_v27  ;;  %v248_v33 = vsel %vm240_vm1, %v4697_v29, 0  ;;  %v4704_v35 = vld [vmem:[%s6645_s0 + $0xe8] ss:$12 sps:$4 sm:$0xff]   ;;  %s5001_s24 = smov 118  }
   0xc   :  { %256 = vmatprep.subr.bf16.mxu0 %v4672_v10  ;;  %v5181_v36 = vld [vmem:[%s6646_s1] ss:$8 sps:$4 sm:$0xff]   ;;  %v4705_v37 = vld [vmem:[%s6645_s0 + $0xec] ss:$12 sps:$4 sm:$0xff]   ;;  %v4702_v38 = vld [vmem:[%s6645_s0 + $0xe4] ss:$12 sps:$4 sm:$0xff]  }
   0xd   :  { %v242_v34 = vsel %vm240_vm1, %v3899_v32, 0  ;;  %v4708_v39 = vld [vmem:[%s6645_s0 + $0x100] ss:$12 sps:$4 sm:$0xff]   ;;  %v4709_v40 = vld [vmem:[%s6645_s0 + $0x104] ss:$12 sps:$4 sm:$0xff]   ;;  %s4997_s1 = smov 41  }
   0xe   :  { %300 = vmatpush1.bf16.msra.mxu1 %v4674_v11  ;;  %v4706_v41 = vld [vmem:[%s6645_s0 + $0xfc] ss:$12 sps:$4 sm:$0xff]   ;;  %v4712_v42 = vld [vmem:[%s6645_s0 + $0x118] ss:$12 sps:$4 sm:$0xff]   ;;  %v4710_v44 = vld [vmem:[%s6645_s0 + $0x114] ss:$12 sps:$4 sm:$0xff]  }
   0xf   :  { %257 = vmatpush1.bf16.msra.mxu0 %v4675_v12  ;;  %301 = vmatprep.subr.bf16.mxu1 %v4993_v0  ;;  %v4713_v43 = vld [vmem:[%s6645_s0 + $0x11c] ss:$12 sps:$4 sm:$0xff]   ;;  %v4717_v46 = vld [vmem:[%s6645_s0 + $0x134] ss:$12 sps:$4 sm:$0xff]   ;;  %v4714_v47 = vld [vmem:[%s6645_s0 + $0x12c] ss:$12 sps:$4 sm:$0xff]  }
  0x10   :  { %258 = vmatprep.subr.bf16.mxu0 %v4676_v13  ;;  %v4716_v45 = vld [vmem:[%s6645_s0 + $0x130] ss:$12 sps:$4 sm:$0xff]   ;;  %v4720_v48 = vld [vmem:[%s6645_s0 + $0x148] ss:$12 sps:$4 sm:$0xff]   ;;  %v4721_v49 = vld [vmem:[%s6645_s0 + $0x14c] ss:$12 sps:$4 sm:$0xff]  }
  0x11   :  { %v4718_v50 = vld [vmem:[%s6645_s0 + $0x144] ss:$12 sps:$4 sm:$0xff]   ;;  %v4724_v51 = vld [vmem:[%s6645_s0 + $0x160] ss:$12 sps:$4 sm:$0xff]   ;;  %v4722_v53 = vld [vmem:[%s6645_s0 + $0x15c] ss:$12 sps:$4 sm:$0xff]  }
  0x12   :  { %302 = vmatpush1.bf16.msra.mxu1 %v4678_v14  ;;  %v4725_v52 = vld [vmem:[%s6645_s0 + $0x164] ss:$12 sps:$4 sm:$0xff]   ;;  %v4729_v55 = vld [vmem:[%s6645_s0 + $0x17c] ss:$12 sps:$4 sm:$0xff]   ;;  %v4726_v56 = vld [vmem:[%s6645_s0 + $0x174] ss:$12 sps:$4 sm:$0xff]  }
  0x13   :  { %259 = vmatpush1.bf16.msra.mxu0 %v4679_v15  ;;  %303 = vmatprep.subr.bf16.mxu1 %v4993_v0  ;;  %v4728_v54 = vld [vmem:[%s6645_s0 + $0x178] ss:$12 sps:$4 sm:$0xff]   ;;  %v4732_v57 = vld [vmem:[%s6645_s0 + $0x190] ss:$12 sps:$4 sm:$0xff]   ;;  %v4733_v58 = vld [vmem:[%s6645_s0 + $0x194] ss:$12 sps:$4 sm:$0xff]  }
  0x14   :  { %260 = vmatprep.subr.bf16.mxu0 %v4680_v16  ;;  %v4730_v59 = vld [vmem:[%s6645_s0 + $0x18c] ss:$12 sps:$4 sm:$0xff]   ;;  %v4736_v60 = vld [vmem:[%s6645_s0 + $0x1a8] ss:$12 sps:$4 sm:$0xff]   ;;  %v3941_v61 = vld [vmem:[%s6645_s0 + $0x1bc] sm:$0x77] }
  0x15   :  { %v4734_v62 = vld [vmem:[%s6645_s0 + $0x1a4] ss:$12 sps:$4 sm:$0xff]   ;;  %v4737_v63 = vld [vmem:[%s6645_s0 + $0x1ac] ss:$12 sps:$4 sm:$0xff]   ;;  %v3971_v2 = vcombine.high %v3941_v61, %v3941_v61  ;;  %v3970_v3 = vcombine.low %v3941_v61, %v3941_v61  ;;  %v4741_v8 = vld [vmem:[%s6645_s0 + $0x1c8] ss:$12 sps:$4 sm:$0xff]  }
  0x16   :  { %304 = vmatpush1.bf16.msra.mxu1 %v4682_v17  ;;  %v4739_v1 = vld [vmem:[%s6645_s0 + $0x1c4] ss:$0 sps:$4 sm:$0x77]   ;;  %v4743_v6 = vld [vmem:[%s6645_s0 + $0x1cc] ss:$12 sps:$4 sm:$0xff]   ;;  %s5002_s30 = smov 72  }
  0x17   :  { %261 = vmatpush1.bf16.msra.mxu0 %v4683_v18  ;;  %305 = vmatprep.subr.bf16.mxu1 %v4993_v0  ;;  %v532_v4 = vsel %vm240_vm1, %v4739_v1, 0  ;;  %v526_v5 = vsel %vm240_vm1, %v3970_v3, 0  ;;  %v4744_v7 = vld [vmem:[%s6645_s0 + $0x1d0] ss:$12 sps:$4 sm:$0xff]   ;;  %v4748_v10 = vld [vmem:[%s6645_s0 + $0x1e8] ss:$12 sps:$4 sm:$0xff]  }
  0x18   :  { %262 = vmatprep.subr.bf16.mxu0 %v4684_v19  ;;  %v4747_v9 = vld [vmem:[%s6645_s0 + $0x1e4] ss:$12 sps:$4 sm:$0xff]   ;;  %v4745_v11 = vld [vmem:[%s6645_s0 + $0x1e0] ss:$12 sps:$4 sm:$0xff]   ;;  %v4751_v12 = vld [vmem:[%s6645_s0 + $0x1fc] ss:$12 sps:$4 sm:$0xff]  }
  0x19   :  { %v4752_v13 = vld [vmem:[%s6645_s0 + $0x200] ss:$12 sps:$4 sm:$0xff]   ;;  %v4749_v14 = vld [vmem:[%s6645_s0 + $0x1f8] ss:$12 sps:$4 sm:$0xff]   ;;  %v4753_v19 = vld [vmem:[%s6645_s0 + $0x210] ss:$12 sps:$4 sm:$0xff]  }
  0x1a   :  { %306 = vmatpush1.bf16.msra.mxu1 %v4686_v21  ;;  %v4755_v15 = vld [vmem:[%s6645_s0 + $0x214] ss:$12 sps:$4 sm:$0xff]   ;;  %v4756_v17 = vld [vmem:[%s6645_s0 + $0x218] ss:$12 sps:$4 sm:$0xff]   ;;  %v1205_v18 = vld [vmem:[%s6647_s2 + $0x8] sm:$0xff]  ;;  %s5005_s10 = smov 26  }
  0x1b   :  { %263 = vmatpush1.bf16.msra.mxu0 %v4687_v22  ;;  %307 = vmatprep.subr.bf16.mxu1 %v4993_v0  ;;  %v1204_v16 = vld [vmem:[%s6647_s2] sm:$0xff]  ;;  %v4759_v21 = vld [vmem:[%s6645_s0 + $0x22c] ss:$12 sps:$4 sm:$0xff]   ;;  %v4760_v22 = vld [vmem:[%s6645_s0 + $0x230] ss:$12 sps:$4 sm:$0xff]   ;;  %s5004_s2 = smov 113  }
  0x1c   :  { %264 = vmatprep.subr.bf16.mxu0 %v4688_v23  ;;  %1208 = vperm.xlu0 %4659, %v1204_v16   ;;  %v4757_v23 = vld [vmem:[%s6645_s0 + $0x228] ss:$12 sps:$4 sm:$0xff]   ;;  %v4765_v29 = vld [vmem:[%s6645_s0 + $0x258] ss:$12 sps:$4 sm:$0xff]   ;;  %v4769_v32 = vld [vmem:[%s6645_s0 + $0x270] ss:$12 sps:$4 sm:$0xff]  }
  0x1d   :  { %v4767_v27 = vld [vmem:[%s6645_s0 + $0x25c] ss:$12 sps:$4 sm:$0xff]   ;;  %v4807_v61 = vld [vmem:[%s6645_s0 + $0x344] ss:$12 sps:$4 sm:$0xff]   ;;  %s5006_s12 = smov 67   ;;  %s5007_s13 = smov 108  }
  0x1e   :  { %308 = vmatpush1.bf16.msra.mxu1 %v4690_v24  ;;  %v4763_v24 = vld [vmem:[%s6645_s0 + $0x244] ss:$12 sps:$4 sm:$0xff]   ;;  %v4811_v1 = vld [vmem:[%s6645_s0 + $0x35c] ss:$12 sps:$4 sm:$0xff]   ;;  %s5008_s14 = smov 21   ;;  %s5009_s15 = smov 62  }
  0x1f   :  { %265 = vmatpush1.bf16.msra.mxu0 %v4691_v25  ;;  %309 = vmatprep.subr.bf16.mxu1 %v4993_v0  ;;  %v4764_v25 = vld [vmem:[%s6645_s0 + $0x248] ss:$12 sps:$4 sm:$0xff]   ;;  %v4814_v3 = vld [vmem:[%s6645_s0 + $0x370] ss:$12 sps:$4 sm:$0xff]   ;;  %vm1262_vm9 = vcmask 334848   ;;  %vm1274_vm12 = vcmask 670720  }
  0x20   :  { %266 = vmatprep.subr.bf16.mxu0 %v4692_v26  ;;  %1213 = vperm.xlu0 %4659, %v1205_v18   ;;  %v4761_v26 = vld [vmem:[%s6645_s0 + $0x240] ss:$12 sps:$4 sm:$0xff]   ;;  %vm1286_vm14 = vcmask 1006592  }
  0x22   :  { %310 = vmatpush1.bf16.msra.mxu1 %v4694_v28  ;;  %v4768_v28 = vld [vmem:[%s6645_s0 + $0x260] ss:$12 sps:$4 sm:$0xff]  }
  0x23   :  { %267 = vmatpush1.bf16.msra.mxu0 %v4695_v30  ;;  %311 = vmatprep.subr.bf16.mxu1 %v4993_v0  ;;  %v4771_v30 = vld [vmem:[%s6645_s0 + $0x274] ss:$12 sps:$4 sm:$0xff]  }
  0x24   :  { %3902 = vmatprep.subr.msk.bf16.mxu0 %vm240_vm1, %v3900_v31  ;;  %v4772_v31 = vld [vmem:[%s6645_s0 + $0x278] ss:$12 sps:$4 sm:$0xff]  }
  0x26   :  { %312 = vmatpush1.bf16.msra.mxu1 %v248_v33  ;;  %v4775_v33 = vld [vmem:[%s6645_s0 + $0x28c] ss:$12 sps:$4 sm:$0xff]  }
  0x27   :  { %269 = vmatpush1.bf16.msra.mxu0 %v242_v34  ;;  %577 = vmatprep.subr.bf16.mxu1 %v4993_v0  ;;  %v4012_v34 = vld [vmem:[%s6645_s0 + $0x2a0] sm:$0x77] }
  0x28   :  { %534 = vmatprep.subr.bf16.mxu0 %v4704_v35  ;;  %v4776_v35 = vld [vmem:[%s6645_s0 + $0x290] ss:$12 sps:$4 sm:$0xff]  }
  0x29   :  { %326 = vmatmul.mubr.bf16.vlgmr.msra.gmra.mrb[0].mxu1 %v5181_v36 }
  0x2a   :  { %283 = vmatmul.mubr.bf16.vlgmr.msra.gmra.mrb[0].mxu0 %v5181_v36  ;;  %578 = vmatpush1.bf16.msra.mxu1 %v4705_v37  ;;  %v4773_v37 = vld [vmem:[%s6645_s0 + $0x288] ss:$12 sps:$4 sm:$0xff]  }
  0x2b   :  { %535 = vmatpush1.bf16.msra.mxu0 %v4702_v38  ;;  %579 = vmatprep.subr.bf16.mxu1 %v4993_v0  ;;  %v4778_v38 = vld [vmem:[%s6645_s0 + $0x2a8] ss:$0 sps:$4 sm:$0x77]  }
  0x2c   :  { %536 = vmatprep.subr.bf16.mxu0 %v4708_v39  ;;  %3975 = vmatprep.mubr.msk.bf16.mxu1 %vm236_vm0, %v5132_v20  ;;  %v4042_v39 = vcombine.high %v4012_v34, %v4012_v34 }
  0x2d   :  { %3974 = vmatprep.mubr.msk.bf16.mxu0 %vm236_vm0, %v5132_v20 }
  0x2e   :  { %580 = vmatpush1.bf16.msra.mxu1 %v4709_v40  ;;  %v4041_v40 = vcombine.low %v4012_v34, %v4012_v34  ;;  %v4819_v34 = vld [vmem:[%s6648_s3 + $0x40] sm:$0xff]  }
  0x2f   :  { %537 = vmatpush1.bf16.msra.mxu0 %v4706_v41  ;;  %581 = vmatprep.subr.bf16.mxu1 %v4993_v0  ;;  %v822_v41 = vsel %vm240_vm1, %v4778_v38, 0 }
  0x30   :  { %538 = vmatprep.subr.bf16.mxu0 %v4712_v42  ;;  %v816_v42 = vsel %vm240_vm1, %v4041_v40, 0 }
  0x32   :  { %582 = vmatpush1.bf16.msra.mxu1 %v4713_v43  ;;  %v4782_v43 = vld [vmem:[%s6645_s0 + $0x2b0] ss:$12 sps:$4 sm:$0xff]  }
  0x33   :  { %539 = vmatpush1.bf16.msra.mxu0 %v4710_v44  ;;  %583 = vmatprep.subr.bf16.mxu1 %v4993_v0  ;;  %v4783_v44 = vld [vmem:[%s6645_s0 + $0x2b4] ss:$12 sps:$4 sm:$0xff]  }
  0x34   :  { %540 = vmatprep.subr.bf16.mxu0 %v4716_v45  ;;  %v4780_v45 = vld [vmem:[%s6645_s0 + $0x2ac] ss:$12 sps:$4 sm:$0xff]  }
  0x36   :  { %584 = vmatpush1.bf16.msra.mxu1 %v4717_v46  ;;  %v4786_v46 = vld [vmem:[%s6645_s0 + $0x2c8] ss:$12 sps:$4 sm:$0xff]  }
  0x37   :  { %541 = vmatpush1.bf16.msra.mxu0 %v4714_v47  ;;  %585 = vmatprep.subr.bf16.mxu1 %v4993_v0  ;;  %v4787_v47 = vld [vmem:[%s6645_s0 + $0x2cc] ss:$12 sps:$4 sm:$0xff]  }
  0x38   :  { %542 = vmatprep.subr.bf16.mxu0 %v4720_v48  ;;  %v4784_v48 = vld [vmem:[%s6645_s0 + $0x2c4] ss:$12 sps:$4 sm:$0xff]  }
  0x3a   :  { %586 = vmatpush1.bf16.msra.mxu1 %v4721_v49  ;;  %v4790_v49 = vld [vmem:[%s6645_s0 + $0x2e0] ss:$12 sps:$4 sm:$0xff]  }
  0x3b   :  { %543 = vmatpush1.bf16.msra.mxu0 %v4718_v50  ;;  %587 = vmatprep.subr.bf16.mxu1 %v4993_v0  ;;  %v4791_v50 = vld [vmem:[%s6645_s0 + $0x2e4] ss:$12 sps:$4 sm:$0xff]  }
  0x3c   :  { %544 = vmatprep.subr.bf16.mxu0 %v4724_v51  ;;  %v4788_v51 = vld [vmem:[%s6645_s0 + $0x2dc] ss:$12 sps:$4 sm:$0xff]  }
  0x3e   :  { %588 = vmatpush1.bf16.msra.mxu1 %v4725_v52  ;;  %v4794_v52 = vld [vmem:[%s6645_s0 + $0x2f8] ss:$12 sps:$4 sm:$0xff]  }
  0x3f   :  { %545 = vmatpush1.bf16.msra.mxu0 %v4722_v53  ;;  %589 = vmatprep.subr.bf16.mxu1 %v4993_v0  ;;  %v4792_v53 = vld [vmem:[%s6645_s0 + $0x2f4] ss:$12 sps:$4 sm:$0xff]  }
  0x40   :  { %546 = vmatprep.subr.bf16.mxu0 %v4728_v54  ;;  %v4798_v54 = vld [vmem:[%s6645_s0 + $0x310] ss:$12 sps:$4 sm:$0xff]  }
  0x42   :  { %590 = vmatpush1.bf16.msra.mxu1 %v4729_v55  ;;  %v4799_v55 = vld [vmem:[%s6645_s0 + $0x314] ss:$12 sps:$4 sm:$0xff]  }
  0x43   :  { %547 = vmatpush1.bf16.msra.mxu0 %v4726_v56  ;;  %591 = vmatprep.subr.bf16.mxu1 %v4993_v0  ;;  %v4796_v56 = vld [vmem:[%s6645_s0 + $0x30c] ss:$12 sps:$4 sm:$0xff]  }
  0x44   :  { %548 = vmatprep.subr.bf16.mxu0 %v4732_v57  ;;  %v4802_v57 = vld [vmem:[%s6645_s0 + $0x328] ss:$12 sps:$4 sm:$0xff]  }
  0x46   :  { %592 = vmatpush1.bf16.msra.mxu1 %v4733_v58  ;;  %v4803_v58 = vld [vmem:[%s6645_s0 + $0x32c] ss:$12 sps:$4 sm:$0xff]  }
  0x47   :  { %549 = vmatpush1.bf16.msra.mxu0 %v4730_v59  ;;  %593 = vmatprep.subr.bf16.mxu1 %v4993_v0  ;;  %v4800_v59 = vld [vmem:[%s6645_s0 + $0x324] ss:$12 sps:$4 sm:$0xff]  }
  0x48   :  { %550 = vmatprep.subr.bf16.mxu0 %v4736_v60  ;;  %v4806_v60 = vld [vmem:[%s6645_s0 + $0x340] ss:$12 sps:$4 sm:$0xff]  }
  0x4a   :  { %594 = vmatpush1.bf16.msra.mxu1 %v4737_v63  ;;  %v4810_v63 = vld [vmem:[%s6645_s0 + $0x358] ss:$12 sps:$4 sm:$0xff]  }
  0x4b   :  { %551 = vmatpush1.bf16.msra.mxu0 %v4734_v62  ;;  %595 = vmatprep.subr.bf16.mxu1 %v4993_v0  ;;  %v4804_v62 = vld [vmem:[%s6645_s0 + $0x33c] ss:$12 sps:$4 sm:$0xff]  }
  0x4c   :  { %3973 = vmatprep.subr.msk.bf16.mxu0 %vm240_vm1, %v3971_v2  ;;  %v4808_v2 = vld [vmem:[%s6645_s0 + $0x354] ss:$12 sps:$4 sm:$0xff]  }
  0x4e   :  { %596 = vmatpush1.bf16.msra.mxu1 %v532_v4  ;;  %v4083_v4 = vld [vmem:[%s6645_s0 + $0x384] sm:$0x77] }
  0x4f   :  { %553 = vmatpush1.bf16.msra.mxu0 %v526_v5  ;;  %867 = vmatprep.subr.bf16.mxu1 %v4993_v0  ;;  %v4815_v5 = vld [vmem:[%s6645_s0 + $0x374] ss:$12 sps:$4 sm:$0xff]  }
  0x50   :  { %824 = vmatprep.subr.bf16.mxu0 %v4743_v6  ;;  %v4812_v6 = vld [vmem:[%s6645_s0 + $0x36c] ss:$12 sps:$4 sm:$0xff]  }
  0x51   :  { %610 = vmatmul.mubr.bf16.vlgmr.msra.gmra.mrb[4].mxu1 %v5181_v36 }
  0x52   :  { %567 = vmatmul.mubr.bf16.vlgmr.msra.gmra.mrb[4].mxu0 %v5181_v36  ;;  %868 = vmatpush1.bf16.msra.mxu1 %v4744_v7  ;;  %v4817_v7 = vld [vmem:[%s6645_s0 + $0x38c] ss:$0 sps:$4 sm:$0x77]  }
  0x53   :  { %825 = vmatpush1.bf16.msra.mxu0 %v4741_v8  ;;  %869 = vmatprep.subr.bf16.mxu1 %v4993_v0  ;;  %v4113_v8 = vcombine.high %v4083_v4, %v4083_v4 }
  0x54   :  { %826 = vmatprep.subr.bf16.mxu0 %v4747_v9  ;;  %4046 = vmatprep.mubr.msk.bf16.mxu1 %vm236_vm0, %v5132_v20  ;;  %v4112_v9 = vcombine.low %v4083_v4, %v4083_v4 }
  0x55   :  { %4045 = vmatprep.mubr.msk.bf16.mxu0 %vm236_vm0, %v5132_v20 }
  0x56   :  { %870 = vmatpush1.bf16.msra.mxu1 %v4748_v10  ;;  %v1112_v10 = vsel %vm240_vm1, %v4817_v7, 0 }
  0x57   :  { %827 = vmatpush1.bf16.msra.mxu0 %v4745_v11  ;;  %871 = vmatprep.subr.bf16.mxu1 %v4993_v0  ;;  %v1106_v11 = vsel %vm240_vm1, %v4112_v9, 0 }
  0x58   :  { %828 = vmatprep.subr.bf16.mxu0 %v4751_v12 }
  0x5a   :  { %872 = vmatpush1.bf16.msra.mxu1 %v4752_v13 }
  0x5b   :  { %829 = vmatpush1.bf16.msra.mxu0 %v4749_v14  ;;  %873 = vmatprep.subr.bf16.mxu1 %v4993_v0 }
  0x5c   :  { %830 = vmatprep.subr.bf16.mxu0 %v4755_v15 }
  0x5e   :  { %874 = vmatpush1.bf16.msra.mxu1 %v4756_v17 }
  0x5f   :  { %831 = vmatpush1.bf16.msra.mxu0 %v4753_v19  ;;  %875 = vmatprep.subr.bf16.mxu1 %v4993_v0 }
  0x60   :  { %832 = vmatprep.subr.bf16.mxu0 %v4759_v21 }
  0x62   :  { %876 = vmatpush1.bf16.msra.mxu1 %v4760_v22 }
  0x63   :  { %833 = vmatpush1.bf16.msra.mxu0 %v4757_v23  ;;  %877 = vmatprep.subr.bf16.mxu1 %v4993_v0 }
  0x64   :  { %834 = vmatprep.subr.bf16.mxu0 %v4763_v24 }
  0x66   :  { %878 = vmatpush1.bf16.msra.mxu1 %v4764_v25 }
  0x67   :  { %835 = vmatpush1.bf16.msra.mxu0 %v4761_v26  ;;  %879 = vmatprep.subr.bf16.mxu1 %v4993_v0 }
  0x68   :  { %836 = vmatprep.subr.bf16.mxu0 %v4767_v27 }
  0x6a   :  { %880 = vmatpush1.bf16.msra.mxu1 %v4768_v28 }
  0x6b   :  { %837 = vmatpush1.bf16.msra.mxu0 %v4765_v29  ;;  %881 = vmatprep.subr.bf16.mxu1 %v4993_v0 }
  0x6c   :  { %838 = vmatprep.subr.bf16.mxu0 %v4771_v30 }
  0x6e   :  { %882 = vmatpush1.bf16.msra.mxu1 %v4772_v31 }
  0x6f   :  { %839 = vmatpush1.bf16.msra.mxu0 %v4769_v32  ;;  %883 = vmatprep.subr.bf16.mxu1 %v4993_v0 }
  0x70   :  { %840 = vmatprep.subr.bf16.mxu0 %v4775_v33 }
  0x72   :  { %884 = vmatpush1.bf16.msra.mxu1 %v4776_v35  ;;  %v4820_v35 = vld [vmem:[%s6648_s3] sm:$0xff]  }
  0x73   :  { %841 = vmatpush1.bf16.msra.mxu0 %v4773_v37  ;;  %885 = vmatprep.subr.bf16.mxu1 %v4993_v0  ;;  %v4821_v37 = vld [vmem:[%s6648_s3 + $0xc0] sm:$0xff]  }
  0x74   :  { %4044 = vmatprep.subr.msk.bf16.mxu0 %vm240_vm1, %v4042_v39 }
  0x76   :  { %886 = vmatpush1.bf16.msra.mxu1 %v822_v41 }
  0x77   :  { %843 = vmatpush1.bf16.msra.mxu0 %v816_v42  ;;  %1157 = vmatprep.subr.bf16.mxu1 %v4993_v0 }
  0x78   :  { %1114 = vmatprep.subr.bf16.mxu0 %v4782_v43 }
  0x79   :  { %900 = vmatmul.mubr.bf16.vlgmr.msra.gmra.mrb[8].mxu1 %v5181_v36 }
  0x7a   :  { %857 = vmatmul.mubr.bf16.vlgmr.msra.gmra.mrb[8].mxu0 %v5181_v36  ;;  %1158 = vmatpush1.bf16.msra.mxu1 %v4783_v44 }
  0x7b   :  { %1115 = vmatpush1.bf16.msra.mxu0 %v4780_v45  ;;  %1159 = vmatprep.subr.bf16.mxu1 %v4993_v0 }
  0x7c   :  { %1116 = vmatprep.subr.bf16.mxu0 %v4786_v46  ;;  %4117 = vmatprep.mubr.msk.bf16.mxu1 %vm236_vm0, %v5132_v20 }
  0x7d   :  { %4116 = vmatprep.mubr.msk.bf16.mxu0 %vm236_vm0, %v5132_v20  ;;  %v4795_v20 = vld [vmem:[%s6645_s0 + $0x2fc] ss:$12 sps:$4 sm:$0xff]  }
  0x7e   :  { %1160 = vmatpush1.bf16.msra.mxu1 %v4787_v47 }
  0x7f   :  { %1117 = vmatpush1.bf16.msra.mxu0 %v4784_v48  ;;  %1161 = vmatprep.subr.bf16.mxu1 %v4993_v0 }
  0x80   :  { %1118 = vmatprep.subr.bf16.mxu0 %v4790_v49 }
  0x82   :  { %1162 = vmatpush1.bf16.msra.mxu1 %v4791_v50 }
  0x83   :  { %1119 = vmatpush1.bf16.msra.mxu0 %v4788_v51  ;;  %1163 = vmatprep.subr.bf16.mxu1 %v4993_v0 }
  0x84   :  { %1120 = vmatprep.subr.bf16.mxu0 %v4794_v52 }
  0x86   :  { %1164 = vmatpush1.bf16.msra.mxu1 %v4795_v20  ;;  %v1234_v20 = vlaneseq }
  0x87   :  { %1121 = vmatpush1.bf16.msra.mxu0 %v4792_v53  ;;  %1165 = vmatprep.subr.bf16.mxu1 %v4993_v0  ;;  %v4994_v53 = vmov 1966171168  }
  0x88   :  { %1122 = vmatprep.subr.bf16.mxu0 %v4798_v54  ;;  %v1232_v54 = vunpack.c.l.s4 %v4994_v53  ;;  %vm5544_vm2 = vcmp.lt.s32.totalorder %v1234_v20, 169  ;;  %v4835_v53 = vld [vmem:[%s6648_s3 + $0x60] sm:$0xff]   ;;  %vm5672_vm3 = vcmp.ge.s32.totalorder %v1234_v20, 41  ;;  %vm5677_vm4 = vcmp.lt.s32.totalorder %v1234_v20, 210 }
  0x89   :  { %vm1267_vm6 = vmand %vm5672_vm3, %vm5677_vm4  ;;  %vm5686_vm7 = vcmp.ge.s32.totalorder %v1234_v20, 82  ;;  %vm5691_vm8 = vcmp.lt.s32.totalorder %v1234_v20, 251  ;;  %vm5698_vm10 = vcmp.ge.s32.totalorder %v1234_v20, 123  ;;  %vm5703_vm11 = vcmp.lt.s32.totalorder %v1234_v20, 292 }
  0x8a   :  { %1166 = vmatpush1.bf16.msra.mxu1 %v4799_v55  ;;  %vm1279_vm13 = vmand %vm5686_vm7, %vm5691_vm8  ;;  %vm5729_vm0 = vcmp.ge.s32.totalorder %v1234_v20, 36  ;;  %vm5760_vm4 = vcmp.ge.s32.totalorder %v1234_v20, 77  ;;  %vm5786_vm8 = vcmp.ge.s32.totalorder %v1234_v20, 118 }
  0x8b   :  { %1123 = vmatpush1.bf16.msra.mxu0 %v4796_v56  ;;  %1167 = vmatprep.subr.bf16.mxu1 %v4993_v0  ;;  %vm1291_vm15 = vmand %vm5698_vm10, %vm5703_vm11  ;;  %vm1343_vm10 = vcmask 965632  }
  0x8c   :  { %1124 = vmatprep.subr.bf16.mxu0 %v4802_v57  ;;  %v5516_v57 = vshrl.u32 %v1234_v20, 7 }
  0x8e   :  { %1168 = vmatpush1.bf16.msra.mxu1 %v4803_v58 }
  0x8f   :  { %1125 = vmatpush1.bf16.msra.mxu0 %v4800_v59  ;;  %1169 = vmatprep.subr.bf16.mxu1 %v4993_v0 }
  0x90   :  { %1126 = vmatprep.subr.bf16.mxu0 %v4806_v60 }
  0x92   :  { %1170 = vmatpush1.bf16.msra.mxu1 %v4807_v61 }
  0x93   :  { %1127 = vmatpush1.bf16.msra.mxu0 %v4804_v62  ;;  %1171 = vmatprep.subr.bf16.mxu1 %v4993_v0 }
  0x94   :  { %1128 = vmatprep.subr.bf16.mxu0 %v4810_v63 }
  0x96   :  { %1172 = vmatpush1.bf16.msra.mxu1 %v4811_v1 }
  0x97   :  { %1129 = vmatpush1.bf16.msra.mxu0 %v4808_v2  ;;  %1173 = vmatprep.subr.bf16.mxu1 %v4993_v0 }
  0x98   :  { %1130 = vmatprep.subr.bf16.mxu0 %v4814_v3 }
  0x9a   :  { %1174 = vmatpush1.bf16.msra.mxu1 %v4815_v5 }
  0x9b   :  { %1131 = vmatpush1.bf16.msra.mxu0 %v4812_v6  ;;  %1175 = vmatprep.subr.bf16.mxu1 %v4993_v0  ;;  %v1209_v52 = vpop.permute.xlu0 %1208  ;;  %v1233_v6 = vunpack.c.0.s8 %v1232_v54 }
  0x9c   :  { %4115 = vmatprep.subr.msk.bf16.mxu0 %vm240_vm1, %v4113_v8  ;;  %vm5734_vm1 = vcmp.lt.s32.totalorder %v1234_v20, 205 }
  0x9d   :  { %vm1317_vm3 = vmand %vm5729_vm0, %vm5734_vm1  ;;  %vm1355_vm0 = vcmask 252928   ;;  %vm6656_vm1 = vcmask 588800  }
  0x9e   :  { %1176 = vmatpush1.bf16.msra.mxu1 %v1112_v10 }
  0x9f   :  { %1133 = vmatpush1.bf16.msra.mxu0 %v1106_v11  ;;  %4317 = vmatprep.subr.bf16.mxu1 %v4821_v37  ;;  %v1214_v56 = vpop.permute.xlu0 %1213  ;;  %v4828_v37 = vld [vmem:[%s6648_s3 + $0x10] sm:$0xff]  }
  0xa0   :  { %4295 = vmatprep.subr.bf16.mxu0 %v4819_v34 }
  0xa1   :  { %1190 = vmatmul.mubr.bf16.vlgmr.msra.gmra.mrb[12].mxu1 %v5181_v36 }
  0xa2   :  { %1147 = vmatmul.mubr.bf16.vlgmr.msra.gmra.mrb[12].mxu0 %v5181_v36 }
  0xa3   :  { %4296 = vmatpush3.bf16.msra.mxu0 %v4820_v35 }
  0xfc   :  { %v327_v12 = vpop.f32.mrb[0].mxu1 }
  0xfd   :  { %v284_v13 = vpop.f32.mrb[0].mxu0  ;;  %v329_v14 = vpop.f32.mrb[1].mxu1 }
  0xfe   :  { %v286_v15 = vpop.f32.mrb[1].mxu0  ;;  %v330_v16 = vpop.f32.mrb[2].mxu1 }
  0xff   :  { %v288_v17 = vpop.f32.mrb[2].mxu0  ;;  %v332_v18 = vpop.f32.mrb[3].mxu1 }
 0x100   :  { %v290_v19 = vpop.f32.mrb[3].mxu0 }
 0x124   :  { %v611_v21 = vpop.f32.mrb[4].mxu1 }
 0x125   :  { %v620_v22 = vmax.f32 %v327_v12, %v611_v21  ;;  %v568_v23 = vpop.f32.mrb[4].mxu0  ;;  %v613_v24 = vpop.f32.mrb[5].mxu1 }
 0x126   :  { %v618_v25 = vmax.f32 %v284_v13, %v568_v23  ;;  %v570_v26 = vpop.f32.mrb[5].mxu0  ;;  %v614_v27 = vpop.f32.mrb[6].mxu1  ;;  %v4825_v23 = vld [vmem:[%s6648_s3 + $0xc8] sm:$0xff]  }
 0x127   :  { %v619_v28 = vmax.f32 %v286_v15, %v570_v26  ;;  %v623_v29 = vmax.f32 %v330_v16, %v614_v27  ;;  %v572_v30 = vpop.f32.mrb[6].mxu0  ;;  %v616_v31 = vpop.f32.mrb[7].mxu1  ;;  %v4822_v15 = vld [vmem:[%s6648_s3 + $0x80] sm:$0xff]   ;;  %v4823_v16 = vld [vmem:[%s6648_s3 + $0x48] sm:$0xff]  }
 0x128   :  { %v621_v36 = vmax.f32 %v288_v17, %v572_v30  ;;  %v574_v32 = vpop.f32.mrb[7].mxu0  ;;  %v4824_v17 = vld [vmem:[%s6648_s3 + $0x8] sm:$0xff]   ;;  %4318 = vmatpush3.bf16.msra.mxu1 %v4822_v15  ;;  %4297 = vmatprep.subr.bf16.mxu0 %v4823_v16  ;;  %v4827_v30 = vld [vmem:[%s6648_s3 + $0x50] sm:$0xff]  }
 0x129   :  { %v622_v33 = vmax.f32 %v290_v19, %v574_v32  ;;  %4298 = vmatpush3.bf16.msra.mxu0 %v4824_v17  ;;  %4319 = vmatprep.subr.bf16.mxu1 %v4825_v23  ;;  %v4849_v17 = vld [vmem:[%s6648_s3 + $0xf8] sm:$0xff]  }
 0x12a   :  { %4299 = vmatprep.subr.bf16.mxu0 %v4827_v30  ;;  %v4850_v23 = vld [vmem:[%s6648_s3 + $0xb8] sm:$0xff]  }
 0x12d   :  { %4300 = vmatpush3.bf16.msra.mxu0 %v4828_v37 }
 0x14c   :  { %v901_v38 = vpop.f32.mrb[8].mxu1 }
 0x14d   :  { %v910_v39 = vmax.f32 %v620_v22, %v901_v38  ;;  %v858_v40 = vpop.f32.mrb[8].mxu0  ;;  %v903_v41 = vpop.f32.mrb[9].mxu1  ;;  %v5528_v22 = vsub.s32 %v1233_v6, %v5516_v57  ;;  %v4829_v38 = vld [vmem:[%s6648_s3 + $0xd0] sm:$0xff]  }
 0x14e   :  { %v908_v42 = vmax.f32 %v618_v25, %v858_v40  ;;  %v860_v43 = vpop.f32.mrb[9].mxu0  ;;  %v904_v44 = vpop.f32.mrb[10].mxu1  ;;  %v4843_v6 = vld [vmem:[%s6648_s3 + $0x70] sm:$0xff]  }
 0x14f   :  { %v909_v45 = vmax.f32 %v619_v28, %v860_v43  ;;  %v913_v46 = vmax.f32 %v623_v29, %v904_v44  ;;  %v862_v47 = vpop.f32.mrb[10].mxu0  ;;  %v906_v48 = vpop.f32.mrb[11].mxu1  ;;  %v4826_v29 = vld [vmem:[%s6648_s3 + $0x88] sm:$0xff]  }
 0x150   :  { %v911_v49 = vmax.f32 %v621_v36, %v862_v47  ;;  %v864_v50 = vpop.f32.mrb[11].mxu0  ;;  %4320 = vmatpush3.bf16.msra.mxu1 %v4826_v29 }
 0x151   :  { %v912_v51 = vmax.f32 %v622_v33, %v864_v50  ;;  %4321 = vmatprep.subr.bf16.mxu1 %v4829_v38  ;;  %v4833_v50 = vld [vmem:[%s6648_s3 + $0xd8] sm:$0xff]  }
 0x174   :  { %v1191_v55 = vpop.f32.mrb[12].mxu1 }
 0x175   :  { %v1200_v58 = vmax.f32 %v910_v39, %v1191_v55  ;;  %v1148_v59 = vpop.f32.mrb[12].mxu0  ;;  %v1193_v60 = vpop.f32.mrb[13].mxu1 }
 0x176   :  { %v1198_v61 = vmax.f32 %v908_v42, %v1148_v59  ;;  %v1150_v62 = vpop.f32.mrb[13].mxu0  ;;  %v1194_v63 = vpop.f32.mrb[14].mxu1 }
 0x177   :  { %v1218_v1 = vadd.f32 %v1209_v52, %v1200_v58  ;;  %v1199_v2 = vmax.f32 %v909_v45, %v1150_v62  ;;  %v1203_v3 = vmax.f32 %v913_v46, %v1194_v63  ;;  %v1152_v4 = vpop.f32.mrb[14].mxu0  ;;  %v1196_v5 = vpop.f32.mrb[15].mxu1  ;;  %v4830_v45 = vld [vmem:[%s6648_s3 + $0x90] sm:$0xff]   ;;  %v4831_v46 = vld [vmem:[%s6648_s3 + $0x58] sm:$0xff]   ;;  %v4836_v58 = vld [vmem:[%s6648_s3 + $0x20] sm:$0xff]  }
 0x178   :  { %v1216_v7 = vadd.f32 %v1209_v52, %v1198_v61  ;;  %v1201_v8 = vmax.f32 %v911_v49, %v1152_v4  ;;  %v1154_v9 = vpop.f32.mrb[15].mxu0  ;;  %v4832_v49 = vld [vmem:[%s6648_s3 + $0x18] sm:$0xff]   ;;  %4322 = vmatpush3.bf16.msra.mxu1 %v4830_v45  ;;  %4301 = vmatprep.subr.bf16.mxu0 %v4831_v46  ;;  %v4839_v61 = vld [vmem:[%s6648_s3 + $0x68] sm:$0xff]   ;;  %v4838_v62 = vld [vmem:[%s6648_s3 + $0xa0] sm:$0xff]  }
 0x179   :  { %v1217_v10 = vadd.f32 %v1209_v52, %v1199_v2  ;;  %v1202_v11 = vmax.f32 %v912_v51, %v1154_v9  ;;  %v1221_v14 = vadd.f32 %v1214_v56, %v1203_v3  ;;  %v1224_v18 = vmax.f32 %v1218_v1, 0.0  ;;  %v4834_v52 = vld [vmem:[%s6648_s3 + $0x98] sm:$0xff]   ;;  %4302 = vmatpush3.bf16.msra.mxu0 %v4832_v49  ;;  %4323 = vmatprep.subr.bf16.mxu1 %v4833_v50  ;;  %v4841_v2 = vld [vmem:[%s6648_s3 + $0xe8] sm:$0xff]  }
 0x17a   :  { %v1222_v12 = vmax.f32 %v1216_v7, 0.0  ;;  %v1219_v13 = vadd.f32 %v1214_v56, %v1201_v8  ;;  %4303 = vmatprep.subr.bf16.mxu0 %v4835_v53  ;;  %v4840_v3 = vld [vmem:[%s6648_s3 + $0x28] sm:$0xff]   ;;  %v4844_v8 = vld [vmem:[%s6648_s3 + $0x30] sm:$0xff]  }
 0x17b   :  { %v1223_v19 = vmax.f32 %v1217_v10, 0.0  ;;  %v1220_v21 = vadd.f32 %v1214_v56, %v1202_v11  ;;  %v1227_v31 = vmax.f32 %v1221_v14, 0.0  ;;  %v4837_v56 = vld [vmem:[%s6648_s3 + $0xe0] sm:$0xff]   ;;  %v4842_v7 = vld [vmem:[%s6648_s3 + $0xa8] sm:$0xff]   ;;  %v4845_v10 = vld [vmem:[%s6648_s3 + $0xf0] sm:$0xff]  }
 0x17c   :  { %v1225_v24 = vmax.f32 %v1219_v13, 0.0  ;;  %4324 = vmatpush3.bf16.msra.mxu1 %v4834_v52  ;;  %v4847_v13 = vld [vmem:[%s6648_s3 + $0x78] sm:$0xff]   ;;  %v4846_v14 = vld [vmem:[%s6648_s3 + $0xb0] sm:$0xff]  }
 0x17d   :  { %v1226_v25 = vmax.f32 %v1220_v21, 0.0  ;;  %v1504_v26 = vcombine.low %v1223_v19, %v1224_v18  ;;  %v1230_v27 = vcombine.low %v1222_v12, %v1223_v19  ;;  %v1294_v28 = vcombine.high %v1222_v12, %v1223_v19  ;;  %4325 = vmatprep.subr.bf16.mxu1 %v4837_v56  ;;  %4304 = vmatpush3.bf16.msra.mxu0 %v4836_v58  ;;  %v4851_v21 = vld [vmem:[%s6648_s3 + $0x140] sm:$0xff]   ;;  %v4894_v58 = vld [vmem:[%s6648_s3 + $0x2d0] sm:$0xff]  }
 0x17e   :  { %v1554_v36 = vcombine.high %v1223_v19, %v1224_v18  ;;  %4305 = vmatprep.subr.bf16.mxu0 %v4839_v61  ;;  %v4848_v18 = vld [vmem:[%s6648_s3 + $0x38] sm:$0xff]  }
 0x17f   :  { %v1511_v32 = vrot.slane %v1504_v26, %v5528_v22  ;;  %v1237_v33 = vrot.slane %v1230_v27, %v5528_v22  ;;  %v5541_v34 = vcombine.low %v1225_v24, %v1226_v25  ;;  %v5554_v39 = vcombine.low %v1226_v25, %v1227_v31 }
 0x180   :  { %v5556_v40 = vcombine.high %v1225_v24, %v1226_v25  ;;  %v5558_v41 = vcombine.high %v1226_v25, %v1227_v31  ;;  %v1301_v55 = vrot.slane %v1294_v28, %v5528_v22  ;;  %v1561_v5 = vrot.slane %v1554_v36, %v5528_v22  ;;  %4326 = vmatpush3.bf16.msra.mxu1 %v4838_v62  ;;  %v4853_v25 = vld [vmem:[%s6648_s3 + $0x1c0] sm:$0xff]  }
 0x181   :  { %v1518_v42 = vrot.slane %v1511_v32, %v5528_v22  ;;  %v1244_v43 = vrot.slane %v1237_v33, %v5528_v22  ;;  %v1251_v44 = vcombine.high %v1237_v33, %v1237_v33  ;;  %v1527_v51 = vcombine.high %v1511_v32, %v1511_v32  ;;  %4327 = vmatprep.subr.bf16.mxu1 %v4841_v2 }
 0x182   :  { %v1308_v63 = vrot.slane %v1301_v55, %v5528_v22  ;;  %v1320_v1 = vcombine.high %v1301_v55, %v1301_v55  ;;  %4306 = vmatpush3.bf16.msra.mxu0 %v4840_v3  ;;  %v1568_v11 = vrot.slane %v1561_v5, %v5528_v22  ;;  %v1576_v12 = vcombine.high %v1561_v5, %v1561_v5 }
 0x183   :  { %1519 = vrot.lane.b32.xlu1 %v1518_v42, %s4995_s28  ;;  %v1270_v47 = vcombine.high %v1244_v43, %v1244_v43  ;;  %v1258_v48 = vrot.slane %v1251_v44, %v5528_v22  ;;  %1250 = vst.msk [vmem:[#allocation2] ss:$2 sm:$0x3] %vm5544_vm2, %v1244_v43  ;;  %v1538_v59 = vcombine.high %v1518_v42, %v1518_v42  ;;  %s4999_s28 = smov 36  }
 0x184   :  { %v5593_v60 = vrot.slane %v1527_v51, %v5528_v22  ;;  %v1327_v9 = vrot.slane %v1320_v1, %v5528_v22  ;;  %4307 = vmatprep.subr.bf16.mxu0 %v4843_v6  ;;  %4328 = vmatpush3.bf16.msra.mxu1 %v4842_v7  ;;  %v1339_v15 = vcombine.high %v1308_v63, %v1308_v63  ;;  %v4855_v1 = vld [vmem:[%s6648_s3 + $0x148] sm:$0xff]  }
 0x185   :  { %1271 = vrot.lane.b32.xlu0 %v1270_v47, %s4996_s11  ;;  %v1282_v54 = vcombine.high %v1258_v48, %v1258_v48  ;;  %v1372_v16 = vrot.slane %v5541_v34, %v5528_v22  ;;  %4329 = vmatprep.subr.bf16.mxu1 %v4845_v10  ;;  %v1583_v19 = vrot.slane %v1576_v12, %v5528_v22  ;;  %v4857_v6 = vld [vmem:[%s6648_s3 + $0x1c8] sm:$0xff]  }
 0x186   :  { %v1546_v4 = vcombine.high %v5593_v60, %v5593_v60  ;;  %4308 = vmatpush3.bf16.msra.mxu0 %v4844_v8  ;;  %v1591_v26 = vcombine.high %v1568_v11, %v1568_v11  ;;  %v1615_v27 = vrot.slane %v5554_v39, %v5528_v22  ;;  %v1351_v28 = vcombine.high %v1327_v9, %v1327_v9 }
 0x187   :  { %1259 = vrot.lane.b32.xlu1 %v1258_v48, %s4997_s1  ;;  %4309 = vmatprep.subr.bf16.mxu0 %v4847_v13  ;;  %v1379_v24 = vrot.slane %v1372_v16, %v5528_v22  ;;  %v1391_v29 = vcombine.high %v1372_v16, %v1372_v16  ;;  %v1599_v36 = vcombine.high %v1583_v19, %v1583_v19  ;;  %v5011_v16 = vmov 1983009808  }
 0x188   :  { %4330 = vmatpush3.bf16.msra.mxu1 %v4846_v14  ;;  %v1622_v30 = vrot.slane %v1615_v27, %v5528_v22  ;;  %v1630_v32 = vcombine.high %v1615_v27, %v1615_v27  ;;  %v1441_v38 = vrot.slane %v5556_v40, %v5528_v22  ;;  %v1668_v45 = vrot.slane %v5558_v41, %v5528_v22  ;;  %v4859_v14 = vld [vmem:[%s6648_s3 + $0x150] sm:$0xff]  }
 0x189   :  { %1283 = vrot.lane.b32.xlu0 %v1282_v54, %s4998_s20  ;;  %4331 = vmatprep.subr.bf16.mxu1 %v4849_v17  ;;  %v1398_v31 = vrot.slane %v1391_v29, %v5528_v22  ;;  %v1410_v33 = vcombine.high %v1379_v24, %v1379_v24  ;;  %v1728_v17 = vunpack.c.l.s4 %v5011_v16  ;;  %v4858_v16 = vld [vmem:[%s6648_s3 + $0x188] sm:$0xff]   ;;  %v4860_v27 = vld [vmem:[%s6648_s3 + $0x110] sm:$0xff]  }
 0x18a   :  { %4310 = vmatpush3.bf16.msra.mxu0 %v4848_v18  ;;  %v1637_v34 = vrot.slane %v1630_v32, %v5528_v22  ;;  %v1645_v39 = vcombine.high %v1622_v30, %v1622_v30  ;;  %v1448_v42 = vrot.slane %v1441_v38, %v5528_v22  ;;  %v1460_v43 = vcombine.high %v1441_v38, %v1441_v38 }
 0x18b   :  { %1539 = vrot.lane.b32.xlu1 %v1538_v59, %s4997_s1  ;;  %s5000_s1 = smov 77   ;;  %4339 = vmatprep.subr.bf16.mxu0 %v4851_v21  ;;  %v1422_v37 = vcombine.high %v1398_v31, %v1398_v31  ;;  %v1675_v40 = vrot.slane %v1668_v45, %v5528_v22  ;;  %v1683_v47 = vcombine.high %v1668_v45, %v1668_v45  ;;  %v4852_v59 = vld [vmem:[%s6648_s3 + $0x100] sm:$0xff]  }
 0x18c   :  { %4332 = vmatpush3.bf16.msra.mxu1 %v4850_v23  ;;  %v1653_v44 = vcombine.high %v1637_v34, %v1637_v34  ;;  %v1467_v46 = vrot.slane %v1460_v43, %v5528_v22  ;;  %v1479_v48 = vcombine.high %v1448_v42, %v1448_v42 }
 0x18d   :  { %1309 = vrot.lane.b32.xlu0 %v1308_v63, %s4999_s28  ;;  %4361 = vmatprep.subr.bf16.mxu1 %v4853_v25  ;;  %v1690_v49 = vrot.slane %v1683_v47, %v5528_v22  ;;  %v1698_v51 = vcombine.high %v1675_v40, %v1675_v40 }
 0x18e   :  { %v1491_v50 = vcombine.high %v1467_v46, %v1467_v46 }
 0x18f   :  { %1547 = vrot.lane.b32.xlu1 %v1546_v4, %s4996_s11  ;;  %v1706_v41 = vcombine.high %v1690_v49, %v1690_v49 }
 0x191   :  { %1328 = vrot.lane.b32.xlu0 %v1327_v9, %s5000_s1 }
 0x193   :  { %1569 = vrot.lane.b32.xlu1 %v1568_v11, %s4998_s20 }
 0x195   :  { %1340 = vrot.lane.b32.xlu0 %v1339_v15, %s5001_s24 }
 0x197   :  { %1584 = vrot.lane.b32.xlu1 %v1583_v19, %s4999_s28  ;;  %s5003_s28 = smov 31  }
 0x199   :  { %1380 = vrot.lane.b32.xlu0 %v1379_v24, %s5002_s30 }
 0x19b   :  { %1592 = vrot.lane.b32.xlu1 %v1591_v26, %s5000_s1  ;;  %s5010_s1 = smov 103   ;;  %v4879_v26 = vld [vmem:[%s6648_s3 + $0x178] sm:$0xff]  }
 0x19d   :  { %1352 = vrot.lane.b32.xlu0 %v1351_v28, %s5003_s28  ;;  %v1729_v28 = vunpack.c.0.s8 %v1728_v17 }
 0x19f   :  { %1623 = vrot.lane.b32.xlu1 %v1622_v30, %s5003_s28 }
 0x1a1   :  { %1399 = vrot.lane.b32.xlu0 %v1398_v31, %s5004_s2 }
 0x1a3   :  { %1600 = vrot.lane.b32.xlu1 %v1599_v36, %s5001_s24 }
 0x1a5   :  { %1411 = vrot.lane.b32.xlu0 %v1410_v33, %s5005_s10 }
 0x1a7   :  { %1638 = vrot.lane.b32.xlu1 %v1637_v34, %s5002_s30  ;;  %v5812_v34 = vsub.s32 %v1729_v28, %v5516_v57 }
 0x1a9   :  { %1423 = vrot.lane.b32.xlu0 %v1422_v37, %s5006_s12 }
 0x1ab   :  { %1646 = vrot.lane.b32.xlu1 %v1645_v39, %s5004_s2 }
 0x1ad   :  { %1449 = vrot.lane.b32.xlu0 %v1448_v42, %s5007_s13 }
 0x1af   :  { %1654 = vrot.lane.b32.xlu1 %v1653_v44, %s5005_s10 }
 0x1b1   :  { %1468 = vrot.lane.b32.xlu0 %v1467_v46, %s5008_s14 }
 0x1b3   :  { %1676 = vrot.lane.b32.xlu1 %v1675_v40, %s5006_s12 }
 0x1b5   :  { %1480 = vrot.lane.b32.xlu0 %v1479_v48, %s5009_s15 }
 0x1b7   :  { %1691 = vrot.lane.b32.xlu1 %v1690_v49, %s5007_s13 }
 0x1b9   :  { %1492 = vrot.lane.b32.xlu0 %v1491_v50, %s5010_s1 }
 0x1bb   :  { %1699 = vrot.lane.b32.xlu1 %v1698_v51, %s5008_s14 }
 0x1bf   :  { %1707 = vrot.lane.b32.xlu1 %v1706_v41, %s5009_s15 }
 0x1f5   :  { %v1520_v22 = vpop.permute.xlu1 %1519 }
 0x1f6   :  { %v1521_v54 = vrot.slane %v1520_v22, 1 }
 0x1f7   :  { %v1272_v55 = vpop.permute.xlu0 %1271 }
 0x1f8   :  { %v1523_v56 = vsel %vm1522_vm5, %v1520_v22, %v1521_v54  ;;  %v1273_v61 = vrot.slane %v1272_v55, 7  ;;  %vm5765_vm5 = vcmp.lt.s32.totalorder %v1234_v20, 246 }
 0x1f9   :  { %1526 = vst.msk [vmem:[#allocation2 + $0x1] ss:$2 sm:$0x3] %vm5544_vm2, %v1523_v56  ;;  %v1260_v62 = vpop.permute.xlu1 %1259  ;;  %vm1312_vm2 = vcmask 293888   ;;  %vm1336_vm7 = vmand %vm5760_vm4, %vm5765_vm5  ;;  %vm5863_vm4 = vcmp.ge.s32.totalorder %v1234_v20, 113  ;;  %vm5868_vm5 = vcmp.lt.s32.totalorder %v1234_v20, 282 }
 0x1fa   :  { %1537 = vst.msk [vmem:[#allocation2 + $0x3] ss:$2 sm:$0x3] %vm1267_vm6, %v5593_v60  ;;  %v1261_v35 = vrot.slane %v1260_v62, 7  ;;  %v1275_v5 = vsel %vm1274_vm12, %v1273_v61, %v1272_v55  ;;  %v4891_v56 = vld [vmem:[%s6648_s3 + $0x288] sm:$0xff]  }
 0x1fb   :  { %v1284_v2 = vpop.permute.xlu0 %1283 }
 0x1fc   :  { %v1263_v3 = vsel %vm1262_vm9, %v1261_v35, %v1260_v62  ;;  %v1285_v4 = vrot.slane %v1284_v2, 7 }
 0x1fd   :  { %1269 = vst.msk [vmem:[#allocation2 + $0x2] ss:$2 sm:$0x3] %vm1267_vm6, %v1263_v3  ;;  %v1540_v60 = vpop.permute.xlu1 %1539  ;;  %vm1331_vm6 = vcmask 629760  }
 0x1fe   :  { %1281 = vst.msk [vmem:[#allocation2 + $0x4] ss:$2 sm:$0x3] %vm1279_vm13, %v1275_v5  ;;  %v1287_v8 = vsel %vm1286_vm14, %v1285_v4, %v1284_v2  ;;  %v1541_v9 = vrot.slane %v1540_v60, 7  ;;  %v4854_v4 = vld [vmem:[%s6648_s3 + $0x180] sm:$0xff]  }
 0x1ff   :  { %1293 = vst.msk [vmem:[#allocation2 + $0x6] ss:$2 sm:$0x7] %vm1291_vm15, %v1287_v8  ;;  %v1310_v10 = vpop.permute.xlu0 %1309 }
 0x200   :  { %v1542_v11 = vsel %vm1262_vm9, %v1541_v9, %v1540_v60  ;;  %v1311_v12 = vrot.slane %v1310_v10, 7  ;;  %vm5791_vm9 = vcmp.lt.s32.totalorder %v1234_v20, 287 }
 0x201   :  { %1545 = vst.msk [vmem:[#allocation2 + $0x5] ss:$2 sm:$0x3] %vm1279_vm13, %v1542_v11  ;;  %v1548_v13 = vpop.permute.xlu1 %1547  ;;  %vm1348_vm11 = vmand %vm5786_vm8, %vm5791_vm9  ;;  %vm5832_vm13 = vcmp.lt.s32.totalorder %v1234_v20, 200  ;;  %vm5901_vm8 = vcmp.ge.s32.totalorder %v1234_v20, 26  ;;  %vm5906_vm9 = vcmp.lt.s32.totalorder %v1234_v20, 195 }
 0x202   :  { %v1313_v18 = vsel %vm1312_vm2, %v1311_v12, %v1310_v10  ;;  %v1549_v19 = vrot.slane %v1548_v13, 7  ;;  %v4856_v11 = vld [vmem:[%s6648_s3 + $0x108] sm:$0xff]   ;;  %v4875_v10 = vld [vmem:[%s6648_s3 + $0x170] sm:$0xff]  }
 0x203   :  { %1319 = vst.msk [vmem:[#allocation2 + $0xa] ss:$2 sm:$0x3] %vm1317_vm3, %v1313_v18  ;;  %v1329_v21 = vpop.permute.xlu0 %1328 }
 0x204   :  { %v1550_v23 = vsel %vm1274_vm12, %v1549_v19, %v1548_v13  ;;  %v1330_v24 = vrot.slane %v1329_v21, 7  ;;  %vm5827_vm12 = vcmp.ge.s32.totalorder %v1234_v20, 31 }
 0x205   :  { %1553 = vst.msk [vmem:[#allocation2 + $0x7] ss:$2 sm:$0x7] %vm1291_vm15, %v1550_v23  ;;  %v1570_v25 = vpop.permute.xlu1 %1569  ;;  %vm5843_vm15 = vcmp.lt.s32.totalorder %v1234_v20, 241 }
 0x206   :  { %v1332_v29 = vsel %vm1331_vm6, %v1330_v24, %v1329_v21  ;;  %v1571_v30 = vrot.slane %v1570_v25, 1  ;;  %v4861_v21 = vld [vmem:[%s6648_s3 + $0x1d0] sm:$0xff]  }
 0x207   :  { %1338 = vst.msk [vmem:[#allocation2 + $0xc] ss:$2 sm:$0x3] %vm1336_vm7, %v1332_v29  ;;  %v1341_v31 = vpop.permute.xlu0 %1340 }
 0x208   :  { %v1572_v36 = vsel %vm1286_vm14, %v1570_v25, %v1571_v30  ;;  %v1342_v32 = vrot.slane %v1341_v31, 7  ;;  %vm5838_vm14 = vcmp.ge.s32.totalorder %v1234_v20, 72 }
 0x209   :  { %1575 = vst.msk [vmem:[#allocation2 + $0xb] ss:$2 sm:$0x3] %vm1317_vm3, %v1572_v36  ;;  %v1585_v33 = vpop.permute.xlu1 %1584  ;;  %vm1388_vm3 = vmand %vm5838_vm14, %vm5843_vm15  ;;  %v4863_v36 = vld [vmem:[%s6648_s3 + $0x158] sm:$0xff]   ;;  %vm5991_vm15 = vcmp.ge.s32.totalorder %v1234_v20, 108 }
 0x20a   :  { %v1344_v37 = vsel %vm1343_vm10, %v1342_v32, %v1341_v31  ;;  %v1586_v38 = vrot.slane %v1585_v33, 7 }
 0x20b   :  { %1350 = vst.msk [vmem:[#allocation2 + $0xe] ss:$2 sm:$0x7] %vm1348_vm11, %v1344_v37  ;;  %v1381_v39 = vpop.permute.xlu0 %1380 }
 0x20c   :  { %v1587_v42 = vsel %vm1312_vm2, %v1586_v38, %v1585_v33  ;;  %v1714_v43 = vld [vmem:[#allocation2] sm:$0xff]  ;;  %v1382_v50 = vrot.slane %v1381_v39, 7  ;;  %vm1360_vm2 = vmand %vm5827_vm12, %vm5832_vm13  ;;  %vm1426_vm12 = vcmask 547840   ;;  %v4862_v33 = vld [vmem:[%s6648_s3 + $0x190] sm:$0xff]   ;;  %vm6703_vm13 = vcmask 588800  }
 0x20d   :  { %1590 = vst.msk [vmem:[#allocation2 + $0xd] ss:$2 sm:$0x3] %vm1336_vm7, %v1587_v42  ;;  %v1593_v57 = vpop.permute.xlu1 %1592  ;;  %v1733_v46 = vrot.slane %v1714_v43, %v5812_v34  ;;  %v1726_v40 = vcombine.high %v1714_v43, %v1714_v43  ;;  %vm1407_vm7 = vmand %vm5863_vm4, %vm5868_vm5  ;;  %v4865_v43 = vld [vmem:[%s6648_s3 + $0x1d8] sm:$0xff]   ;;  %vm6031_vm5 = vcmp.ge.s32.totalorder %v1234_v20, 21 }
 0x20e   :  { %v1594_v47 = vrot.slane %v1593_v57, 7  ;;  %v1384_v35 = vsel %vm6656_vm1, %v1382_v50, %v1381_v39  ;;  %vm5931_vm1 = vcmp.ge.s32.totalorder %v1234_v20, 67  ;;  %v4867_v50 = vld [vmem:[%s6648_s3 + $0x160] sm:$0xff]  }
 0x20f   :  { %v1353_v51 = vpop.permute.xlu0 %1352  ;;  %v1741_v41 = vcombine.high %v1733_v46, %v1733_v46  ;;  %v1740_v52 = vrot.slane %v1726_v40, %v5812_v34  ;;  %v1841_v63 = vpack.c.bf16 %v1733_v46, %v1733_v46  ;;  %v4864_v40 = vld [vmem:[%s6648_s3 + $0x118] sm:$0xff]   ;;  %v4885_v46 = vld [vmem:[%s6648_s3 + $0x2c0] sm:$0xff]  }
 0x210   :  { %v1595_v53 = vsel %vm1331_vm6, %v1594_v47, %v1593_v57  ;;  %v1354_v22 = vrot.slane %v1353_v51, 7  ;;  %vm6655_vm6 = vcmask 924672  }
 0x211   :  { %1598 = vst.msk [vmem:[#allocation2 + $0xf] ss:$2 sm:$0x7] %vm1348_vm11, %v1595_v53  ;;  %v1624_v54 = vpop.permute.xlu1 %1623  ;;  %v1842_v55 = vpack.c.bf16 %v1741_v41, %v1741_v41  ;;  %v1742_v61 = vcombine.high %v1740_v52, %v1740_v52  ;;  %v1843_v60 = vpack.c.bf16 %v1740_v52, %v1740_v52  ;;  %vm1414_vm11 = vcmask 211968   ;;  %v4866_v52 = vld [vmem:[%s6648_s3 + $0x198] sm:$0xff]  }
 0x212   :  { %v1356_v62 = vsel %vm1355_vm0, %v1354_v22, %v1353_v51  ;;  %v1625_v7 = vrot.slane %v1624_v54, 7 }
 0x213   :  { %1362 = vst.msk [vmem:[#allocation2 + $0x12] ss:$2 sm:$0x3] %vm1360_vm2, %v1356_v62  ;;  %3258 = vmatprep.mubr.bf16.mxu0 %v1842_v55  ;;  %v1400_v2 = vpop.permute.xlu0 %1399  ;;  %v1844_v3 = vpack.c.bf16 %v1742_v61, %v1742_v61 }
 0x214   :  { %1390 = vst.msk [vmem:[#allocation2 + $0x14] ss:$2 sm:$0x3] %vm1388_vm3, %v1384_v35  ;;  %v1401_v5 = vrot.slane %v1400_v2, 7  ;;  %3259 = vmatmul.mubr.bf16.vlgmr.msra.gmra.mrb[16].mxu0 %v1841_v63  ;;  %v1626_v24 = vsel %vm1355_vm0, %v1625_v7, %v1624_v54  ;;  %vm5996_vm0 = vcmp.lt.s32.totalorder %v1234_v20, 277  ;;  %v4869_v54 = vld [vmem:[%s6648_s3 + $0x1e0] sm:$0xff]  }
 0x215   :  { %4340 = vmatpush3.bf16.msra.mxu0 %v4852_v59  ;;  %3298 = vmatprep.mubr.bf16.mxu1 %v1844_v3  ;;  %v1601_v8 = vpop.permute.xlu1 %1600  ;;  %vm1457_vm4 = vmand %vm5991_vm15, %vm5996_vm0  ;;  %v4868_v59 = vld [vmem:[%s6648_s3 + $0x120] sm:$0xff]   ;;  %v4871_v63 = vld [vmem:[%s6648_s3 + $0x168] sm:$0xff]   ;;  %vm3222_vm0 = vcmask 130048  }
 0x216   :  { %v1403_v12 = vsel %vm6655_vm6, %v1401_v5, %v1400_v2  ;;  %v1602_v13 = vrot.slane %v1601_v8, 1  ;;  %3299 = vmatmul.mubr.bf16.vlgmr.msra.gmra.mrb[16].mxu1 %v1843_v60  ;;  %4341 = vmatprep.subr.bf16.mxu0 %v4855_v1  ;;  %vm1419_vm6 = vmand %vm5901_vm8, %vm5906_vm9  ;;  %v4870_v35 = vld [vmem:[%s6648_s3 + $0x1a0] sm:$0xff]   ;;  %vm6069_vm9 = vcmp.ge.s32.totalorder %v1234_v20, 62  ;;  %v4872_v7 = vld [vmem:[%s6648_s3 + $0x128] sm:$0xff]  }
 0x217   :  { %1409 = vst.msk [vmem:[#allocation2 + $0x16] ss:$2 sm:$0x7] %vm1407_vm7, %v1403_v12  ;;  %4362 = vmatpush3.bf16.msra.mxu1 %v4854_v4  ;;  %v1412_v15 = vpop.permute.xlu0 %1411  ;;  %v4873_v4 = vld [vmem:[%s6648_s3 + $0x1e8] sm:$0xff]   ;;  %v4903_v60 = vld [vmem:[%s6648_s3 + $0x2a0] sm:$0xff]  }
 0x218   :  { %v1603_v17 = vsel %vm1343_vm10, %v1601_v8, %v1602_v13  ;;  %v1413_v18 = vrot.slane %v1412_v15, 7  ;;  %4363 = vmatprep.subr.bf16.mxu1 %v4857_v6  ;;  %v1715_v23 = vld [vmem:[#allocation2 + $0x8] sm:$0xff]  ;;  %vm5945_vm10 = vcmp.lt.s32.totalorder %v1234_v20, 236 }
 0x219   :  { %1606 = vst.msk [vmem:[#allocation2 + $0x13] ss:$2 sm:$0x3] %vm1360_vm2, %v1603_v17  ;;  %4342 = vmatpush3.bf16.msra.mxu0 %v4856_v11  ;;  %v1639_v25 = vpop.permute.xlu1 %1638  ;;  %v5953_v28 = vrot.slane %v1715_v23, %v5812_v34  ;;  %v1743_v29 = vcombine.high %v1715_v23, %v1715_v23  ;;  %vm1431_vm14 = vmand %vm5931_vm1, %vm5945_vm10  ;;  %vm1452_vm2 = vcmask 883712   ;;  %vm1483_vm1 = vcmask 506880   ;;  %v4874_v13 = vld [vmem:[%s6648_s3 + $0x1a8] sm:$0xff]  }
 0x21a   :  { %1629 = vst.msk [vmem:[#allocation2 + $0x15] ss:$2 sm:$0x3] %vm1388_vm3, %v1626_v24  ;;  %v1415_v30 = vsel %vm1414_vm11, %v1413_v18, %v1412_v15  ;;  %v1640_v31 = vrot.slane %v1639_v25, 7  ;;  %4343 = vmatprep.subr.bf16.mxu0 %v4859_v14  ;;  %vm6708_vm3 = vcmask 924672   ;;  %v4906_v6 = vld [vmem:[%s6648_s3 + $0x2e8] sm:$0xff]  }
 0x21b   :  { %1421 = vst.msk [vmem:[#allocation2 + $0x1a] ss:$2 sm:$0x3] %vm1419_vm6, %v1415_v30  ;;  %4364 = vmatpush3.bf16.msra.mxu1 %v4858_v16  ;;  %v1424_v32 = vpop.permute.xlu0 %1423  ;;  %v1758_v37 = vcombine.high %v5953_v28, %v5953_v28  ;;  %v5975_v38 = vrot.slane %v1743_v29, %v5812_v34  ;;  %v4877_v16 = vld [vmem:[%s6648_s3 + $0x1f0] sm:$0xff]   ;;  %v4913_v18 = vld [vmem:[%s6648_s3 + $0x238] sm:$0xff]  }
 0x21c   :  { %v1641_v39 = vsel %vm6703_vm13, %v1640_v31, %v1639_v25  ;;  %v1425_v42 = vrot.slane %v1424_v32, 7  ;;  %4365 = vmatprep.subr.bf16.mxu1 %v4861_v21  ;;  %vm6112_vm13 = vcmp.lt.s32.totalorder %v1234_v20, 272  ;;  %v4876_v21 = vld [vmem:[%s6648_s3 + $0x130] sm:$0xff]  }
 0x21d   :  { %1644 = vst.msk [vmem:[#allocation2 + $0x17] ss:$2 sm:$0x7] %vm1407_vm7, %v1641_v39  ;;  %4344 = vmatpush3.bf16.msra.mxu0 %v4860_v27  ;;  %v1647_v57 = vpop.permute.xlu1 %1646  ;;  %v1846_v44 = vpack.c.bf16 %v1758_v37, %v1758_v37  ;;  %v1759_v47 = vcombine.high %v5975_v38, %v5975_v38  ;;  %vm6036_vm7 = vcmp.lt.s32.totalorder %v1234_v20, 190  ;;  %v4878_v27 = vld [vmem:[%s6648_s3 + $0x1b0] sm:$0xff]  }
 0x21e   :  { %v1427_v48 = vsel %vm1426_vm12, %v1425_v42, %v1424_v32  ;;  %v1648_v49 = vrot.slane %v1647_v57, 1  ;;  %4345 = vmatprep.subr.bf16.mxu0 %v4863_v36  ;;  %vm1476_vm8 = vmand %vm6031_vm5, %vm6036_vm7  ;;  %v4881_v36 = vld [vmem:[%s6648_s3 + $0x1f8] sm:$0xff]   ;;  %vm3782_vm5 = vcmask 687104   ;;  %vm3864_vm7 = vcmask 1024  }
 0x21f   :  { %1433 = vst.msk [vmem:[#allocation2 + $0x1c] ss:$2 sm:$0x3] %vm1431_vm14, %v1427_v48  ;;  %4366 = vmatpush3.bf16.msra.mxu1 %v4862_v33  ;;  %3338 = vmatprep.mubr.bf16.mxu0 %v1846_v44  ;;  %v1450_v51 = vpop.permute.xlu0 %1449  ;;  %v1848_v41 = vpack.c.bf16 %v1759_v47, %v1759_v47  ;;  %v4880_v33 = vld [vmem:[%s6648_s3 + $0x138] sm:$0xff]   ;;  %v4884_v47 = vld [vmem:[%s6648_s3 + $0x200] sm:$0xff]  }
 0x220   :  { %v1649_v53 = vsel %vm6708_vm3, %v1647_v57, %v1648_v49  ;;  %v1451_v22 = vrot.slane %v1450_v51, 7  ;;  %4367 = vmatprep.subr.bf16.mxu1 %v4865_v43  ;;  %v4883_v43 = vld [vmem:[%s6648_s3 + $0x240] sm:$0xff]   ;;  %v4882_v57 = vld [vmem:[%s6648_s3 + $0x1b8] sm:$0xff]   ;;  %vm3689_vm3 = vcmask 982016  }
 0x221   :  { %1652 = vst.msk [vmem:[#allocation2 + $0x1b] ss:$2 sm:$0x3] %vm1419_vm6, %v1649_v53  ;;  %4346 = vmatpush3.bf16.msra.mxu0 %v4864_v40  ;;  %3378 = vmatprep.mubr.bf16.mxu1 %v1848_v41  ;;  %v1655_v55 = vpop.permute.xlu1 %1654  ;;  %vm1471_vm6 = vcmask 171008  }
 0x222   :  { %v1453_v61 = vsel %vm1452_vm2, %v1451_v22, %v1450_v51  ;;  %v1656_v62 = vrot.slane %v1655_v55, 7  ;;  %4347 = vmatprep.subr.bf16.mxu0 %v4867_v50  ;;  %v1845_v50 = vpack.c.bf16 %v5953_v28, %v5953_v28  ;;  %v4888_v51 = vld [vmem:[%s6648_s3 + $0x248] sm:$0xff]   ;;  %v1847_v22 = vpack.c.bf16 %v5975_v38, %v5975_v38  ;;  %v4892_v38 = vld [vmem:[%s6648_s3 + $0x250] sm:$0xff]  }
 0x223   :  { %1459 = vst.msk [vmem:[#allocation2 + $0x1e] ss:$2 sm:$0x7] %vm1457_vm4, %v1453_v61  ;;  %4368 = vmatpush3.bf16.msra.mxu1 %v4866_v52  ;;  %v1469_v1 = vpop.permute.xlu0 %1468  ;;  %v4886_v52 = vld [vmem:[%s6648_s3 + $0x280] sm:$0xff]   ;;  %v4890_v28 = vld [vmem:[%s6648_s3 + $0x2c8] sm:$0xff]   ;;  %v4896_v61 = vld [vmem:[%s6648_s3 + $0x258] sm:$0xff]  }
 0x224   :  { %v1657_v2 = vsel %vm1414_vm11, %v1656_v62, %v1655_v55  ;;  %v1470_v3 = vrot.slane %v1469_v1, 7  ;;  %4369 = vmatprep.subr.bf16.mxu1 %v4869_v54  ;;  %vm6074_vm11 = vcmp.lt.s32.totalorder %v1234_v20, 231  ;;  %v1716_v11 = vld [vmem:[#allocation2 + $0x10] sm:$0xff]  ;;  %v4889_v55 = vld [vmem:[%s6648_s3 + $0x208] sm:$0xff]  }
 0x225   :  { %1660 = vst.msk [vmem:[#allocation2 + $0x1d] ss:$2 sm:$0x3] %vm1431_vm14, %v1657_v2  ;;  %4348 = vmatpush3.bf16.msra.mxu0 %v4868_v59  ;;  %v1677_v5 = vpop.permute.xlu1 %1676  ;;  %vm1488_vm10 = vmand %vm6069_vm9, %vm6074_vm11  ;;  %v1760_v23 = vcombine.high %v1716_v11, %v1716_v11  ;;  %vm1495_vm14 = vcmask 842752   ;;  %v6132_v29 = vrot.slane %v1716_v11, %v5812_v34  ;;  %v4893_v59 = vld [vmem:[%s6648_s3 + $0x210] sm:$0xff]   ;;  %v4899_v2 = vld [vmem:[%s6648_s3 + $0x298] sm:$0xff]  }
 0x226   :  { %v1472_v8 = vsel %vm1471_vm6, %v1470_v3, %v1469_v1  ;;  %v1678_v9 = vrot.slane %v1677_v5, 7  ;;  %4349 = vmatprep.subr.bf16.mxu0 %v4871_v63  ;;  %v4895_v62 = vld [vmem:[%s6648_s3 + $0x290] sm:$0xff]   ;;  %v4898_v63 = vld [vmem:[%s6648_s3 + $0x2d8] sm:$0xff]   ;;  %v4902_v3 = vld [vmem:[%s6648_s3 + $0x2e0] sm:$0xff]  }
 0x227   :  { %1478 = vst.msk [vmem:[#allocation2 + $0x22] ss:$2 sm:$0x3] %vm1476_vm8, %v1472_v8  ;;  %4370 = vmatpush3.bf16.msra.mxu1 %v4870_v35  ;;  %v1481_v12 = vpop.permute.xlu0 %1480  ;;  %v6151_v37 = vrot.slane %v1760_v23, %v5812_v34  ;;  %v1775_v44 = vcombine.high %v6132_v29, %v6132_v29  ;;  %v4897_v1 = vld [vmem:[%s6648_s3 + $0x218] sm:$0xff]   ;;  %v4900_v35 = vld [vmem:[%s6648_s3 + $0x260] sm:$0xff]   ;;  %v4908_v8 = vld [vmem:[%s6648_s3 + $0x270] sm:$0xff]  }
 0x228   :  { %v1679_v14 = vsel %vm1426_vm12, %v1678_v9, %v1677_v5  ;;  %v1482_v15 = vrot.slane %v1481_v12, 7  ;;  %4371 = vmatprep.subr.bf16.mxu1 %v4873_v4  ;;  %vm6107_vm12 = vcmp.ge.s32.totalorder %v1234_v20, 103  ;;  %v4901_v4 = vld [vmem:[%s6648_s3 + $0x220] sm:$0xff]   ;;  %v4904_v5 = vld [vmem:[%s6648_s3 + $0x268] sm:$0xff]   ;;  %v4910_v11 = vld [vmem:[%s6648_s3 + $0x2f0] sm:$0xff]  }
 0x229   :  { %1682 = vst.msk [vmem:[#allocation2 + $0x1f] ss:$2 sm:$0x7] %vm1457_vm4, %v1679_v14  ;;  %4350 = vmatpush3.bf16.msra.mxu0 %v4872_v7  ;;  %v1692_v17 = vpop.permute.xlu1 %1691  ;;  %vm1500_vm15 = vmand %vm6107_vm12, %vm6112_vm13  ;;  %v1776_v48 = vcombine.high %v6151_v37, %v6151_v37  ;;  %v1850_v41 = vpack.c.bf16 %v1775_v44, %v1775_v44  ;;  %v4905_v7 = vld [vmem:[%s6648_s3 + $0x228] sm:$0xff]   ;;  %v4912_v14 = vld [vmem:[%s6648_s3 + $0x278] sm:$0xff]   ;;  %vm3786_vm4 = vcmask 1043456  }
 0x22a   :  { %v1484_v24 = vsel %vm1483_vm1, %v1482_v15, %v1481_v12  ;;  %v1693_v25 = vrot.slane %v1692_v17, 1  ;;  %4351 = vmatprep.subr.bf16.mxu0 %v4875_v10  ;;  %v4907_v10 = vld [vmem:[%s6648_s3 + $0x2a8] sm:$0xff]   ;;  %v4909_v12 = vld [vmem:[%s6648_s3 + $0x230] sm:$0xff]   ;;  %v4915_v23 = vld [vmem:[%s6648_s3 + $0x2b8] sm:$0xff]  }
 0x22b   :  { %1490 = vst.msk [vmem:[#allocation2 + $0x24] ss:$2 sm:$0x3] %vm1488_vm10, %v1484_v24  ;;  %4372 = vmatpush3.bf16.msra.mxu1 %v4874_v13  ;;  %v1493_v20 = vpop.permute.xlu0 %1492  ;;  %v1852_v54 = vpack.c.bf16 %v1776_v48, %v1776_v48  ;;  %v4911_v15 = vld [vmem:[%s6648_s3 + $0x2b0] sm:$0xff]   ;;  %v4929_v44 = vld [vmem:[%s6648_s3 + $0x358] sm:$0xff]  }
 0x22c   :  { %v1694_v30 = vsel %vm1452_vm2, %v1692_v17, %v1693_v25  ;;  %v1494_v31 = vrot.slane %v1493_v20, 7  ;;  %4373 = vmatprep.subr.bf16.mxu1 %v4877_v16  ;;  %v4914_v17 = vld [vmem:[%s6648_s3 + $0x2f8] sm:$0xff]   ;;  %v4918_v25 = vld [vmem:[%s6648_s3 + $0x3c0] sm:$0xff]   ;;  %vm5013_vm2 = vmmov 0  }
 0x22d   :  { %1697 = vst.msk [vmem:[#allocation2 + $0x23] ss:$2 sm:$0x3] %vm1476_vm8, %v1694_v30  ;;  %4352 = vmatpush3.bf16.msra.mxu0 %v4876_v21  ;;  %v1700_v32 = vpop.permute.xlu1 %1699  ;;  %v4916_v21 = vld [vmem:[%s6648_s3 + $0x340] sm:$0xff]   ;;  %v4921_v30 = vld [vmem:[%s6648_s3 + $0x348] sm:$0xff]   ;;  %v4932_v48 = vld [vmem:[%s6648_s3 + $0x398] sm:$0xff]  }
 0x22e   :  { %v1496_v39 = vsel %vm1495_vm14, %v1494_v31, %v1493_v20  ;;  %v1701_v42 = vrot.slane %v1700_v32, 7  ;;  %4353 = vmatprep.subr.bf16.mxu0 %v4879_v26  ;;  %v4917_v26 = vld [vmem:[%s6648_s3 + $0x300] sm:$0xff]  }
 0x22f   :  { %1502 = vst.msk [vmem:[#allocation2 + $0x26] ss:$2 sm:$0x7] %vm1500_vm15, %v1496_v39  ;;  %4374 = vmatpush3.bf16.msra.mxu1 %v4878_v27  ;;  %v1849_v27 = vpack.c.bf16 %v6132_v29, %v6132_v29  ;;  %v4923_v29 = vld [vmem:[%s6648_s3 + $0x3c8] sm:$0xff]  }
 0x230   :  { %v1702_v45 = vsel %vm1471_vm6, %v1701_v42, %v1700_v32  ;;  %4375 = vmatprep.subr.bf16.mxu1 %v4881_v36  ;;  %v1717_v9 = vld [vmem:[#allocation2 + $0x18] sm:$0xff]  ;;  %v4919_v36 = vld [vmem:[%s6648_s3 + $0x380] sm:$0xff]   ;;  %v1851_v32 = vpack.c.bf16 %v6151_v37, %v6151_v37  ;;  %v4922_v39 = vld [vmem:[%s6648_s3 + $0x308] sm:$0xff]  }
 0x231   :  { %1705 = vst.msk [vmem:[#allocation2 + $0x25] ss:$2 sm:$0x3] %vm1488_vm10, %v1702_v45  ;;  %4354 = vmatpush3.bf16.msra.mxu0 %v4880_v33  ;;  %v1708_v40 = vpop.permute.xlu1 %1707  ;;  %v1777_v13 = vcombine.high %v1717_v9, %v1717_v9  ;;  %v6269_v16 = vrot.slane %v1717_v9, %v5812_v34  ;;  %v4925_v42 = vld [vmem:[%s6648_s3 + $0x350] sm:$0xff]   ;;  %v4924_v37 = vld [vmem:[%s6648_s3 + $0x388] sm:$0xff]  }
 0x232   :  { %v1709_v49 = vrot.slane %v1708_v40, 7  ;;  %4383 = vmatprep.subr.bf16.mxu0 %v4883_v43  ;;  %v4927_v43 = vld [vmem:[%s6648_s3 + $0x3d0] sm:$0xff]  }
 0x233   :  { %4376 = vmatpush3.bf16.msra.mxu1 %v4882_v57  ;;  %v6278_v19 = vrot.slane %v1777_v13, %v5812_v34  ;;  %v1792_v24 = vcombine.high %v6269_v16, %v6269_v16  ;;  %v4926_v57 = vld [vmem:[%s6648_s3 + $0x310] sm:$0xff]  }
 0x234   :  { %v1710_v53 = vsel %vm1483_vm1, %v1709_v49, %v1708_v40  ;;  %3339 = vmatmul.mubr.bf16.vlgmr.msra.gmra.mrb[20].mxu0 %v1845_v50  ;;  %4405 = vmatprep.subr.bf16.mxu1 %v4885_v46  ;;  %v4928_v45 = vld [vmem:[%s6648_s3 + $0x390] sm:$0xff]   ;;  %v4931_v46 = vld [vmem:[%s6648_s3 + $0x3d8] sm:$0xff]   ;;  %v4935_v49 = vld [vmem:[%s6648_s3 + $0x3e0] sm:$0xff]  }
 0x235   :  { %1713 = vst.msk [vmem:[#allocation2 + $0x27] ss:$2 sm:$0x7] %vm1500_vm15, %v1710_v53  ;;  %4384 = vmatpush3.bf16.msra.mxu0 %v4884_v47  ;;  %3418 = vmatprep.mubr.bf16.mxu0 %v1850_v41  ;;  %v1793_v20 = vcombine.high %v6278_v19, %v6278_v19  ;;  %v1854_v31 = vpack.c.bf16 %v1792_v24, %v1792_v24  ;;  %v4930_v40 = vld [vmem:[%s6648_s3 + $0x318] sm:$0xff]   ;;  %v4933_v47 = vld [vmem:[%s6648_s3 + $0x360] sm:$0xff]   ;;  %v4938_v53 = vld [vmem:[%s6648_s3 + $0x328] sm:$0xff]  }
 0x236   :  { %3379 = vmatmul.mubr.bf16.vlgmr.msra.gmra.mrb[20].mxu1 %v1847_v22  ;;  %4385 = vmatprep.subr.bf16.mxu0 %v4888_v51  ;;  %v4934_v50 = vld [vmem:[%s6648_s3 + $0x320] sm:$0xff]   ;;  %v4937_v51 = vld [vmem:[%s6648_s3 + $0x368] sm:$0xff]   ;;  %v4941_v22 = vld [vmem:[%s6648_s3 + $0x370] sm:$0xff]   ;;  %v1855_v9 = vpack.c.bf16 %v6278_v19, %v6278_v19 }
 0x237   :  { %4406 = vmatpush3.bf16.msra.mxu1 %v4886_v52  ;;  %3458 = vmatprep.mubr.bf16.mxu1 %v1852_v54  ;;  %v1856_v33 = vpack.c.bf16 %v1793_v20, %v1793_v20  ;;  %v4936_v41 = vld [vmem:[%s6648_s3 + $0x3a0] sm:$0xff]   ;;  %v4939_v52 = vld [vmem:[%s6648_s3 + $0x3e8] sm:$0xff]   ;;  %v4958_v13 = vld [vmem:[%s6648_s3 + $0x450] sm:$0xff]  }
 0x238   :  { %4407 = vmatprep.subr.bf16.mxu1 %v4890_v28  ;;  %v4940_v54 = vld [vmem:[%s6648_s3 + $0x3a8] sm:$0xff]   ;;  %v4964_v19 = vld [vmem:[%s6648_s3 + $0x4d8] sm:$0xff]  }
 0x239   :  { %4386 = vmatpush3.bf16.msra.mxu0 %v4889_v55  ;;  %v4943_v55 = vld [vmem:[%s6648_s3 + $0x3f0] sm:$0xff]   ;;  %v4965_v24 = vld [vmem:[%s6648_s3 + $0x498] sm:$0xff]   ;;  %v4970_v20 = vld [vmem:[%s6648_s3 + $0x468] sm:$0xff]  }
 0x23a   :  { %4387 = vmatprep.subr.bf16.mxu0 %v4892_v38  ;;  %v4942_v38 = vld [vmem:[%s6648_s3 + $0x330] sm:$0xff]  }
 0x23b   :  { %4408 = vmatpush3.bf16.msra.mxu1 %v4891_v56 }
 0x23c   :  { %4409 = vmatprep.subr.bf16.mxu1 %v4894_v58  ;;  %v1718_v28 = vld [vmem:[#allocation2 + $0x20] sm:$0xff]  ;;  %v4945_v58 = vld [vmem:[%s6648_s3 + $0x378] sm:$0xff]  }
 0x23d   :  { %4388 = vmatpush3.bf16.msra.mxu0 %v4893_v59  ;;  %v1794_v56 = vcombine.high %v1718_v28, %v1718_v28  ;;  %v4944_v59 = vld [vmem:[%s6648_s3 + $0x3b0] sm:$0xff]  }
 0x23e   :  { %4389 = vmatprep.subr.bf16.mxu0 %v4896_v61  ;;  %v6379_v61 = vrot.slane %v1718_v28, %v5812_v34  ;;  %v4990_v28 = vld [vmem:[%s6648_s3 + $0x540] sm:$0xff]  }
 0x23f   :  { %4410 = vmatpush3.bf16.msra.mxu1 %v4895_v62  ;;  %v4947_v62 = vld [vmem:[%s6648_s3 + $0x3f8] sm:$0xff]  }
 0x240   :  { %4411 = vmatprep.subr.bf16.mxu1 %v4898_v63  ;;  %v4946_v63 = vld [vmem:[%s6648_s3 + $0x338] sm:$0xff]  }
 0x241   :  { %4390 = vmatpush3.bf16.msra.mxu0 %v4897_v1  ;;  %v6388_v1 = vrot.slane %v1794_v56, %v5812_v34  ;;  %v4950_v34 = vld [vmem:[%s6648_s3 + $0x400] sm:$0xff]  }
 0x242   :  { %4391 = vmatprep.subr.bf16.mxu0 %v4900_v35  ;;  %v4949_v35 = vld [vmem:[%s6648_s3 + $0x440] sm:$0xff]  }
 0x243   :  { %4412 = vmatpush3.bf16.msra.mxu1 %v4899_v2  ;;  %v4948_v2 = vld [vmem:[%s6648_s3 + $0x3b8] sm:$0xff]  }
 0x244   :  { %4413 = vmatprep.subr.bf16.mxu1 %v4902_v3  ;;  %v1809_v3 = vcombine.high %v6379_v61, %v6379_v61 }
 0x245   :  { %4392 = vmatpush3.bf16.msra.mxu0 %v4901_v4  ;;  %v4951_v4 = vld [vmem:[%s6648_s3 + $0x4c0] sm:$0xff]  }
 0x246   :  { %4393 = vmatprep.subr.bf16.mxu0 %v4904_v5  ;;  %v1810_v5 = vcombine.high %v6388_v1, %v6388_v1 }
 0x247   :  { %4414 = vmatpush3.bf16.msra.mxu1 %v4903_v60  ;;  %v1853_v60 = vpack.c.bf16 %v6269_v16, %v6269_v16  ;;  %v4959_v16 = vld [vmem:[%s6648_s3 + $0x410] sm:$0xff]  }
 0x248   :  { %4415 = vmatprep.subr.bf16.mxu1 %v4906_v6  ;;  %v4954_v6 = vld [vmem:[%s6648_s3 + $0x448] sm:$0xff]  }
 0x249   :  { %4394 = vmatpush3.bf16.msra.mxu0 %v4905_v7  ;;  %v1858_v7 = vpack.c.bf16 %v1809_v3, %v1809_v3 }
 0x24a   :  { %4395 = vmatprep.subr.bf16.mxu0 %v4908_v8  ;;  %v4952_v8 = vld [vmem:[%s6648_s3 + $0x480] sm:$0xff]  }
 0x24b   :  { %4416 = vmatpush3.bf16.msra.mxu1 %v4907_v10  ;;  %v4956_v10 = vld [vmem:[%s6648_s3 + $0x4c8] sm:$0xff]  }
 0x24c   :  { %4417 = vmatprep.subr.bf16.mxu1 %v4910_v11  ;;  %v1860_v11 = vpack.c.bf16 %v1810_v5, %v1810_v5  ;;  %v3668_v5 = vld [vmem:[%s6650_s5 + $0x8] sm:$0xff] }
 0x24d   :  { %4396 = vmatpush3.bf16.msra.mxu0 %v4909_v12  ;;  %v4955_v12 = vld [vmem:[%s6648_s3 + $0x408] sm:$0xff]  }
 0x24e   :  { %4397 = vmatprep.subr.bf16.mxu0 %v4912_v14  ;;  %v4957_v14 = vld [vmem:[%s6648_s3 + $0x488] sm:$0xff]  }
 0x24f   :  { %4418 = vmatpush3.bf16.msra.mxu1 %v4911_v15  ;;  %v4960_v15 = vld [vmem:[%s6648_s3 + $0x4d0] sm:$0xff]  }
 0x250   :  { %4419 = vmatprep.subr.bf16.mxu1 %v4914_v17  ;;  %v4962_v17 = vld [vmem:[%s6648_s3 + $0x458] sm:$0xff]  }
 0x251   :  { %4398 = vmatpush3.bf16.msra.mxu0 %v4913_v18  ;;  %v4961_v18 = vld [vmem:[%s6648_s3 + $0x490] sm:$0xff]  }
 0x252   :  { %4427 = vmatprep.subr.bf16.mxu0 %v4916_v21  ;;  %v4963_v21 = vld [vmem:[%s6648_s3 + $0x418] sm:$0xff]  }
 0x253   :  { %4420 = vmatpush3.bf16.msra.mxu1 %v4915_v23  ;;  %v4966_v23 = vld [vmem:[%s6648_s3 + $0x460] sm:$0xff]  }
 0x254   :  { %3419 = vmatmul.mubr.bf16.vlgmr.msra.gmra.mrb[24].mxu0 %v1849_v27  ;;  %4449 = vmatprep.subr.bf16.mxu1 %v4918_v25  ;;  %v4968_v25 = vld [vmem:[%s6648_s3 + $0x4e0] sm:$0xff]  }
 0x255   :  { %4428 = vmatpush3.bf16.msra.mxu0 %v4917_v26  ;;  %3498 = vmatprep.mubr.bf16.mxu0 %v1854_v31  ;;  %v4967_v26 = vld [vmem:[%s6648_s3 + $0x420] sm:$0xff]   ;;  %v4971_v31 = vld [vmem:[%s6648_s3 + $0x428] sm:$0xff]  }
 0x256   :  { %3459 = vmatmul.mubr.bf16.vlgmr.msra.gmra.mrb[24].mxu1 %v1851_v32  ;;  %4429 = vmatprep.subr.bf16.mxu0 %v4921_v30  ;;  %v4969_v27 = vld [vmem:[%s6648_s3 + $0x4a0] sm:$0xff]   ;;  %v4972_v30 = vld [vmem:[%s6648_s3 + $0x4e8] sm:$0xff]  }
 0x257   :  { %4450 = vmatpush3.bf16.msra.mxu1 %v4919_v36  ;;  %3538 = vmatprep.mubr.bf16.mxu1 %v1856_v33  ;;  %v4974_v36 = vld [vmem:[%s6648_s3 + $0x470] sm:$0xff]   ;;  %v4973_v32 = vld [vmem:[%s6648_s3 + $0x4a8] sm:$0xff]  }
 0x258   :  { %4451 = vmatprep.subr.bf16.mxu1 %v4923_v29  ;;  %v4976_v29 = vld [vmem:[%s6648_s3 + $0x4f0] sm:$0xff]  }
 0x259   :  { %4430 = vmatpush3.bf16.msra.mxu0 %v4922_v39  ;;  %v4975_v33 = vld [vmem:[%s6648_s3 + $0x430] sm:$0xff]   ;;  %v4978_v39 = vld [vmem:[%s6648_s3 + $0x478] sm:$0xff]  }
 0x25a   :  { %4431 = vmatprep.subr.bf16.mxu0 %v4925_v42  ;;  %v4977_v42 = vld [vmem:[%s6648_s3 + $0x4b0] sm:$0xff]  }
 0x25b   :  { %4452 = vmatpush3.bf16.msra.mxu1 %v4924_v37  ;;  %v4980_v37 = vld [vmem:[%s6648_s3 + $0x4f8] sm:$0xff]  }
 0x25c   :  { %4453 = vmatprep.subr.bf16.mxu1 %v4927_v43  ;;  %v4118_v43 = vld.sshfl [vmem:[#allocation2 + $0x28] sm:$0x33 pattern:$0x76325410] }
 0x25d   :  { %4432 = vmatpush3.bf16.msra.mxu0 %v4926_v57  ;;  %v4979_v57 = vld [vmem:[%s6648_s3 + $0x438] sm:$0xff]  }
 0x25e   :  { %4433 = vmatprep.subr.bf16.mxu0 %v4929_v44  ;;  %v4981_v44 = vld [vmem:[%s6648_s3 + $0x4b8] sm:$0xff]  }
 0x25f   :  { %4454 = vmatpush3.bf16.msra.mxu1 %v4928_v45  ;;  %v1818_v45 = vcombine.high %v4118_v43, %v4118_v43 }
 0x260   :  { %4455 = vmatprep.subr.bf16.mxu1 %v4931_v46  ;;  %v4982_v46 = vld [vmem:[%s6648_s3 + $0x500] sm:$0xff]  }
 0x261   :  { %4434 = vmatpush3.bf16.msra.mxu0 %v4930_v40  ;;  %v1857_v40 = vpack.c.bf16 %v6379_v61, %v6379_v61 }
 0x262   :  { %4435 = vmatprep.subr.bf16.mxu0 %v4933_v47  ;;  %v1862_v47 = vpack.c.bf16 %v1818_v45, %v1818_v45 }
 0x263   :  { %4456 = vmatpush3.bf16.msra.mxu1 %v4932_v48  ;;  %v1859_v48 = vpack.c.bf16 %v6388_v1, %v6388_v1 }
 0x264   :  { %4457 = vmatprep.subr.bf16.mxu1 %v4935_v49  ;;  %v4983_v49 = vld [vmem:[%s6648_s3 + $0x508] sm:$0xff]  }
 0x265   :  { %4436 = vmatpush3.bf16.msra.mxu0 %v4934_v50  ;;  %v4984_v50 = vld [vmem:[%s6648_s3 + $0x510] sm:$0xff]  }
 0x266   :  { %4437 = vmatprep.subr.bf16.mxu0 %v4937_v51  ;;  %v4985_v51 = vld [vmem:[%s6648_s3 + $0x518] sm:$0xff]  }
 0x267   :  { %4458 = vmatpush3.bf16.msra.mxu1 %v4936_v41  ;;  %v4986_v41 = vld [vmem:[%s6648_s3 + $0x520] sm:$0xff]  }
 0x268   :  { %4459 = vmatprep.subr.bf16.mxu1 %v4939_v52  ;;  %v4987_v52 = vld [vmem:[%s6648_s3 + $0x528] sm:$0xff]  }
 0x269   :  { %4438 = vmatpush3.bf16.msra.mxu0 %v4938_v53  ;;  %v4988_v53 = vld [vmem:[%s6648_s3 + $0x530] sm:$0xff]  }
 0x26a   :  { %4439 = vmatprep.subr.bf16.mxu0 %v4941_v22  ;;  %v4989_v22 = vld [vmem:[%s6648_s3 + $0x538] sm:$0xff]  }
 0x26b   :  { %4460 = vmatpush3.bf16.msra.mxu1 %v4940_v54  ;;  %v1861_v54 = vpack.c.bf16 %v4118_v43, %v4118_v43  ;;  %v5014_v43 = vmov 0.0  }
 0x26c   :  { %4461 = vmatprep.subr.bf16.mxu1 %v4943_v55 }
 0x26d   :  { %4440 = vmatpush3.bf16.msra.mxu0 %v4942_v38  ;;  %v4119_v38 = vld [vmem:[%s6649_s4] ss:$0 sm:$0xff] }
 0x26e   :  { %4441 = vmatprep.subr.bf16.mxu0 %v4945_v58 }
 0x26f   :  { %4462 = vmatpush3.bf16.msra.mxu1 %v4944_v59 }
 0x270   :  { %4463 = vmatprep.subr.bf16.mxu1 %v4947_v62 }
 0x271   :  { %4442 = vmatpush3.bf16.msra.mxu0 %v4946_v63 }
 0x272   :  { %4471 = vmatprep.subr.bf16.mxu0 %v4949_v35 }
 0x273   :  { %4464 = vmatpush3.bf16.msra.mxu1 %v4948_v2 }
 0x274   :  { %3499 = vmatmul.mubr.bf16.vlgmr.msra.gmra.mrb[28].mxu0 %v1853_v60  ;;  %4493 = vmatprep.subr.bf16.mxu1 %v4951_v4  ;;  %v3669_v60 = vld [vmem:[%s6650_s5 + $0x10] sm:$0xff] }
 0x275   :  { %4472 = vmatpush3.bf16.msra.mxu0 %v4950_v34  ;;  %3578 = vmatprep.mubr.bf16.mxu0 %v1858_v7  ;;  %v3667_v34 = vld [vmem:[%s6650_s5] sm:$0xff]  ;;  %v3670_v7 = vld [vmem:[%s6650_s5 + $0x18] sm:$0xff] }
 0x276   :  { %3539 = vmatmul.mubr.bf16.vlgmr.msra.gmra.mrb[28].mxu1 %v1855_v9  ;;  %4473 = vmatprep.subr.bf16.mxu0 %v4954_v6  ;;  %v4602_v6 = vpack.c.bf16 %v3668_v5, %v3667_v34  ;;  %v3671_v9 = vld [vmem:[%s6650_s5 + $0x20] sm:$0xff] }
 0x277   :  { %4494 = vmatpush3.bf16.msra.mxu1 %v4952_v8  ;;  %3618 = vmatprep.mubr.bf16.mxu1 %v1860_v11  ;;  %v4605_v8 = vpack.c.bf16 %v3670_v7, %v3669_v60 }
 0x278   :  { %4495 = vmatprep.subr.bf16.mxu1 %v4956_v10  ;;  %v3672_v10 = vld [vmem:[%s6650_s5 + $0x28] sm:$0xff] }
 0x279   :  { %4474 = vmatpush3.bf16.msra.mxu0 %v4955_v12  ;;  %v4608_v11 = vpack.c.bf16 %v3672_v10, %v3671_v9  ;;  %v3673_v12 = vld [vmem:[%s6650_s5 + $0x30] sm:$0xff] }
 0x27a   :  { %4475 = vmatprep.subr.bf16.mxu0 %v4958_v13  ;;  %v3674_v13 = vld [vmem:[%s6650_s5 + $0x38] sm:$0xff] }
 0x27b   :  { %4496 = vmatpush3.bf16.msra.mxu1 %v4957_v14  ;;  %v4611_v14 = vpack.c.bf16 %v3674_v13, %v3673_v12  ;;  %v3765_v12 = vld [vmem:[%s6651_s7 + $0x8] sm:$0xff] }
 0x27c   :  { %4497 = vmatprep.subr.bf16.mxu1 %v4960_v15  ;;  %v3675_v15 = vld [vmem:[%s6650_s5 + $0x40] sm:$0xff] }
 0x27d   :  { %4476 = vmatpush3.bf16.msra.mxu0 %v4959_v16  ;;  %v3676_v16 = vld [vmem:[%s6650_s5 + $0x48] sm:$0xff] }
 0x27e   :  { %4477 = vmatprep.subr.bf16.mxu0 %v4962_v17  ;;  %v4614_v17 = vpack.c.bf16 %v3676_v16, %v3675_v15 }
 0x27f   :  { %4498 = vmatpush3.bf16.msra.mxu1 %v4961_v18  ;;  %v3677_v18 = vld [vmem:[%s6650_s5 + $0x50] sm:$0xff] }
 0x280   :  { %4499 = vmatprep.subr.bf16.mxu1 %v4964_v19  ;;  %v3678_v19 = vld [vmem:[%s6650_s5 + $0x58] sm:$0xff] }
 0x281   :  { %4478 = vmatpush3.bf16.msra.mxu0 %v4963_v21  ;;  %v4617_v21 = vpack.c.bf16 %v3678_v19, %v3677_v18 }
 0x282   :  { %4479 = vmatprep.subr.bf16.mxu0 %v4966_v23 }
 0x283   :  { %4500 = vmatpush3.bf16.msra.mxu1 %v4965_v24 }
 0x284   :  { %4501 = vmatprep.subr.bf16.mxu1 %v4968_v25 }
 0x285   :  { %4480 = vmatpush3.bf16.msra.mxu0 %v4967_v26 }
 0x286   :  { %4481 = vmatprep.subr.bf16.mxu0 %v4970_v20 }
 0x287   :  { %4502 = vmatpush3.bf16.msra.mxu1 %v4969_v27 }
 0x288   :  { %4503 = vmatprep.subr.bf16.mxu1 %v4972_v30 }
 0x289   :  { %4482 = vmatpush3.bf16.msra.mxu0 %v4971_v31 }
 0x28a   :  { %4483 = vmatprep.subr.bf16.mxu0 %v4974_v36 }
 0x28b   :  { %4504 = vmatpush3.bf16.msra.mxu1 %v4973_v32 }
 0x28c   :  { %4505 = vmatprep.subr.bf16.mxu1 %v4976_v29 }
 0x28d   :  { %4484 = vmatpush3.bf16.msra.mxu0 %v4975_v33 }
 0x28e   :  { %4485 = vmatprep.subr.bf16.mxu0 %v4978_v39  ;;  %v3679_v39 = vld [vmem:[%s6650_s5 + $0x60] sm:$0xff] }
 0x28f   :  { %4506 = vmatpush3.bf16.msra.mxu1 %v4977_v42  ;;  %v3680_v42 = vld [vmem:[%s6650_s5 + $0x68] sm:$0xff] }
 0x290   :  { %4507 = vmatprep.subr.bf16.mxu1 %v4980_v37  ;;  %v4620_v37 = vpack.c.bf16 %v3680_v42, %v3679_v39  ;;  %v4290_v39 = vld [vmem:[%s6653_s6] ss:$0 sm:$0xff] }
 0x291   :  { %4486 = vmatpush3.bf16.msra.mxu0 %v4979_v57  ;;  %v3681_v57 = vld [vmem:[%s6650_s5 + $0x70] sm:$0xff] }
 0x292   :  { %3626 = vmatprep.subr.bf16.mxu0 %v4993_v0 }
 0x293   :  { %4508 = vmatpush3.bf16.msra.mxu1 %v4981_v44 }
 0x294   :  { %3579 = vmatmul.mubr.bf16.vlgmr.msra.gmra.mrb[32].mxu0 %v1857_v40 }
 0x295   :  { %3627 = vmatpush1.bf16.msra.mxu0 %v4982_v46  ;;  %4289 = vmatprep.mubr.msk.bf16.mxu0 %vm3222_vm0, %v1862_v47 }
 0x296   :  { %3619 = vmatmul.mubr.bf16.vlgmr.msra.gmra.mrb[32].mxu1 %v1859_v48  ;;  %3628 = vmatprep.subr.bf16.mxu0 %v4993_v0 }
 0x297   :  { %4573 = vmatprep.mubr.msk.f32.mxu1 %vm5013_vm2, %v5014_v43 }
 0x299   :  { %3629 = vmatpush1.bf16.msra.mxu0 %v4983_v49 }
 0x29a   :  { %3630 = vmatprep.subr.bf16.mxu0 %v4993_v0 }
 0x29d   :  { %3631 = vmatpush1.bf16.msra.mxu0 %v4984_v50 }
 0x29e   :  { %3632 = vmatprep.subr.bf16.mxu0 %v4993_v0 }
 0x2a1   :  { %3633 = vmatpush1.bf16.msra.mxu0 %v4985_v51 }
 0x2a2   :  { %3634 = vmatprep.subr.bf16.mxu0 %v4993_v0 }
 0x2a5   :  { %3635 = vmatpush1.bf16.msra.mxu0 %v4986_v41 }
 0x2a6   :  { %3636 = vmatprep.subr.bf16.mxu0 %v4993_v0 }
 0x2a9   :  { %3637 = vmatpush1.bf16.msra.mxu0 %v4987_v52 }
 0x2aa   :  { %3638 = vmatprep.subr.bf16.mxu0 %v4993_v0 }
 0x2ad   :  { %3639 = vmatpush1.bf16.msra.mxu0 %v4988_v53 }
 0x2ae   :  { %3640 = vmatprep.subr.bf16.mxu0 %v4993_v0 }
 0x2b1   :  { %3641 = vmatpush1.bf16.msra.mxu0 %v4989_v22 }
 0x2b2   :  { %3642 = vmatprep.subr.bf16.mxu0 %v4993_v0  ;;  %v5012_v0 = vmov 0.0|0.0  }
 0x2b3   :  { %4601 = vmatprep.subr.bf16.mxu1 %v5012_v0 }
 0x2b4   :  { %4603 = vmatpush3.bf16.msra.mxu1 %v4602_v6 }
 0x2b5   :  { %3643 = vmatpush1.bf16.msra.mxu0 %v4990_v28  ;;  %4604 = vmatprep.subr.bf16.mxu1 %v5012_v0 }
 0x2b8   :  { %3659 = vmatmul.mubr.bf16.vlgmr.msra.gmra.mrb[36].mxu0 %v1861_v54  ;;  %4606 = vmatpush3.bf16.msra.mxu1 %v4605_v8 }
 0x2b9   :  { %4607 = vmatprep.subr.bf16.mxu1 %v5012_v0 }
 0x2bc   :  { %4609 = vmatpush3.bf16.msra.mxu1 %v4608_v11  ;;  %v3764_v11 = vld [vmem:[%s6651_s7] sm:$0xff] }
 0x2bd   :  { %4610 = vmatprep.subr.bf16.mxu1 %v5012_v0 }
 0x2c0   :  { %4612 = vmatpush3.bf16.msra.mxu1 %v4611_v14 }
 0x2c1   :  { %4613 = vmatprep.subr.bf16.mxu1 %v5012_v0 }
 0x2c4   :  { %4615 = vmatpush3.bf16.msra.mxu1 %v4614_v17  ;;  %v4623_v17 = vpack.c.bf16 %v3765_v12, %v3764_v11 }
 0x2c5   :  { %4616 = vmatprep.subr.bf16.mxu1 %v5012_v0 }
 0x2c8   :  { %4618 = vmatpush3.bf16.msra.mxu1 %v4617_v21  ;;  %v3766_v21 = vld [vmem:[%s6651_s7 + $0x10] sm:$0xff] }
 0x2c9   :  { %4619 = vmatprep.subr.bf16.mxu1 %v5012_v0 }
 0x2cc   :  { %4621 = vmatpush3.bf16.msra.mxu1 %v4620_v37 }
 0x2cd   :  { %4571 = vmatprep.subr.mxu1 %v5014_v43 }
 0x2d0   :  { %4572 = vmatpush3.msra.mxu1 %v3681_v57 }
 0x2d1   :  { %4622 = vmatprep.subr.bf16.mxu1 %v5012_v0 }
 0x2e7   :  { %v4311_v55 = vpop.f32.mrb[16].mxu0 }
 0x2e8   :  { %v4312_v56 = vpop.f32.mrb[17].mxu0 }
 0x2e9   :  { %v4313_v58 = vadd.f32 %v4312_v56, %v4311_v55  ;;  %v4314_v59 = vpop.f32.mrb[18].mxu0  ;;  %v4333_v61 = vpop.f32.mrb[16].mxu1 }
 0x2ea   :  { %v4315_v62 = vpop.f32.mrb[19].mxu0  ;;  %v4334_v63 = vpop.f32.mrb[17].mxu1 }
 0x2eb   :  { %v3261_v1 = vadd.f32 %v4313_v58, %v4119_v38  ;;  %v4335_v35 = vadd.f32 %v4334_v63, %v4333_v61  ;;  %v4336_v2 = vpop.f32.mrb[18].mxu1 }
 0x2ec   :  { %v4337_v3 = vpop.f32.mrb[19].mxu1 }
 0x2ed   :  { %v3301_v4 = vadd.f32 %v4335_v35, %v3261_v1 }
 0x307   :  { %v4355_v23 = vpop.f32.mrb[20].mxu0 }
 0x308   :  { %v4356_v24 = vpop.f32.mrb[21].mxu0 }
 0x309   :  { %v4357_v25 = vadd.f32 %v4356_v24, %v4355_v23  ;;  %v4358_v26 = vpop.f32.mrb[22].mxu0  ;;  %v4377_v20 = vpop.f32.mrb[20].mxu1  ;;  %v3767_v23 = vld [vmem:[%s6651_s7 + $0x18] sm:$0xff] }
 0x30a   :  { %v4359_v27 = vpop.f32.mrb[23].mxu0  ;;  %v4378_v30 = vpop.f32.mrb[21].mxu1  ;;  %v4626_v24 = vpack.c.bf16 %v3767_v23, %v3766_v21  ;;  %v3769_v26 = vld [vmem:[%s6651_s7 + $0x28] sm:$0xff] }
 0x30b   :  { %v3341_v31 = vadd.f32 %v4357_v25, %v3301_v4  ;;  %v4379_v36 = vadd.f32 %v4378_v30, %v4377_v20  ;;  %v4380_v32 = vpop.f32.mrb[22].mxu1  ;;  %v3768_v25 = vld [vmem:[%s6651_s7 + $0x20] sm:$0xff]  ;;  %v3770_v27 = vld [vmem:[%s6651_s7 + $0x30] sm:$0xff]  ;;  %v3771_v30 = vld [vmem:[%s6651_s7 + $0x38] sm:$0xff] }
 0x30c   :  { %v4381_v29 = vpop.f32.mrb[23].mxu1  ;;  %v4629_v20 = vpack.c.bf16 %v3769_v26, %v3768_v25  ;;  %v3773_v32 = vld [vmem:[%s6651_s7 + $0x48] sm:$0xff] }
 0x30d   :  { %v3381_v33 = vadd.f32 %v4379_v36, %v3341_v31  ;;  %v4632_v31 = vpack.c.bf16 %v3771_v30, %v3770_v27  ;;  %v3772_v36 = vld [vmem:[%s6651_s7 + $0x40] sm:$0xff] }
 0x30e   :  { %v4635_v29 = vpack.c.bf16 %v3773_v32, %v3772_v36 }
 0x327   :  { %v4399_v44 = vpop.f32.mrb[24].mxu0 }
 0x328   :  { %v4400_v45 = vpop.f32.mrb[25].mxu0 }
 0x329   :  { %v4401_v46 = vadd.f32 %v4400_v45, %v4399_v44  ;;  %v4402_v40 = vpop.f32.mrb[26].mxu0  ;;  %v4421_v47 = vpop.f32.mrb[24].mxu1 }
 0x32a   :  { %v4403_v48 = vpop.f32.mrb[27].mxu0  ;;  %v4422_v49 = vpop.f32.mrb[25].mxu1 }
 0x32b   :  { %v3421_v50 = vadd.f32 %v4401_v46, %v3381_v33  ;;  %v4423_v51 = vadd.f32 %v4422_v49, %v4421_v47  ;;  %v4424_v41 = vpop.f32.mrb[26].mxu1  ;;  %v14_v33 = vstv %s6652_s8 }
 0x32c   :  { %v4425_v52 = vpop.f32.mrb[27].mxu1  ;;  %15 = vst [vmem:[#allocation3] sm:$0x1] %v14_v33 }
 0x32d   :  { %v3461_v53 = vadd.f32 %v4423_v51, %v3421_v50 }
 0x333   :  { %v4292_v45 = vld [vmem:[#allocation3] ss:$0 sm:$0xff] }
 0x347   :  { %v4443_v22 = vpop.f32.mrb[28].mxu0 }
 0x348   :  { %v4444_v28 = vpop.f32.mrb[29].mxu0 }
 0x349   :  { %v4445_v54 = vadd.f32 %v4444_v28, %v4443_v22  ;;  %v4446_v55 = vpop.f32.mrb[30].mxu0  ;;  %v4465_v38 = vpop.f32.mrb[28].mxu1 }
 0x34a   :  { %v4447_v56 = vpop.f32.mrb[31].mxu0  ;;  %v4466_v58 = vpop.f32.mrb[29].mxu1 }
 0x34b   :  { %v3501_v59 = vadd.f32 %v4445_v54, %v3461_v53  ;;  %v4467_v61 = vadd.f32 %v4466_v58, %v4465_v38  ;;  %v4468_v62 = vpop.f32.mrb[30].mxu1 }
 0x34c   :  { %v4469_v63 = vpop.f32.mrb[31].mxu1 }
 0x34d   :  { %v3541_v1 = vadd.f32 %v4467_v61, %v3501_v59 }
 0x367   :  { %v4487_v35 = vpop.f32.mrb[32].mxu0 }
 0x368   :  { %v4488_v2 = vpop.f32.mrb[33].mxu0 }
 0x369   :  { %v4489_v3 = vadd.f32 %v4488_v2, %v4487_v35  ;;  %v4490_v4 = vpop.f32.mrb[34].mxu0  ;;  %v4509_v34 = vpop.f32.mrb[32].mxu1 }
 0x36a   :  { %v4491_v5 = vpop.f32.mrb[35].mxu0  ;;  %v4510_v60 = vpop.f32.mrb[33].mxu1 }
 0x36b   :  { %v3581_v6 = vadd.f32 %v4489_v3, %v3541_v1  ;;  %v4511_v7 = vadd.f32 %v4510_v60, %v4509_v34  ;;  %v4512_v8 = vpop.f32.mrb[34].mxu1 }
 0x36c   :  { %v4513_v9 = vpop.f32.mrb[35].mxu1 }
 0x36d   :  { %v3621_v10 = vadd.f32 %v4511_v7, %v3581_v6 }
 0x38b   :  { %v3660_v13 = vpop.f32.mrb[36].mxu0 }
 0x38c   :  { %v3661_v14 = vadd.f32 %v3660_v13, %v3621_v10  ;;  %v3662_v15 = vpop.f32.mrb[37].mxu0 }
 0x38d   :  { %v3663_v16 = vpop.f32.mrb[38].mxu0 }
 0x38e   :  { %v3666_v18 = vmax.f32 %v3661_v14, 0.0  ;;  %v3664_v19 = vpop.f32.mrb[39].mxu0 }
 0x390   :  { %4574 = vmatmul.mubr.msk.f32.vlgmr.msra.gmra.mrb[36].mxu1 %vm3689_vm3, %v3666_v18 }
 0x391   :  { %4624 = vmatpush3.bf16.msra.mxu1 %v4623_v17  ;;  %4598 = vmatprep.mubr.msk.f32.mxu1 %vm5013_vm2, %v5014_v43 }
 0x392   :  { %4625 = vmatprep.subr.bf16.mxu1 %v5012_v0 }
 0x395   :  { %4627 = vmatpush3.bf16.msra.mxu1 %v4626_v24 }
 0x396   :  { %4628 = vmatprep.subr.bf16.mxu1 %v5012_v0 }
 0x399   :  { %4630 = vmatpush3.bf16.msra.mxu1 %v4629_v20 }
 0x39a   :  { %4631 = vmatprep.subr.bf16.mxu1 %v5012_v0 }
 0x39d   :  { %4633 = vmatpush3.bf16.msra.mxu1 %v4632_v31 }
 0x39e   :  { %4634 = vmatprep.subr.bf16.mxu1 %v5012_v0  ;;  %v3774_v0 = vld [vmem:[%s6651_s7 + $0x50] sm:$0xf] }
 0x3a1   :  { %4636 = vmatpush3.bf16.msra.mxu1 %v4635_v29 }
 0x3a2   :  { %4596 = vmatprep.subr.mxu1 %v5014_v43 }
 0x3a5   :  { %4597 = vmatpush3.msk.msra.mxu1 %vm3786_vm4, %v3774_v0 }
 0x463   :  { %v3759_v42 = vpop.f32.mrb[36].mxu1 }
 0x464   :  { %v3760_v37 = vadd.f32 %v4290_v39, %v3759_v42  ;;  %v4575_v57 = vpop.f32.mrb[37].mxu1 }
 0x466   :  { %v3763_v44 = vmax.f32 %v3760_v37, 0.0 }
 0x468   :  { %4599 = vmatmul.mubr.msk.f32.vlgmr.msra.gmra.mrb[38].mxu1 %vm3782_vm5, %v3763_v44 }
 0x53b   :  { %v3856_v46 = vpop.f32.mrb[38].mxu1 }
 0x53c   :  { %v3857_v43 = vadd.f32 %v4292_v45, %v3856_v46  ;;  %v4600_v40 = vpop.f32.mrb[39].mxu1 }
 0x53e   :  { %v3860_v47 = vmul.f32 0.5, %v3857_v43 }
 0x540   :  { %4991 = vtanh.f32 %v3860_v47 }
 0x54a   :  { %v4992_v48 = vpop.eup %4991 }
 0x54b   :  { %v3862_v49 = vadd.f32 1.0, %v4992_v48 }
 0x54d   :  { %v3863_v50 = vmul.f32 0.5, %v3862_v49 }
 0x54f   :  { %3865 = vst.msk [vmem:[%s6654_s9] sm:$0x3] %vm3864_vm7, %v3863_v50 }

</bundles_post_ra>
